<compile_context>
chip_gen: v6e
topology: v6e:2x2x1
jax: 0.10.0
libtpu: 0.0.40
codegen_flags: <defaults>
</compile_context>

<pallas_src>
import functools

import numpy as np

import jax
import jax.numpy as jnp
from jax.experimental import pallas as pl
from jax.experimental.pallas import tpu as pltpu


# ----------------------------------------------------------------------------
# Fused conv(3x3, valid) + bias + ReLU + maxpool(2,2) kernel
# ----------------------------------------------------------------------------

def conv_pool_kernel(x_ref, w_ref, b_ref, s_ref, o_ref, *, W, OH):
    """One image per grid step.

    x_ref: (R, Cin)   flat NHWC image rows r = h*W + w (R >= OH*W + 2*W + 2;
                      the extra rows are zero padding so shifted slices stay
                      in bounds).
    w_ref: (9, Cin, Cout)  slice [dy*3+dx] is the (Cin, Cout) tap for (dy, dx).
    b_ref: (1, Cout)
    s_ref: (out_rows, OH*W - W - 1)  0/1 pool-selection matrix; all-zero rows
                      produce the zero pad rows the next conv layer reads.
    o_ref: (out_rows, Cout)  pooled rows r = ph*PW + pw (+ zero pad rows).
    """
    M = OH * W  # conv output rows computed (columns >= OW are wrap garbage,
                # never selected by s_ref)

    # in-kernel im2col: 9 shifted matmuls over the VMEM-resident flat image
    acc = jnp.dot(x_ref[0:M, :], w_ref[0], preferred_element_type=jnp.float32)
    for k in range(1, 9):
        off = (k // 3) * W + (k % 3)
        acc = acc + jnp.dot(x_ref[off:off + M, :], w_ref[k],
                            preferred_element_type=jnp.float32)

    # fused epilogue: bias + ReLU
    y = jnp.maximum(acc + b_ref[...], 0.0)                 # (M, Cout)

    # 2x2 window max at every flat position r via overlapping-slice maxima:
    #   m[r] = max(y[r], y[r+1], y[r+W], y[r+W+1])
    h = jnp.maximum(y[:M - 1, :], y[1:, :])
    m = jnp.maximum(h[:M - 1 - W, :], h[W:, :])            # (M-1-W, Cout)

    # stride-2 corner gather as a 0/1 selection matmul (exact, runs on MXU)
    o_ref[...] = jnp.dot(s_ref[...], m, preferred_element_type=jnp.float32)


def _pool_select(OH, OW, W, out_rows):
    """Selection matrix: row ph*PW+pw picks flat position 2*ph*W + 2*pw.

    Extra all-zero rows (out_rows > PH*PW) yield the zero pad rows required by
    the next conv layer's shifted slices.  Built once on the host (constant).
    """
    PH, PW = OH // 2, OW // 2
    S = np.zeros((out_rows, OH * W - W - 1), np.float32)
    for ph in range(PH):
        for pw in range(PW):
            S[ph * PW + pw, 2 * ph * W + 2 * pw] = 1.0
    return jnp.asarray(S)


def conv_relu_pool(x_flat, w, b, S, *, W, OH):
    """x_flat: (B, R, Cin) padded flat NHWC images -> (B, out_rows, Cout)."""
    B, R, Cin = x_flat.shape
    Cout = w.shape[2]
    out_rows = S.shape[0]
    return pl.pallas_call(
        functools.partial(conv_pool_kernel, W=W, OH=OH),
        out_shape=jax.ShapeDtypeStruct((B, out_rows, Cout), jnp.float32),
        grid=(B,),
        in_specs=[
            pl.BlockSpec((None, R, Cin), lambda i: (i, 0, 0)),       # per-image
            pl.BlockSpec((9, Cin, Cout), lambda i: (0, 0, 0)),       # resident
            pl.BlockSpec((1, Cout), lambda i: (0, 0)),               # resident
            pl.BlockSpec((out_rows, S.shape[1]), lambda i: (0, 0)),  # resident
        ],
        out_specs=pl.BlockSpec((None, out_rows, Cout), lambda i: (i, 0, 0)),
        compiler_params=pltpu.CompilerParams(
            dimension_semantics=("parallel",),        # v7x: 2 TCs split batch
            vmem_limit_bytes=32 * 1024 * 1024,        # explicit (v7x headroom)
        ),
    )(x_flat, w, b.reshape(1, Cout), S)


# ----------------------------------------------------------------------------
# Fused dueling head: FC -> ReLU -> FC (adv & val) -> dueling -> softmax(atoms)
# ----------------------------------------------------------------------------

def dueling_head_kernel(f_ref, aw1_ref, ab1_ref, aw2_ref, ab2_ref,
                        vw1_ref, vb1_ref, vw2_ref, vb2_ref, o_ref, *, A, Z):
    """All weights (<0.5 MiB) and intermediates stay in VMEM; single launch."""
    f = f_ref[...]
    ah = jnp.maximum(
        jnp.dot(f, aw1_ref[...], preferred_element_type=jnp.float32)
        + ab1_ref[...], 0.0)
    adv = (jnp.dot(ah, aw2_ref[...], preferred_element_type=jnp.float32)
           + ab2_ref[...])                               # (B, A*Z) action-major
    vh = jnp.maximum(
        jnp.dot(f, vw1_ref[...], preferred_element_type=jnp.float32)
        + vb1_ref[...], 0.0)
    val = (jnp.dot(vh, vw2_ref[...], preferred_element_type=jnp.float32)
           + vb2_ref[...])                               # (B, Z)

    for a in range(A):                                   # A static -> unrolled
        adv_a = adv[:, a * Z:(a + 1) * Z]                # atoms of action a
        # matches reference: p = val + adv - adv.mean(dim=1) on (B, Z, A),
        # i.e. mean over the atom axis, then softmax over atoms (dim=-2)
        p = val + adv_a - jnp.mean(adv_a, axis=-1, keepdims=True)
        p = p - jnp.max(p, axis=-1, keepdims=True)
        e = jnp.exp(p)
        # exact reciprocal (approx=False) keeps the sum-to-1 check tight
        o_ref[a, :, :] = e * pl.reciprocal(jnp.sum(e, axis=-1, keepdims=True))


def dueling_head(f, params, A, Z):
    B = f.shape[0]
    vmem = pl.BlockSpec(memory_space=pltpu.MemorySpace.VMEM)
    return pl.pallas_call(
        functools.partial(dueling_head_kernel, A=A, Z=Z),
        out_shape=jax.ShapeDtypeStruct((A, B, Z), jnp.float32),
        in_specs=[vmem] * 9,
        out_specs=vmem,
        compiler_params=pltpu.CompilerParams(vmem_limit_bytes=32 * 1024 * 1024),
    )(f,
      params["adv_w1"], params["adv_b1"].reshape(1, -1),
      params["adv_w2"], params["adv_b2"].reshape(1, -1),
      params["val_w1"], params["val_b1"].reshape(1, -1),
      params["val_w2"], params["val_b2"].reshape(1, -1))


# ----------------------------------------------------------------------------
# Parameters (deterministic synthetic init; one-time relayouts folded in)
# ----------------------------------------------------------------------------

def init_params(key, n_actions, n_atoms, feat_chw=(64, 2, 2)):
    ks = jax.random.split(key, 12)
    Cf, Hf, Wf = feat_chw
    flat_dim = Cf * Hf * Wf

    def w(k, shape, fan_in):
        return jax.random.normal(k, shape, jnp.float32) / jnp.sqrt(float(fan_in))

    p = {}
    # conv weights: rows generated in im2col (dy, dx, c) order, reshaped to
    # (9, Cin, Cout) so the kernel can take per-(dy, dx) taps with a static index
    p["conv1_w"] = w(ks[0], (3 * 3 * 3, 32), 27).reshape(9, 3, 32)
    p["conv1_b"] = w(ks[1], (32,), 27)
    p["conv3_w"] = w(ks[2], (3 * 3 * 32, 64), 288).reshape(9, 32, 64)
    p["conv3_b"] = w(ks[3], (64,), 288)

    # One-time relayout: FC1 rows are generated for PyTorch's NCHW flatten and
    # permuted to the NHWC (h, w, c) flatten the conv kernel produces, so no
    # runtime transpose is needed (numerically identical).
    chw = np.arange(flat_dim).reshape(Cf, Hf, Wf)
    hwc_perm = jnp.asarray(np.transpose(chw, (1, 2, 0)).reshape(-1))
    p["adv_w1"] = w(ks[4], (flat_dim, 256), flat_dim)[hwc_perm, :]
    p["adv_b1"] = w(ks[5], (256,), flat_dim)
    p["val_w1"] = w(ks[6], (flat_dim, 128), flat_dim)[hwc_perm, :]
    p["val_b1"] = w(ks[7], (128,), flat_dim)

    # One-time relayout: adv_fc2 columns from torch's (z*A + a) order to
    # action-major (a*Z + z) so the head kernel uses static per-action slices.
    A, Z = n_actions, n_atoms
    colp = jnp.asarray(np.arange(Z * A).reshape(Z, A).T.reshape(-1))
    p["adv_w2"] = w(ks[8], (256, Z * A), 256)[:, colp]
    p["adv_b2"] = w(ks[9], (Z * A,), 256)[colp]
    p["val_w2"] = w(ks[10], (128, Z), 128)
    p["val_b2"] = w(ks[11], (Z,), 128)
    return p


# ----------------------------------------------------------------------------
# Forward pass
# ----------------------------------------------------------------------------

def rainbow_dqn_forward(x, params, n_actions, n_atoms):
    if x.ndim == 3:                        # matches `input.unsqueeze(0)`
        x = x[None]
    B, C, H, W = x.shape

    # conv0/relu0/maxpool1 in the reference are dead code (their result is
    # immediately overwritten by conv1(input)); intentionally not computed.

    # NCHW -> NHWC -> per-image flat (h*W + w, c) rows with one zero pad row so
    # the in-kernel 3x3 shifted slices stay in bounds (replaces HBM im2col).
    xh = jnp.transpose(x, (0, 2, 3, 1))
    xf = jnp.pad(xh, ((0, 0), (0, 1), (0, 0), (0, 0))).reshape(B, (H + 1) * W, C)

    # conv1 + ReLU + maxpool, fused; output is already the padded flat layout
    # conv3 consumes (zero pad rows written by the selection matmul itself).
    OH1, OW1 = H - 2, W - 2
    PH1, PW1 = OH1 // 2, OW1 // 2
    S1 = _pool_select(OH1, OW1, W, (PH1 + 1) * PW1)
    y1 = conv_relu_pool(xf, params["conv1_w"], params["conv1_b"], S1, W=W, OH=OH1)

    # conv3 + ReLU + maxpool, fused.
    H2, W2 = PH1, PW1
    OH2, OW2 = H2 - 2, W2 - 2
    PH2, PW2 = OH2 // 2, OW2 // 2
    S2 = _pool_select(OH2, OW2, W2, PH2 * PW2)
    y2 = conv_relu_pool(y1, params["conv3_w"], params["conv3_b"], S2, W=W2, OH=OH2)

    # flatten in NHWC (h, w, c) order; FC1 weight rows were permuted at init so
    # this is numerically identical to PyTorch's NCHW nn.Flatten.
    f = y2.reshape(B, -1)

    A, Z = n_actions, n_atoms
    out = dueling_head(f, params, A, Z)          # (A, B, Z)
    return jnp.transpose(out, (1, 2, 0))         # (B, n_atoms, n_actions)


# ----------------------------------------------------------------------------

if __name__ == "__main__":
    B, C, H, W = 2, 3, 16, 16
    n_actions, n_atoms = 4, 8

    x = jax.random.normal(jax.random.PRNGKey(0), (B, C, H, W), dtype=jnp.float32)
    # 16x16 -> conv 14 -> pool 7 -> conv 5 -> pool 2  =>  features = 64*2*2
    params = init_params(jax.random.PRNGKey(1), n_actions, n_atoms,
                         feat_chw=(64, 2, 2))

    fwd = jax.jit(functools.partial(rainbow_dqn_forward,
                                    n_actions=n_actions, n_atoms=n_atoms))
    out = jax.block_until_ready(fwd(x, params))

    assert out.shape == (B, n_atoms, n_actions), out.shape
    # softmax over the atom axis (dim=-2) must sum to 1 for every (batch, action)
    sums = jnp.sum(out, axis=-2)
    assert bool(jnp.all(jnp.abs(sums - 1.0) < 1e-5))
    assert bool(jnp.all(jnp.isfinite(out)))

    print("KERNEL_OK")
</pallas_src>

<mosaic_0001>
module attributes {stable_mosaic.version = 11 : i64} {
  func.func @conv_pool_kernel(%arg0: i32, %arg1: memref<1x56x32xf32, #tpu.memory_space<vmem>>, %arg2: memref<9x32x64xf32, #tpu.memory_space<vmem>>, %arg3: memref<1x64xf32, #tpu.memory_space<vmem>>, %arg4: memref<4x27xf32, #tpu.memory_space<vmem>>, %arg5: memref<1x4x64xf32, #tpu.memory_space<vmem>>) attributes {dimension_semantics = [#tpu.dimension_semantics<parallel>], iteration_bounds = array<i64: 2>, scalar_prefetch = 0 : i64, scratch_operands = 0 : i64, tpu.core_type = #tpu.core_type<tc>, window_params = [{transform_indices = @transform_0, window_bounds = array<i64: 1, 56, 32>}, {pipeline_mode = #tpu.pipeline_mode<synchronous>, transform_indices = @transform_1, window_bounds = array<i64: 9, 32, 64>}, {pipeline_mode = #tpu.pipeline_mode<synchronous>, transform_indices = @transform_2, window_bounds = array<i64: 1, 64>}, {pipeline_mode = #tpu.pipeline_mode<synchronous>, transform_indices = @transform_3, window_bounds = array<i64: 4, 27>}, {transform_indices = @transform_4, window_bounds = array<i64: 1, 4, 64>}]} {
    %c0 = arith.constant 0 : index
    %c0_0 = arith.constant 0 : index
    %c0_1 = arith.constant 0 : index
    %0 = vector.load %arg1[%c0, %c0_0, %c0_1] : memref<1x56x32xf32, #tpu.memory_space<vmem>>, vector<1x35x32xf32>
    %1 = vector.shape_cast %0 : vector<1x35x32xf32> to vector<35x32xf32>
    %c0_2 = arith.constant 0 : index
    %c0_3 = arith.constant 0 : index
    %c0_4 = arith.constant 0 : index
    %2 = vector.load %arg2[%c0_2, %c0_3, %c0_4] : memref<9x32x64xf32, #tpu.memory_space<vmem>>, vector<1x32x64xf32>
    %3 = vector.shape_cast %2 : vector<1x32x64xf32> to vector<32x64xf32>
    %cst = arith.constant dense<0.000000e+00> : vector<35x64xf32>
    %4 = tpu.matmul %1, %3, %cst {dimension_numbers = #tpu.dot_dimension_numbers<[1], [0], [0], [1], [0, 0, 1, 1], [], []>} : vector<35x32xf32>, vector<32x64xf32>, vector<35x64xf32> -> vector<35x64xf32>
    %c0_5 = arith.constant 0 : index
    %c1 = arith.constant 1 : index
    %c0_6 = arith.constant 0 : index
    %5 = vector.load %arg1[%c0_5, %c1, %c0_6] : memref<1x56x32xf32, #tpu.memory_space<vmem>>, vector<1x35x32xf32>
    %6 = vector.shape_cast %5 : vector<1x35x32xf32> to vector<35x32xf32>
    %c1_7 = arith.constant 1 : index
    %c0_8 = arith.constant 0 : index
    %c0_9 = arith.constant 0 : index
    %7 = vector.load %arg2[%c1_7, %c0_8, %c0_9] : memref<9x32x64xf32, #tpu.memory_space<vmem>>, vector<1x32x64xf32>
    %8 = vector.shape_cast %7 : vector<1x32x64xf32> to vector<32x64xf32>
    %cst_10 = arith.constant dense<0.000000e+00> : vector<35x64xf32>
    %9 = tpu.matmul %6, %8, %cst_10 {dimension_numbers = #tpu.dot_dimension_numbers<[1], [0], [0], [1], [0, 0, 1, 1], [], []>} : vector<35x32xf32>, vector<32x64xf32>, vector<35x64xf32> -> vector<35x64xf32>
    %10 = arith.addf %4, %9 : vector<35x64xf32>
    %c0_11 = arith.constant 0 : index
    %c2 = arith.constant 2 : index
    %c0_12 = arith.constant 0 : index
    %11 = vector.load %arg1[%c0_11, %c2, %c0_12] : memref<1x56x32xf32, #tpu.memory_space<vmem>>, vector<1x35x32xf32>
    %12 = vector.shape_cast %11 : vector<1x35x32xf32> to vector<35x32xf32>
    %c2_13 = arith.constant 2 : index
    %c0_14 = arith.constant 0 : index
    %c0_15 = arith.constant 0 : index
    %13 = vector.load %arg2[%c2_13, %c0_14, %c0_15] : memref<9x32x64xf32, #tpu.memory_space<vmem>>, vector<1x32x64xf32>
    %14 = vector.shape_cast %13 : vector<1x32x64xf32> to vector<32x64xf32>
    %cst_16 = arith.constant dense<0.000000e+00> : vector<35x64xf32>
    %15 = tpu.matmul %12, %14, %cst_16 {dimension_numbers = #tpu.dot_dimension_numbers<[1], [0], [0], [1], [0, 0, 1, 1], [], []>} : vector<35x32xf32>, vector<32x64xf32>, vector<35x64xf32> -> vector<35x64xf32>
    %16 = arith.addf %10, %15 : vector<35x64xf32>
    %c0_17 = arith.constant 0 : index
    %c7 = arith.constant 7 : index
    %c0_18 = arith.constant 0 : index
    %17 = vector.load %arg1[%c0_17, %c7, %c0_18] : memref<1x56x32xf32, #tpu.memory_space<vmem>>, vector<1x35x32xf32>
    %18 = vector.shape_cast %17 : vector<1x35x32xf32> to vector<35x32xf32>
    %c3 = arith.constant 3 : index
    %c0_19 = arith.constant 0 : index
    %c0_20 = arith.constant 0 : index
    %19 = vector.load %arg2[%c3, %c0_19, %c0_20] : memref<9x32x64xf32, #tpu.memory_space<vmem>>, vector<1x32x64xf32>
    %20 = vector.shape_cast %19 : vector<1x32x64xf32> to vector<32x64xf32>
    %cst_21 = arith.constant dense<0.000000e+00> : vector<35x64xf32>
    %21 = tpu.matmul %18, %20, %cst_21 {dimension_numbers = #tpu.dot_dimension_numbers<[1], [0], [0], [1], [0, 0, 1, 1], [], []>} : vector<35x32xf32>, vector<32x64xf32>, vector<35x64xf32> -> vector<35x64xf32>
    %22 = arith.addf %16, %21 : vector<35x64xf32>
    %c0_22 = arith.constant 0 : index
    %c8 = arith.constant 8 : index
    %c0_23 = arith.constant 0 : index
    %23 = vector.load %arg1[%c0_22, %c8, %c0_23] : memref<1x56x32xf32, #tpu.memory_space<vmem>>, vector<1x35x32xf32>
    %24 = vector.shape_cast %23 : vector<1x35x32xf32> to vector<35x32xf32>
    %c4 = arith.constant 4 : index
    %c0_24 = arith.constant 0 : index
    %c0_25 = arith.constant 0 : index
    %25 = vector.load %arg2[%c4, %c0_24, %c0_25] : memref<9x32x64xf32, #tpu.memory_space<vmem>>, vector<1x32x64xf32>
    %26 = vector.shape_cast %25 : vector<1x32x64xf32> to vector<32x64xf32>
    %cst_26 = arith.constant dense<0.000000e+00> : vector<35x64xf32>
    %27 = tpu.matmul %24, %26, %cst_26 {dimension_numbers = #tpu.dot_dimension_numbers<[1], [0], [0], [1], [0, 0, 1, 1], [], []>} : vector<35x32xf32>, vector<32x64xf32>, vector<35x64xf32> -> vector<35x64xf32>
    %28 = arith.addf %22, %27 : vector<35x64xf32>
    %c0_27 = arith.constant 0 : index
    %c9 = arith.constant 9 : index
    %c0_28 = arith.constant 0 : index
    %29 = vector.load %arg1[%c0_27, %c9, %c0_28] : memref<1x56x32xf32, #tpu.memory_space<vmem>>, vector<1x35x32xf32>
    %30 = vector.shape_cast %29 : vector<1x35x32xf32> to vector<35x32xf32>
    %c5 = arith.constant 5 : index
    %c0_29 = arith.constant 0 : index
    %c0_30 = arith.constant 0 : index
    %31 = vector.load %arg2[%c5, %c0_29, %c0_30] : memref<9x32x64xf32, #tpu.memory_space<vmem>>, vector<1x32x64xf32>
    %32 = vector.shape_cast %31 : vector<1x32x64xf32> to vector<32x64xf32>
    %cst_31 = arith.constant dense<0.000000e+00> : vector<35x64xf32>
    %33 = tpu.matmul %30, %32, %cst_31 {dimension_numbers = #tpu.dot_dimension_numbers<[1], [0], [0], [1], [0, 0, 1, 1], [], []>} : vector<35x32xf32>, vector<32x64xf32>, vector<35x64xf32> -> vector<35x64xf32>
    %34 = arith.addf %28, %33 : vector<35x64xf32>
    %c0_32 = arith.constant 0 : index
    %c14 = arith.constant 14 : index
    %c0_33 = arith.constant 0 : index
    %35 = vector.load %arg1[%c0_32, %c14, %c0_33] : memref<1x56x32xf32, #tpu.memory_space<vmem>>, vector<1x35x32xf32>
    %36 = vector.shape_cast %35 : vector<1x35x32xf32> to vector<35x32xf32>
    %c6 = arith.constant 6 : index
    %c0_34 = arith.constant 0 : index
    %c0_35 = arith.constant 0 : index
    %37 = vector.load %arg2[%c6, %c0_34, %c0_35] : memref<9x32x64xf32, #tpu.memory_space<vmem>>, vector<1x32x64xf32>
    %38 = vector.shape_cast %37 : vector<1x32x64xf32> to vector<32x64xf32>
    %cst_36 = arith.constant dense<0.000000e+00> : vector<35x64xf32>
    %39 = tpu.matmul %36, %38, %cst_36 {dimension_numbers = #tpu.dot_dimension_numbers<[1], [0], [0], [1], [0, 0, 1, 1], [], []>} : vector<35x32xf32>, vector<32x64xf32>, vector<35x64xf32> -> vector<35x64xf32>
    %40 = arith.addf %34, %39 : vector<35x64xf32>
    %c0_37 = arith.constant 0 : index
    %c15 = arith.constant 15 : index
    %c0_38 = arith.constant 0 : index
    %41 = vector.load %arg1[%c0_37, %c15, %c0_38] : memref<1x56x32xf32, #tpu.memory_space<vmem>>, vector<1x35x32xf32>
    %42 = vector.shape_cast %41 : vector<1x35x32xf32> to vector<35x32xf32>
    %c7_39 = arith.constant 7 : index
    %c0_40 = arith.constant 0 : index
    %c0_41 = arith.constant 0 : index
    %43 = vector.load %arg2[%c7_39, %c0_40, %c0_41] : memref<9x32x64xf32, #tpu.memory_space<vmem>>, vector<1x32x64xf32>
    %44 = vector.shape_cast %43 : vector<1x32x64xf32> to vector<32x64xf32>
    %cst_42 = arith.constant dense<0.000000e+00> : vector<35x64xf32>
    %45 = tpu.matmul %42, %44, %cst_42 {dimension_numbers = #tpu.dot_dimension_numbers<[1], [0], [0], [1], [0, 0, 1, 1], [], []>} : vector<35x32xf32>, vector<32x64xf32>, vector<35x64xf32> -> vector<35x64xf32>
    %46 = arith.addf %40, %45 : vector<35x64xf32>
    %c0_43 = arith.constant 0 : index
    %c16 = arith.constant 16 : index
    %c0_44 = arith.constant 0 : index
    %47 = vector.load %arg1[%c0_43, %c16, %c0_44] : memref<1x56x32xf32, #tpu.memory_space<vmem>>, vector<1x35x32xf32>
    %48 = vector.shape_cast %47 : vector<1x35x32xf32> to vector<35x32xf32>
    %c8_45 = arith.constant 8 : index
    %c0_46 = arith.constant 0 : index
    %c0_47 = arith.constant 0 : index
    %49 = vector.load %arg2[%c8_45, %c0_46, %c0_47] : memref<9x32x64xf32, #tpu.memory_space<vmem>>, vector<1x32x64xf32>
    %50 = vector.shape_cast %49 : vector<1x32x64xf32> to vector<32x64xf32>
    %cst_48 = arith.constant dense<0.000000e+00> : vector<35x64xf32>
    %51 = tpu.matmul %48, %50, %cst_48 {dimension_numbers = #tpu.dot_dimension_numbers<[1], [0], [0], [1], [0, 0, 1, 1], [], []>} : vector<35x32xf32>, vector<32x64xf32>, vector<35x64xf32> -> vector<35x64xf32>
    %52 = arith.addf %46, %51 : vector<35x64xf32>
    %c0_49 = arith.constant 0 : index
    %c0_50 = arith.constant 0 : index
    %53 = vector.load %arg3[%c0_49, %c0_50] : memref<1x64xf32, #tpu.memory_space<vmem>>, vector<1x64xf32>
    %54 = vector.broadcast %53 : vector<1x64xf32> to vector<35x64xf32>
    %55 = arith.addf %52, %54 : vector<35x64xf32>
    %cst_51 = arith.constant 0.000000e+00 : f32
    %56 = vector.broadcast %cst_51 : f32 to vector<35x64xf32>
    %57 = arith.maximumf %55, %56 : vector<35x64xf32>
    %58 = vector.extract_strided_slice %57 {offsets = [0, 0], sizes = [34, 64], strides = [1, 1]} : vector<35x64xf32> to vector<34x64xf32>
    %59 = vector.extract_strided_slice %57 {offsets = [1, 0], sizes = [34, 64], strides = [1, 1]} : vector<35x64xf32> to vector<34x64xf32>
    %60 = arith.maximumf %58, %59 : vector<34x64xf32>
    %61 = vector.extract_strided_slice %60 {offsets = [0, 0], sizes = [27, 64], strides = [1, 1]} : vector<34x64xf32> to vector<27x64xf32>
    %62 = vector.extract_strided_slice %60 {offsets = [7, 0], sizes = [27, 64], strides = [1, 1]} : vector<34x64xf32> to vector<27x64xf32>
    %63 = arith.maximumf %61, %62 : vector<27x64xf32>
    %c0_52 = arith.constant 0 : index
    %c0_53 = arith.constant 0 : index
    %64 = vector.load %arg4[%c0_52, %c0_53] : memref<4x27xf32, #tpu.memory_space<vmem>>, vector<4x27xf32>
    %cst_54 = arith.constant dense<0.000000e+00> : vector<4x64xf32>
    %65 = tpu.matmul %64, %63, %cst_54 {dimension_numbers = #tpu.dot_dimension_numbers<[1], [0], [0], [1], [0, 0, 1, 1], [], []>} : vector<4x27xf32>, vector<27x64xf32>, vector<4x64xf32> -> vector<4x64xf32>
    %c0_55 = arith.constant 0 : index
    %c0_56 = arith.constant 0 : index
    %c0_57 = arith.constant 0 : index
    %66 = vector.load %arg5[%c0_55, %c0_56, %c0_57] : memref<1x4x64xf32, #tpu.memory_space<vmem>>, vector<1x4x64xf32>
    %67 = vector.shape_cast %66 : vector<1x4x64xf32> to vector<4x64xf32>
    %68 = vector.shape_cast %65 : vector<4x64xf32> to vector<1x4x64xf32>
    tpu.vector_store %arg5[%c0_55, %c0_56, %c0_57], %68 {strides = array<i32>} : memref<1x4x64xf32, #tpu.memory_space<vmem>>, vector<1x4x64xf32>,
    return
  }
  func.func @transform_0(%arg0: i32) -> (i32, i32, i32) {
    %c0_i32 = arith.constant 0 : i32
    %c0_i32_0 = arith.constant 0 : i32
    %c0_i32_1 = arith.constant 0 : i32
    return %arg0, %c0_i32, %c0_i32_0 : i32, i32, i32
  }
  func.func @transform_1(%arg0: i32) -> (i32, i32, i32) {
    %c0_i32 = arith.constant 0 : i32
    %c0_i32_0 = arith.constant 0 : i32
    %c0_i32_1 = arith.constant 0 : i32
    %c0_i32_2 = arith.constant 0 : i32
    return %c0_i32, %c0_i32_0, %c0_i32_1 : i32, i32, i32
  }
  func.func @transform_2(%arg0: i32) -> (i32, i32) {
    %c0_i32 = arith.constant 0 : i32
    %c0_i32_0 = arith.constant 0 : i32
    %c0_i32_1 = arith.constant 0 : i32
    return %c0_i32, %c0_i32_0 : i32, i32
  }
  func.func @transform_3(%arg0: i32) -> (i32, i32) {
    %c0_i32 = arith.constant 0 : i32
    %c0_i32_0 = arith.constant 0 : i32
    %c0_i32_1 = arith.constant 0 : i32
    return %c0_i32, %c0_i32_0 : i32, i32
  }
  func.func @transform_4(%arg0: i32) -> (i32, i32, i32) {
    %c0_i32 = arith.constant 0 : i32
    %c0_i32_0 = arith.constant 0 : i32
    %c0_i32_1 = arith.constant 0 : i32
    return %arg0, %c0_i32, %c0_i32_0 : i32, i32, i32
  }
}

module attributes {stable_mosaic.version = 11 : i64} {
  func.func @conv_pool_kernel(%arg0: i32, %arg1: memref<1x272x3xf32, #tpu.memory_space<vmem>>, %arg2: memref<9x3x32xf32, #tpu.memory_space<vmem>>, %arg3: memref<1x32xf32, #tpu.memory_space<vmem>>, %arg4: memref<56x207xf32, #tpu.memory_space<vmem>>, %arg5: memref<1x56x32xf32, #tpu.memory_space<vmem>>) attributes {dimension_semantics = [#tpu.dimension_semantics<parallel>], iteration_bounds = array<i64: 2>, scalar_prefetch = 0 : i64, scratch_operands = 0 : i64, tpu.core_type = #tpu.core_type<tc>, window_params = [{transform_indices = @transform_0, window_bounds = array<i64: 1, 272, 3>}, {pipeline_mode = #tpu.pipeline_mode<synchronous>, transform_indices = @transform_1, window_bounds = array<i64: 9, 3, 32>}, {pipeline_mode = #tpu.pipeline_mode<synchronous>, transform_indices = @transform_2, window_bounds = array<i64: 1, 32>}, {pipeline_mode = #tpu.pipeline_mode<synchronous>, transform_indices = @transform_3, window_bounds = array<i64: 56, 207>}, {transform_indices = @transform_4, window_bounds = array<i64: 1, 56, 32>}]} {
    %c0 = arith.constant 0 : index
    %c0_0 = arith.constant 0 : index
    %c0_1 = arith.constant 0 : index
    %0 = vector.load %arg1[%c0, %c0_0, %c0_1] : memref<1x272x3xf32, #tpu.memory_space<vmem>>, vector<1x224x3xf32>
    %1 = vector.shape_cast %0 : vector<1x224x3xf32> to vector<224x3xf32>
    %c0_2 = arith.constant 0 : index
    %c0_3 = arith.constant 0 : index
    %c0_4 = arith.constant 0 : index
    %2 = vector.load %arg2[%c0_2, %c0_3, %c0_4] : memref<9x3x32xf32, #tpu.memory_space<vmem>>, vector<1x3x32xf32>
    %3 = vector.shape_cast %2 : vector<1x3x32xf32> to vector<3x32xf32>
    %cst = arith.constant dense<0.000000e+00> : vector<224x32xf32>
    %4 = tpu.matmul %1, %3, %cst {dimension_numbers = #tpu.dot_dimension_numbers<[1], [0], [0], [1], [0, 0, 1, 1], [], []>} : vector<224x3xf32>, vector<3x32xf32>, vector<224x32xf32> -> vector<224x32xf32>
    %c0_5 = arith.constant 0 : index
    %c1 = arith.constant 1 : index
    %c0_6 = arith.constant 0 : index
    %5 = vector.load %arg1[%c0_5, %c1, %c0_6] : memref<1x272x3xf32, #tpu.memory_space<vmem>>, vector<1x224x3xf32>
    %6 = vector.shape_cast %5 : vector<1x224x3xf32> to vector<224x3xf32>
    %c1_7 = arith.constant 1 : index
    %c0_8 = arith.constant 0 : index
    %c0_9 = arith.constant 0 : index
    %7 = vector.load %arg2[%c1_7, %c0_8, %c0_9] : memref<9x3x32xf32, #tpu.memory_space<vmem>>, vector<1x3x32xf32>
    %8 = vector.shape_cast %7 : vector<1x3x32xf32> to vector<3x32xf32>
    %cst_10 = arith.constant dense<0.000000e+00> : vector<224x32xf32>
    %9 = tpu.matmul %6, %8, %cst_10 {dimension_numbers = #tpu.dot_dimension_numbers<[1], [0], [0], [1], [0, 0, 1, 1], [], []>} : vector<224x3xf32>, vector<3x32xf32>, vector<224x32xf32> -> vector<224x32xf32>
    %10 = arith.addf %4, %9 : vector<224x32xf32>
    %c0_11 = arith.constant 0 : index
    %c2 = arith.constant 2 : index
    %c0_12 = arith.constant 0 : index
    %11 = vector.load %arg1[%c0_11, %c2, %c0_12] : memref<1x272x3xf32, #tpu.memory_space<vmem>>, vector<1x224x3xf32>
    %12 = vector.shape_cast %11 : vector<1x224x3xf32> to vector<224x3xf32>
    %c2_13 = arith.constant 2 : index
    %c0_14 = arith.constant 0 : index
    %c0_15 = arith.constant 0 : index
    %13 = vector.load %arg2[%c2_13, %c0_14, %c0_15] : memref<9x3x32xf32, #tpu.memory_space<vmem>>, vector<1x3x32xf32>
    %14 = vector.shape_cast %13 : vector<1x3x32xf32> to vector<3x32xf32>
    %cst_16 = arith.constant dense<0.000000e+00> : vector<224x32xf32>
    %15 = tpu.matmul %12, %14, %cst_16 {dimension_numbers = #tpu.dot_dimension_numbers<[1], [0], [0], [1], [0, 0, 1, 1], [], []>} : vector<224x3xf32>, vector<3x32xf32>, vector<224x32xf32> -> vector<224x32xf32>
    %16 = arith.addf %10, %15 : vector<224x32xf32>
    %c0_17 = arith.constant 0 : index
    %c16 = arith.constant 16 : index
    %c0_18 = arith.constant 0 : index
    %17 = vector.load %arg1[%c0_17, %c16, %c0_18] : memref<1x272x3xf32, #tpu.memory_space<vmem>>, vector<1x224x3xf32>
    %18 = vector.shape_cast %17 : vector<1x224x3xf32> to vector<224x3xf32>
    %c3 = arith.constant 3 : index
    %c0_19 = arith.constant 0 : index
    %c0_20 = arith.constant 0 : index
    %19 = vector.load %arg2[%c3, %c0_19, %c0_20] : memref<9x3x32xf32, #tpu.memory_space<vmem>>, vector<1x3x32xf32>
    %20 = vector.shape_cast %19 : vector<1x3x32xf32> to vector<3x32xf32>
    %cst_21 = arith.constant dense<0.000000e+00> : vector<224x32xf32>
    %21 = tpu.matmul %18, %20, %cst_21 {dimension_numbers = #tpu.dot_dimension_numbers<[1], [0], [0], [1], [0, 0, 1, 1], [], []>} : vector<224x3xf32>, vector<3x32xf32>, vector<224x32xf32> -> vector<224x32xf32>
    %22 = arith.addf %16, %21 : vector<224x32xf32>
    %c0_22 = arith.constant 0 : index
    %c17 = arith.constant 17 : index
    %c0_23 = arith.constant 0 : index
    %23 = vector.load %arg1[%c0_22, %c17, %c0_23] : memref<1x272x3xf32, #tpu.memory_space<vmem>>, vector<1x224x3xf32>
    %24 = vector.shape_cast %23 : vector<1x224x3xf32> to vector<224x3xf32>
    %c4 = arith.constant 4 : index
    %c0_24 = arith.constant 0 : index
    %c0_25 = arith.constant 0 : index
    %25 = vector.load %arg2[%c4, %c0_24, %c0_25] : memref<9x3x32xf32, #tpu.memory_space<vmem>>, vector<1x3x32xf32>
    %26 = vector.shape_cast %25 : vector<1x3x32xf32> to vector<3x32xf32>
    %cst_26 = arith.constant dense<0.000000e+00> : vector<224x32xf32>
    %27 = tpu.matmul %24, %26, %cst_26 {dimension_numbers = #tpu.dot_dimension_numbers<[1], [0], [0], [1], [0, 0, 1, 1], [], []>} : vector<224x3xf32>, vector<3x32xf32>, vector<224x32xf32> -> vector<224x32xf32>
    %28 = arith.addf %22, %27 : vector<224x32xf32>
    %c0_27 = arith.constant 0 : index
    %c18 = arith.constant 18 : index
    %c0_28 = arith.constant 0 : index
    %29 = vector.load %arg1[%c0_27, %c18, %c0_28] : memref<1x272x3xf32, #tpu.memory_space<vmem>>, vector<1x224x3xf32>
    %30 = vector.shape_cast %29 : vector<1x224x3xf32> to vector<224x3xf32>
    %c5 = arith.constant 5 : index
    %c0_29 = arith.constant 0 : index
    %c0_30 = arith.constant 0 : index
    %31 = vector.load %arg2[%c5, %c0_29, %c0_30] : memref<9x3x32xf32, #tpu.memory_space<vmem>>, vector<1x3x32xf32>
    %32 = vector.shape_cast %31 : vector<1x3x32xf32> to vector<3x32xf32>
    %cst_31 = arith.constant dense<0.000000e+00> : vector<224x32xf32>
    %33 = tpu.matmul %30, %32, %cst_31 {dimension_numbers = #tpu.dot_dimension_numbers<[1], [0], [0], [1], [0, 0, 1, 1], [], []>} : vector<224x3xf32>, vector<3x32xf32>, vector<224x32xf32> -> vector<224x32xf32>
    %34 = arith.addf %28, %33 : vector<224x32xf32>
    %c0_32 = arith.constant 0 : index
    %c32 = arith.constant 32 : index
    %c0_33 = arith.constant 0 : index
    %35 = vector.load %arg1[%c0_32, %c32, %c0_33] : memref<1x272x3xf32, #tpu.memory_space<vmem>>, vector<1x224x3xf32>
    %36 = vector.shape_cast %35 : vector<1x224x3xf32> to vector<224x3xf32>
    %c6 = arith.constant 6 : index
    %c0_34 = arith.constant 0 : index
    %c0_35 = arith.constant 0 : index
    %37 = vector.load %arg2[%c6, %c0_34, %c0_35] : memref<9x3x32xf32, #tpu.memory_space<vmem>>, vector<1x3x32xf32>
    %38 = vector.shape_cast %37 : vector<1x3x32xf32> to vector<3x32xf32>
    %cst_36 = arith.constant dense<0.000000e+00> : vector<224x32xf32>
    %39 = tpu.matmul %36, %38, %cst_36 {dimension_numbers = #tpu.dot_dimension_numbers<[1], [0], [0], [1], [0, 0, 1, 1], [], []>} : vector<224x3xf32>, vector<3x32xf32>, vector<224x32xf32> -> vector<224x32xf32>
    %40 = arith.addf %34, %39 : vector<224x32xf32>
    %c0_37 = arith.constant 0 : index
    %c33 = arith.constant 33 : index
    %c0_38 = arith.constant 0 : index
    %41 = vector.load %arg1[%c0_37, %c33, %c0_38] : memref<1x272x3xf32, #tpu.memory_space<vmem>>, vector<1x224x3xf32>
    %42 = vector.shape_cast %41 : vector<1x224x3xf32> to vector<224x3xf32>
    %c7 = arith.constant 7 : index
    %c0_39 = arith.constant 0 : index
    %c0_40 = arith.constant 0 : index
    %43 = vector.load %arg2[%c7, %c0_39, %c0_40] : memref<9x3x32xf32, #tpu.memory_space<vmem>>, vector<1x3x32xf32>
    %44 = vector.shape_cast %43 : vector<1x3x32xf32> to vector<3x32xf32>
    %cst_41 = arith.constant dense<0.000000e+00> : vector<224x32xf32>
    %45 = tpu.matmul %42, %44, %cst_41 {dimension_numbers = #tpu.dot_dimension_numbers<[1], [0], [0], [1], [0, 0, 1, 1], [], []>} : vector<224x3xf32>, vector<3x32xf32>, vector<224x32xf32> -> vector<224x32xf32>
    %46 = arith.addf %40, %45 : vector<224x32xf32>
    %c0_42 = arith.constant 0 : index
    %c34 = arith.constant 34 : index
    %c0_43 = arith.constant 0 : index
    %47 = vector.load %arg1[%c0_42, %c34, %c0_43] : memref<1x272x3xf32, #tpu.memory_space<vmem>>, vector<1x224x3xf32>
    %48 = vector.shape_cast %47 : vector<1x224x3xf32> to vector<224x3xf32>
    %c8 = arith.constant 8 : index
    %c0_44 = arith.constant 0 : index
    %c0_45 = arith.constant 0 : index
    %49 = vector.load %arg2[%c8, %c0_44, %c0_45] : memref<9x3x32xf32, #tpu.memory_space<vmem>>, vector<1x3x32xf32>
    %50 = vector.shape_cast %49 : vector<1x3x32xf32> to vector<3x32xf32>
    %cst_46 = arith.constant dense<0.000000e+00> : vector<224x32xf32>
    %51 = tpu.matmul %48, %50, %cst_46 {dimension_numbers = #tpu.dot_dimension_numbers<[1], [0], [0], [1], [0, 0, 1, 1], [], []>} : vector<224x3xf32>, vector<3x32xf32>, vector<224x32xf32> -> vector<224x32xf32>
    %52 = arith.addf %46, %51 : vector<224x32xf32>
    %c0_47 = arith.constant 0 : index
    %c0_48 = arith.constant 0 : index
    %53 = vector.load %arg3[%c0_47, %c0_48] : memref<1x32xf32, #tpu.memory_space<vmem>>, vector<1x32xf32>
    %54 = vector.broadcast %53 : vector<1x32xf32> to vector<224x32xf32>
    %55 = arith.addf %52, %54 : vector<224x32xf32>
    %cst_49 = arith.constant 0.000000e+00 : f32
    %56 = vector.broadcast %cst_49 : f32 to vector<224x32xf32>
    %57 = arith.maximumf %55, %56 : vector<224x32xf32>
    %58 = vector.extract_strided_slice %57 {offsets = [0, 0], sizes = [223, 32], strides = [1, 1]} : vector<224x32xf32> to vector<223x32xf32>
    %59 = vector.extract_strided_slice %57 {offsets = [1, 0], sizes = [223, 32], strides = [1, 1]} : vector<224x32xf32> to vector<223x32xf32>
    %60 = arith.maximumf %58, %59 : vector<223x32xf32>
    %61 = vector.extract_strided_slice %60 {offsets = [0, 0], sizes = [207, 32], strides = [1, 1]} : vector<223x32xf32> to vector<207x32xf32>
    %62 = vector.extract_strided_slice %60 {offsets = [16, 0], sizes = [207, 32], strides = [1, 1]} : vector<223x32xf32> to vector<207x32xf32>
    %63 = arith.maximumf %61, %62 : vector<207x32xf32>
    %c0_50 = arith.constant 0 : index
    %c0_51 = arith.constant 0 : index
    %64 = vector.load %arg4[%c0_50, %c0_51] : memref<56x207xf32, #tpu.memory_space<vmem>>, vector<56x207xf32>
    %cst_52 = arith.constant dense<0.000000e+00> : vector<56x32xf32>
    %65 = tpu.matmul %64, %63, %cst_52 {dimension_numbers = #tpu.dot_dimension_numbers<[1], [0], [0], [1], [0, 0, 1, 1], [], []>} : vector<56x207xf32>, vector<207x32xf32>, vector<56x32xf32> -> vector<56x32xf32>
    %c0_53 = arith.constant 0 : index
    %c0_54 = arith.constant 0 : index
    %c0_55 = arith.constant 0 : index
    %66 = vector.load %arg5[%c0_53, %c0_54, %c0_55] : memref<1x56x32xf32, #tpu.memory_space<vmem>>, vector<1x56x32xf32>
    %67 = vector.shape_cast %66 : vector<1x56x32xf32> to vector<56x32xf32>
    %68 = vector.shape_cast %65 : vector<56x32xf32> to vector<1x56x32xf32>
    tpu.vector_store %arg5[%c0_53, %c0_54, %c0_55], %68 {strides = array<i32>} : memref<1x56x32xf32, #tpu.memory_space<vmem>>, vector<1x56x32xf32>,
    return
  }
  func.func @transform_0(%arg0: i32) -> (i32, i32, i32) {
    %c0_i32 = arith.constant 0 : i32
    %c0_i32_0 = arith.constant 0 : i32
    %c0_i32_1 = arith.constant 0 : i32
    return %arg0, %c0_i32, %c0_i32_0 : i32, i32, i32
  }
  func.func @transform_1(%arg0: i32) -> (i32, i32, i32) {
    %c0_i32 = arith.constant 0 : i32
    %c0_i32_0 = arith.constant 0 : i32
    %c0_i32_1 = arith.constant 0 : i32
    %c0_i32_2 = arith.constant 0 : i32
    return %c0_i32, %c0_i32_0, %c0_i32_1 : i32, i32, i32
  }
  func.func @transform_2(%arg0: i32) -> (i32, i32) {
    %c0_i32 = arith.constant 0 : i32
    %c0_i32_0 = arith.constant 0 : i32
    %c0_i32_1 = arith.constant 0 : i32
    return %c0_i32, %c0_i32_0 : i32, i32
  }
  func.func @transform_3(%arg0: i32) -> (i32, i32) {
    %c0_i32 = arith.constant 0 : i32
    %c0_i32_0 = arith.constant 0 : i32
    %c0_i32_1 = arith.constant 0 : i32
    return %c0_i32, %c0_i32_0 : i32, i32
  }
  func.func @transform_4(%arg0: i32) -> (i32, i32, i32) {
    %c0_i32 = arith.constant 0 : i32
    %c0_i32_0 = arith.constant 0 : i32
    %c0_i32_1 = arith.constant 0 : i32
    return %arg0, %c0_i32, %c0_i32_0 : i32, i32, i32
  }
}

module attributes {stable_mosaic.version = 11 : i64} {
  func.func @dueling_head_kernel(%arg0: memref<2x256xf32, #tpu.memory_space<vmem>>, %arg1: memref<256x256xf32, #tpu.memory_space<vmem>>, %arg2: memref<1x256xf32, #tpu.memory_space<vmem>>, %arg3: memref<256x32xf32, #tpu.memory_space<vmem>>, %arg4: memref<1x32xf32, #tpu.memory_space<vmem>>, %arg5: memref<256x128xf32, #tpu.memory_space<vmem>>, %arg6: memref<1x128xf32, #tpu.memory_space<vmem>>, %arg7: memref<128x8xf32, #tpu.memory_space<vmem>>, %arg8: memref<1x8xf32, #tpu.memory_space<vmem>>, %arg9: memref<4x2x8xf32, #tpu.memory_space<vmem>>) attributes {dimension_semantics = [], scalar_prefetch = 0 : i64, scratch_operands = 0 : i64, tpu.core_type = #tpu.core_type<tc>} {
    %c0 = arith.constant 0 : index
    %c0_0 = arith.constant 0 : index
    %0 = vector.load %arg0[%c0, %c0_0] : memref<2x256xf32, #tpu.memory_space<vmem>>, vector<2x256xf32>
    %c0_1 = arith.constant 0 : index
    %c0_2 = arith.constant 0 : index
    %1 = vector.load %arg1[%c0_1, %c0_2] : memref<256x256xf32, #tpu.memory_space<vmem>>, vector<256x256xf32>
    %cst = arith.constant dense<0.000000e+00> : vector<2x256xf32>
    %2 = tpu.matmul %0, %1, %cst {dimension_numbers = #tpu.dot_dimension_numbers<[1], [0], [0], [1], [0, 0, 1, 1], [], []>} : vector<2x256xf32>, vector<256x256xf32>, vector<2x256xf32> -> vector<2x256xf32>
    %c0_3 = arith.constant 0 : index
    %c0_4 = arith.constant 0 : index
    %3 = vector.load %arg2[%c0_3, %c0_4] : memref<1x256xf32, #tpu.memory_space<vmem>>, vector<1x256xf32>
    %4 = vector.broadcast %3 : vector<1x256xf32> to vector<2x256xf32>
    %5 = arith.addf %2, %4 : vector<2x256xf32>
    %cst_5 = arith.constant 0.000000e+00 : f32
    %6 = vector.broadcast %cst_5 : f32 to vector<2x256xf32>
    %7 = arith.maximumf %5, %6 : vector<2x256xf32>
    %c0_6 = arith.constant 0 : index
    %c0_7 = arith.constant 0 : index
    %8 = vector.load %arg3[%c0_6, %c0_7] : memref<256x32xf32, #tpu.memory_space<vmem>>, vector<256x32xf32>
    %cst_8 = arith.constant dense<0.000000e+00> : vector<2x32xf32>
    %9 = tpu.matmul %7, %8, %cst_8 {dimension_numbers = #tpu.dot_dimension_numbers<[1], [0], [0], [1], [0, 0, 1, 1], [], []>} : vector<2x256xf32>, vector<256x32xf32>, vector<2x32xf32> -> vector<2x32xf32>
    %c0_9 = arith.constant 0 : index
    %c0_10 = arith.constant 0 : index
    %10 = vector.load %arg4[%c0_9, %c0_10] : memref<1x32xf32, #tpu.memory_space<vmem>>, vector<1x32xf32>
    %11 = vector.broadcast %10 : vector<1x32xf32> to vector<2x32xf32>
    %12 = arith.addf %9, %11 : vector<2x32xf32>
    %c0_11 = arith.constant 0 : index
    %c0_12 = arith.constant 0 : index
    %13 = vector.load %arg5[%c0_11, %c0_12] : memref<256x128xf32, #tpu.memory_space<vmem>>, vector<256x128xf32>
    %cst_13 = arith.constant dense<0.000000e+00> : vector<2x128xf32>
    %14 = tpu.matmul %0, %13, %cst_13 {dimension_numbers = #tpu.dot_dimension_numbers<[1], [0], [0], [1], [0, 0, 1, 1], [], []>} : vector<2x256xf32>, vector<256x128xf32>, vector<2x128xf32> -> vector<2x128xf32>
    %c0_14 = arith.constant 0 : index
    %c0_15 = arith.constant 0 : index
    %15 = vector.load %arg6[%c0_14, %c0_15] : memref<1x128xf32, #tpu.memory_space<vmem>>, vector<1x128xf32>
    %16 = vector.broadcast %15 : vector<1x128xf32> to vector<2x128xf32>
    %17 = arith.addf %14, %16 : vector<2x128xf32>
    %cst_16 = arith.constant 0.000000e+00 : f32
    %18 = vector.broadcast %cst_16 : f32 to vector<2x128xf32>
    %19 = arith.maximumf %17, %18 : vector<2x128xf32>
    %c0_17 = arith.constant 0 : index
    %c0_18 = arith.constant 0 : index
    %20 = vector.load %arg7[%c0_17, %c0_18] : memref<128x8xf32, #tpu.memory_space<vmem>>, vector<128x8xf32>
    %cst_19 = arith.constant dense<0.000000e+00> : vector<2x8xf32>
    %21 = tpu.matmul %19, %20, %cst_19 {dimension_numbers = #tpu.dot_dimension_numbers<[1], [0], [0], [1], [0, 0, 1, 1], [], []>} : vector<2x128xf32>, vector<128x8xf32>, vector<2x8xf32> -> vector<2x8xf32>
    %c0_20 = arith.constant 0 : index
    %c0_21 = arith.constant 0 : index
    %22 = vector.load %arg8[%c0_20, %c0_21] : memref<1x8xf32, #tpu.memory_space<vmem>>, vector<1x8xf32>
    %23 = vector.broadcast %22 : vector<1x8xf32> to vector<2x8xf32>
    %24 = arith.addf %21, %23 : vector<2x8xf32>
    %25 = vector.extract_strided_slice %12 {offsets = [0, 0], sizes = [2, 8], strides = [1, 1]} : vector<2x32xf32> to vector<2x8xf32>
    %26 = arith.addf %24, %25 : vector<2x8xf32>
    %cst_22 = arith.constant dense<0.000000e+00> : vector<2xf32>
    %27 = vector.multi_reduction <add>, %25, %cst_22 [1] : vector<2x8xf32> to vector<2xf32>
    %28 = vector.shape_cast %27 : vector<2xf32> to vector<2x1xf32>
    %cst_23 = arith.constant 8.000000e+00 : f32
    %29 = vector.broadcast %cst_23 : f32 to vector<2x1xf32>
    %30 = arith.divf %28, %29 : vector<2x1xf32>
    %31 = vector.broadcast %30 : vector<2x1xf32> to vector<2x8xf32>
    %32 = arith.subf %26, %31 : vector<2x8xf32>
    %cst_24 = arith.constant dense<0xFF800000> : vector<2xf32>
    %33 = vector.multi_reduction <maximumf>, %32, %cst_24 [1] : vector<2x8xf32> to vector<2xf32>
    %34 = vector.shape_cast %33 : vector<2xf32> to vector<2x1xf32>
    %35 = vector.broadcast %34 : vector<2x1xf32> to vector<2x8xf32>
    %36 = arith.subf %32, %35 : vector<2x8xf32>
    %37 = math.exp %36 : vector<2x8xf32>
    %cst_25 = arith.constant dense<0.000000e+00> : vector<2xf32>
    %38 = vector.multi_reduction <add>, %37, %cst_25 [1] : vector<2x8xf32> to vector<2xf32>
    %39 = vector.shape_cast %38 : vector<2xf32> to vector<2x1xf32>
    %40 = tpu.reciprocal %39 : vector<2x1xf32> -> vector<2x1xf32>
    %41 = vector.broadcast %40 : vector<2x1xf32> to vector<2x8xf32>
    %42 = arith.mulf %37, %41 : vector<2x8xf32>
    %c0_26 = arith.constant 0 : index
    %c0_27 = arith.constant 0 : index
    %c0_28 = arith.constant 0 : index
    %43 = vector.load %arg9[%c0_26, %c0_27, %c0_28] : memref<4x2x8xf32, #tpu.memory_space<vmem>>, vector<1x2x8xf32>
    %44 = vector.shape_cast %43 : vector<1x2x8xf32> to vector<2x8xf32>
    %45 = vector.shape_cast %42 : vector<2x8xf32> to vector<1x2x8xf32>
    tpu.vector_store %arg9[%c0_26, %c0_27, %c0_28], %45 {strides = array<i32>} : memref<4x2x8xf32, #tpu.memory_space<vmem>>, vector<1x2x8xf32>,
    %46 = vector.extract_strided_slice %12 {offsets = [0, 8], sizes = [2, 8], strides = [1, 1]} : vector<2x32xf32> to vector<2x8xf32>
    %47 = arith.addf %24, %46 : vector<2x8xf32>
    %cst_29 = arith.constant dense<0.000000e+00> : vector<2xf32>
    %48 = vector.multi_reduction <add>, %46, %cst_29 [1] : vector<2x8xf32> to vector<2xf32>
    %49 = vector.shape_cast %48 : vector<2xf32> to vector<2x1xf32>
    %cst_30 = arith.constant 8.000000e+00 : f32
    %50 = vector.broadcast %cst_30 : f32 to vector<2x1xf32>
    %51 = arith.divf %49, %50 : vector<2x1xf32>
    %52 = vector.broadcast %51 : vector<2x1xf32> to vector<2x8xf32>
    %53 = arith.subf %47, %52 : vector<2x8xf32>
    %cst_31 = arith.constant dense<0xFF800000> : vector<2xf32>
    %54 = vector.multi_reduction <maximumf>, %53, %cst_31 [1] : vector<2x8xf32> to vector<2xf32>
    %55 = vector.shape_cast %54 : vector<2xf32> to vector<2x1xf32>
    %56 = vector.broadcast %55 : vector<2x1xf32> to vector<2x8xf32>
    %57 = arith.subf %53, %56 : vector<2x8xf32>
    %58 = math.exp %57 : vector<2x8xf32>
    %cst_32 = arith.constant dense<0.000000e+00> : vector<2xf32>
    %59 = vector.multi_reduction <add>, %58, %cst_32 [1] : vector<2x8xf32> to vector<2xf32>
    %60 = vector.shape_cast %59 : vector<2xf32> to vector<2x1xf32>
    %61 = tpu.reciprocal %60 : vector<2x1xf32> -> vector<2x1xf32>
    %62 = vector.broadcast %61 : vector<2x1xf32> to vector<2x8xf32>
    %63 = arith.mulf %58, %62 : vector<2x8xf32>
    %c1 = arith.constant 1 : index
    %c0_33 = arith.constant 0 : index
    %c0_34 = arith.constant 0 : index
    %64 = vector.load %arg9[%c1, %c0_33, %c0_34] : memref<4x2x8xf32, #tpu.memory_space<vmem>>, vector<1x2x8xf32>
    %65 = vector.shape_cast %64 : vector<1x2x8xf32> to vector<2x8xf32>
    %66 = vector.shape_cast %63 : vector<2x8xf32> to vector<1x2x8xf32>
    tpu.vector_store %arg9[%c1, %c0_33, %c0_34], %66 {strides = array<i32>} : memref<4x2x8xf32, #tpu.memory_space<vmem>>, vector<1x2x8xf32>,
    %67 = vector.extract_strided_slice %12 {offsets = [0, 16], sizes = [2, 8], strides = [1, 1]} : vector<2x32xf32> to vector<2x8xf32>
    %68 = arith.addf %24, %67 : vector<2x8xf32>
    %cst_35 = arith.constant dense<0.000000e+00> : vector<2xf32>
    %69 = vector.multi_reduction <add>, %67, %cst_35 [1] : vector<2x8xf32> to vector<2xf32>
    %70 = vector.shape_cast %69 : vector<2xf32> to vector<2x1xf32>
    %cst_36 = arith.constant 8.000000e+00 : f32
    %71 = vector.broadcast %cst_36 : f32 to vector<2x1xf32>
    %72 = arith.divf %70, %71 : vector<2x1xf32>
    %73 = vector.broadcast %72 : vector<2x1xf32> to vector<2x8xf32>
    %74 = arith.subf %68, %73 : vector<2x8xf32>
    %cst_37 = arith.constant dense<0xFF800000> : vector<2xf32>
    %75 = vector.multi_reduction <maximumf>, %74, %cst_37 [1] : vector<2x8xf32> to vector<2xf32>
    %76 = vector.shape_cast %75 : vector<2xf32> to vector<2x1xf32>
    %77 = vector.broadcast %76 : vector<2x1xf32> to vector<2x8xf32>
    %78 = arith.subf %74, %77 : vector<2x8xf32>
    %79 = math.exp %78 : vector<2x8xf32>
    %cst_38 = arith.constant dense<0.000000e+00> : vector<2xf32>
    %80 = vector.multi_reduction <add>, %79, %cst_38 [1] : vector<2x8xf32> to vector<2xf32>
    %81 = vector.shape_cast %80 : vector<2xf32> to vector<2x1xf32>
    %82 = tpu.reciprocal %81 : vector<2x1xf32> -> vector<2x1xf32>
    %83 = vector.broadcast %82 : vector<2x1xf32> to vector<2x8xf32>
    %84 = arith.mulf %79, %83 : vector<2x8xf32>
    %c2 = arith.constant 2 : index
    %c0_39 = arith.constant 0 : index
    %c0_40 = arith.constant 0 : index
    %85 = vector.load %arg9[%c2, %c0_39, %c0_40] : memref<4x2x8xf32, #tpu.memory_space<vmem>>, vector<1x2x8xf32>
    %86 = vector.shape_cast %85 : vector<1x2x8xf32> to vector<2x8xf32>
    %87 = vector.shape_cast %84 : vector<2x8xf32> to vector<1x2x8xf32>
    tpu.vector_store %arg9[%c2, %c0_39, %c0_40], %87 {strides = array<i32>} : memref<4x2x8xf32, #tpu.memory_space<vmem>>, vector<1x2x8xf32>,
    %88 = vector.extract_strided_slice %12 {offsets = [0, 24], sizes = [2, 8], strides = [1, 1]} : vector<2x32xf32> to vector<2x8xf32>
    %89 = arith.addf %24, %88 : vector<2x8xf32>
    %cst_41 = arith.constant dense<0.000000e+00> : vector<2xf32>
    %90 = vector.multi_reduction <add>, %88, %cst_41 [1] : vector<2x8xf32> to vector<2xf32>
    %91 = vector.shape_cast %90 : vector<2xf32> to vector<2x1xf32>
    %cst_42 = arith.constant 8.000000e+00 : f32
    %92 = vector.broadcast %cst_42 : f32 to vector<2x1xf32>
    %93 = arith.divf %91, %92 : vector<2x1xf32>
    %94 = vector.broadcast %93 : vector<2x1xf32> to vector<2x8xf32>
    %95 = arith.subf %89, %94 : vector<2x8xf32>
    %cst_43 = arith.constant dense<0xFF800000> : vector<2xf32>
    %96 = vector.multi_reduction <maximumf>, %95, %cst_43 [1] : vector<2x8xf32> to vector<2xf32>
    %97 = vector.shape_cast %96 : vector<2xf32> to vector<2x1xf32>
    %98 = vector.broadcast %97 : vector<2x1xf32> to vector<2x8xf32>
    %99 = arith.subf %95, %98 : vector<2x8xf32>
    %100 = math.exp %99 : vector<2x8xf32>
    %cst_44 = arith.constant dense<0.000000e+00> : vector<2xf32>
    %101 = vector.multi_reduction <add>, %100, %cst_44 [1] : vector<2x8xf32> to vector<2xf32>
    %102 = vector.shape_cast %101 : vector<2xf32> to vector<2x1xf32>
    %103 = tpu.reciprocal %102 : vector<2x1xf32> -> vector<2x1xf32>
    %104 = vector.broadcast %103 : vector<2x1xf32> to vector<2x8xf32>
    %105 = arith.mulf %100, %104 : vector<2x8xf32>
    %c3 = arith.constant 3 : index
    %c0_45 = arith.constant 0 : index
    %c0_46 = arith.constant 0 : index
    %106 = vector.load %arg9[%c3, %c0_45, %c0_46] : memref<4x2x8xf32, #tpu.memory_space<vmem>>, vector<1x2x8xf32>
    %107 = vector.shape_cast %106 : vector<1x2x8xf32> to vector<2x8xf32>
    %108 = vector.shape_cast %105 : vector<2x8xf32> to vector<1x2x8xf32>
    tpu.vector_store %arg9[%c3, %c0_45, %c0_46], %108 {strides = array<i32>} : memref<4x2x8xf32, #tpu.memory_space<vmem>>, vector<1x2x8xf32>,
    return
  }
}

</mosaic_0001>

<bundles_post_ra>
// kernel: rainbow_dqn_forward.4
= control target key start
LH: loop header
LB: loop body
LE: loop exit
PB: predicated region body
PF: predicated region fallthrough
CT: control target
= control target key end

     0   :  { %s1912_s15 = smov 0   ;;  %s2331_s0 = inlined_call_operand.vmem [shape: f32[2,56,32], index: 0, kind: input, shape index: {}]   ;;  %s2332_s1 = inlined_call_operand.vmem [shape: f32[9,32,64], index: 1, kind: input, shape index: {}]   ;;  %s2333_s2 = inlined_call_operand.vmem [shape: f32[1,64], index: 2, kind: input, shape index: {}]   ;;  %s2334_s3 = inlined_call_operand.vmem [shape: f32[4,27], index: 3, kind: input, shape index: {}]   ;;  %s2335_s4 = inlined_call_operand.vmem [shape: f32[2,4,64], index: 4, kind: output, shape index: {}]  }
   0x1 LB: > { %s1465_s16 = sadd.s32 4294967295, %s1883_s15   ;;  %p1469_p0 = scmp.ge.s32.totalorder %s1883_s15, 1  ;;  %s1883_s15 = sphi %s1912_s15, %s14_s15  }
   0x2   : > { %p162_p1 = scmp.lt.s32.totalorder %s1883_s15, 3 }
   0x4   : > { %p163_p2 = pnand %p1469_p0, %p162_p1 }
   0x5   : > { %p187_p3 = scmp.lt.s32.totalorder (!%p163_p2), %s1465_s16, 1 }
   0x6   : > { %166 = sbr.rel (%p163_p2) target bundleno = 523 (0x20b), region = 36 }
   0xb   : > { %v1475_v0 = vld [vmem:[%s2332_s1 + $0x38] sm:$0xff]  ;;  %v1885_v1 = vmov 0.0   ;;  %v1474_v2 = vld [vmem:[%s2332_s1 + $0x30] sm:$0xff]  ;;  %s2337_s16 = smov (!%p187_p3, %s1465_s16), 1  ;;  %v1473_v3 = vld [vmem:[%s2332_s1 + $0x28] sm:$0xff]  ;;  %vm215_vm0 = vcmask 261120  }
   0xc   : > { %1640 = vmatprep.subr.mxu0 %v1885_v1  ;;  %1858 = vmatprep.subr.mxu1 %v1885_v1  ;;  %s1866_s23 = smul.u32 56, %s2337_s16  ;;  %v1472_v4 = vld [vmem:[%s2332_s1 + $0x20] sm:$0xff]  ;;  %vm1886_vm1 = vmmov 0   ;;  %v204_v7 = vld [vmem:[%s2332_s1 + $0x18] sm:$0xff]  ;;  %v203_v8 = vld [vmem:[%s2332_s1 + $0x10] sm:$0xff]  ;;  %vm1288_vm2 = vcmask 1046528  }
   0xd   : > { %1641 = vmatpush3.msra.mxu0 %v1475_v0  ;;  %1862 = vmatpush3.msra.mxu1 %v1475_v0  ;;  %v202_v11 = vld [vmem:[%s2332_s1 + $0x8] sm:$0xff]  ;;  %v1489_v12 = vld [vmem:[%s2332_s1 + $0x58] sm:$0xff]  ;;  %v201_v13 = vld [vmem:[%s2332_s1] sm:$0xff]  ;;  %vm1313_vm3 = vcmask 1040384   ;;  %vm1336_vm4 = vcmask 1042432   ;;  %vm1332_vm5 = vcmask 220160  }
   0xe   : > { %1642 = vmatprep.subr.mxu0 %v1885_v1  ;;  %1859 = vmatprep.subr.mxu1 %v1885_v1  ;;  %s1944_s28 = scalar_lea.vmem %s2331_s0, %s1866_s23  ;;  %v1488_v14 = vld [vmem:[%s2332_s1 + $0x50] sm:$0xff]  ;;  %v1487_v17 = vld [vmem:[%s2332_s1 + $0x48] sm:$0xff]  ;;  %v1486_v18 = vld [vmem:[%s2332_s1 + $0x40] sm:$0xff]  ;;  %s1471_s26 = sshll.u32 %s2337_s16, 2  ;;  %vm1410_vm6 = vcmask 519168  }
   0xf   : > { %1643 = vmatpush3.msra.mxu0 %v1474_v2  ;;  %1863 = vmatpush3.msra.mxu1 %v1474_v2  ;;  %v205_v5 = vld [vmem:[%s1944_s28 + $0x1] sm:$0xff]  ;;  %v1950_v6 = vld [vmem:[%s1944_s28 + $0x19] sm:$0xff]  ;;  %v1969_v9 = vld [vmem:[%s1944_s28 + $0x9] sm:$0xff]  ;;  %s195_s30 = scalar_lea.vmem %s2335_s4, %s1471_s26 }
  0x10   : > { %1644 = vmatprep.subr.mxu0 %v1885_v1  ;;  %1860 = vmatprep.subr.mxu1 %v1885_v1  ;;  %v209_v10 = vld [vmem:[%s1944_s28 + $0x21] sm:$0x7]  ;;  %v1995_v15 = vld [vmem:[%s1944_s28 + $0x11] sm:$0xff]  ;;  %v2015_v19 = vld [vmem:[%s1944_s28 + $0x8] sm:$0xff] }
  0x11   : > { %1645 = vmatpush3.msra.mxu0 %v1473_v3  ;;  %1864 = vmatpush3.msra.mxu1 %v1473_v3  ;;  %v196_v16 = vld [vmem:[%s1944_s28] sm:$0xff]  ;;  %v1498_v21 = vld [vmem:[%s2332_s1 + $0x78] sm:$0xff]  ;;  %v2031_v22 = vld [vmem:[%s1944_s28 + $0x10] sm:$0xff] }
  0x12   : > { %1646 = vmatprep.subr.mxu0 %v1885_v1  ;;  %1861 = vmatprep.subr.mxu1 %v1885_v1  ;;  %v426_v20 = vld [vmem:[%s1944_s28 + $0x2] sm:$0xff]  ;;  %v1507_v23 = vld [vmem:[%s2332_s1 + $0x98] sm:$0xff]  ;;  %v427_v24 = vld [vmem:[%s1944_s28 + $0xa] sm:$0xff] }
  0x13   : > { %1647 = vmatpush3.msra.mxu0 %v1472_v4  ;;  %1865 = vmatpush3.msra.mxu1 %v1472_v4  ;;  %v1497_v25 = vld [vmem:[%s2332_s1 + $0x70] sm:$0xff]  ;;  %v2050_v26 = vld [vmem:[%s1944_s28 + $0x18] sm:$0xff]  ;;  %v1496_v29 = vld [vmem:[%s2332_s1 + $0x68] sm:$0xff] }
  0x14   : > { %1648 = vmatprep.mubr.msk.f32.mxu0 %vm1886_vm1, %v1885_v1  ;;  %1657 = vmatprep.mubr.msk.f32.mxu1 %vm1886_vm1, %v1885_v1  ;;  %v1506_v27 = vld [vmem:[%s2332_s1 + $0x90] sm:$0xff]  ;;  %v200_v30 = vld [vmem:[%s1944_s28 + $0x20] sm:$0x7]  ;;  %v1505_v31 = vld [vmem:[%s2332_s1 + $0x88] sm:$0xff] }
  0x15   : > { %1649 = vmatmul.mubr.msk.f32.vlgmr.msra.gmra.mxu0 %vm215_vm0, %v205_v5  ;;  %1658 = vmatmul.mubr.msk.f32.vlgmr.msra.gmra.mxu1 %vm215_vm0, %v1950_v6  ;;  %v428_v28 = vld [vmem:[%s1944_s28 + $0x12] sm:$0xff]  ;;  %v429_v32 = vld [vmem:[%s1944_s28 + $0x1a] sm:$0xff]  ;;  %v546_v34 = vld [vmem:[%s1944_s28 + $0x7] sm:$0xff] }
  0x16   : > { %1663 = vmatprep.subr.mxu1 %v1885_v1  ;;  %1651 = vmatprep.mubr.msk.f32.mxu0 %vm1886_vm1, %v1885_v1  ;;  %v1495_v33 = vld [vmem:[%s2332_s1 + $0x60] sm:$0xff]  ;;  %v1516_v37 = vld [vmem:[%s2332_s1 + $0xb8] sm:$0xff]  ;;  %v2101_v38 = vld [vmem:[%s1944_s28 + $0xf] sm:$0xff] }
  0x17   : > { %1664 = vmatpush3.msra.mxu1 %v204_v7  ;;  %1660 = vmatprep.mubr.msk.f32.mxu1 %vm1886_vm1, %v1885_v1  ;;  %v1504_v35 = vld [vmem:[%s2332_s1 + $0x80] sm:$0xff]  ;;  %v1515_v39 = vld [vmem:[%s2332_s1 + $0xb0] sm:$0xff]  ;;  %v1525_v40 = vld [vmem:[%s2332_s1 + $0xd8] sm:$0xff] }
  0x18   : > { %1665 = vmatprep.subr.mxu1 %v1885_v1  ;;  %1686 = vmatprep.subr.mxu0 %v1885_v1  ;;  %v430_v36 = vld [vmem:[%s1944_s28 + $0x22] sm:$0x7]  ;;  %v2120_v41 = vld [vmem:[%s1944_s28 + $0x17] sm:$0xff]  ;;  %v1514_v42 = vld [vmem:[%s2332_s1 + $0xa8] sm:$0xff] }
  0x19   : > { %1666 = vmatpush3.msra.mxu1 %v203_v8  ;;  %1652 = vmatmul.mubr.msk.f32.gmra.mxu0 %vm215_vm0, %v1969_v9  ;;  %v1524_v43 = vld [vmem:[%s2332_s1 + $0xd0] sm:$0xff]  ;;  %v2139_v44 = vld [vmem:[%s1944_s28 + $0x1f] sm:$0xff]  ;;  %v1523_v46 = vld [vmem:[%s2332_s1 + $0xc8] sm:$0xff] }
  0x1a   : > { %1661 = vmatmul.mubr.msk.f32.gmra.mxu1 %vm215_vm0, %v209_v10  ;;  %1667 = vmatprep.subr.mxu1 %v1885_v1  ;;  %v1513_v45 = vld [vmem:[%s2332_s1 + $0xa0] sm:$0xff]  ;;  %v670_v50 = vld [vmem:[%s1944_s28 + $0x28] sm:$0x7]  ;;  %v1534_v51 = vld [vmem:[%s2332_s1 + $0xf8] sm:$0xff] }
  0x1b   : > { %1668 = vmatpush3.msra.mxu1 %v202_v11  ;;  %1687 = vmatpush3.msra.mxu0 %v1489_v12  ;;  %v550_v47 = vld [vmem:[%s1944_s28 + $0x27] sm:$0x7]  ;;  %v906_v52 = vld [vmem:[%s1944_s28 + $0xe] sm:$0xff]  ;;  %v1543_v54 = vld [vmem:[%s2332_s1 + $0x118] sm:$0xff] }
  0x1c   : > { %1669 = vmatprep.subr.mxu1 %v1885_v1  ;;  %1688 = vmatprep.subr.mxu0 %v1885_v1  ;;  %v2161_v48 = vld [vmem:[%s1944_s28 + $0x20] sm:$0xff]  ;;  %v1533_v53 = vld [vmem:[%s2332_s1 + $0xf0] sm:$0xff]  ;;  %v1532_v56 = vld [vmem:[%s2332_s1 + $0xe8] sm:$0xff] }
  0x1d   : > { %1654 = vmatprep.mubr.msk.f32.mxu0 %vm1886_vm1, %v1885_v1  ;;  %1670 = vmatpush3.msra.mxu1 %v201_v13  ;;  %v1522_v49 = vld [vmem:[%s2332_s1 + $0xc0] sm:$0xff]  ;;  %v907_v55 = vld [vmem:[%s1944_s28 + $0x16] sm:$0xff]  ;;  %v1541_v61 = vld [vmem:[%s2332_s1 + $0x108] sm:$0xff] }
  0x1e   : > { %1671 = vmatprep.mubr.msk.f32.mxu1 %vm1886_vm1, %v1885_v1  ;;  %1689 = vmatpush3.msra.mxu0 %v1488_v14  ;;  %v1542_v57 = vld [vmem:[%s2332_s1 + $0x110] sm:$0xff]  ;;  %v789_v58 = vld [vmem:[%s1944_s28 + $0x21] sm:$0xff]  ;;  %v790_v62 = vld [vmem:[%s1944_s28 + $0x29] sm:$0x7] }
  0x1f   : > { %1655 = vmatmul.mubr.msk.f32.gmra.mxu0 %vm215_vm0, %v1995_v15  ;;  %1672 = vmatmul.mubr.msk.f32.vlgmr.msra.gmra.mxu1 %vm215_vm0, %v196_v16  ;;  %v908_v59 = vld [vmem:[%s1944_s28 + $0x1e] sm:$0xff]  ;;  %v909_v63 = vld [vmem:[%s1944_s28 + $0x26] sm:$0xff]  ;;  %v910_v2 = vld [vmem:[%s1944_s28 + $0x2e] sm:$0x7] }
  0x20   : > { %1690 = vmatprep.subr.mxu0 %v1885_v1  ;;  %1674 = vmatprep.mubr.msk.f32.mxu1 %vm1886_vm1, %v1885_v1  ;;  %v1531_v60 = vld [vmem:[%s2332_s1 + $0xe0] sm:$0xff]  ;;  %v1030_v4 = vld [vmem:[%s1944_s28 + $0x2f] sm:$0x7] }
  0x21   : > { %1691 = vmatpush3.msra.mxu0 %v1487_v17  ;;  %1694 = vmatprep.mubr.msk.f32.mxu0 %vm1886_vm1, %v1885_v1  ;;  %v1540_v0 = vld [vmem:[%s2332_s1 + $0x100] sm:$0xff]  ;;  %v1149_v5 = vld [vmem:[%s1944_s28 + $0x28] sm:$0xff] }
  0x22   : > { %1692 = vmatprep.subr.mxu0 %v1885_v1  ;;  %1709 = vmatprep.subr.mxu1 %v1885_v1  ;;  %v1029_v3 = vld [vmem:[%s1944_s28 + $0x27] sm:$0xff] }
  0x23   : > { %1693 = vmatpush3.msra.mxu0 %v1486_v18  ;;  %1675 = vmatmul.mubr.msk.f32.gmra.mxu1 %vm215_vm0, %v2015_v19 }
  0x24   : > { %1695 = vmatmul.mubr.msk.f32.vlgmr.msra.gmra.mxu0 %vm215_vm0, %v426_v20  ;;  %1677 = vmatprep.mubr.msk.f32.mxu1 %vm1886_vm1, %v1885_v1 }
  0x25   : > { %1697 = vmatprep.mubr.msk.f32.mxu0 %vm1886_vm1, %v1885_v1  ;;  %1710 = vmatpush3.msra.mxu1 %v1498_v21 }
  0x26   : > { %1711 = vmatprep.subr.mxu1 %v1885_v1  ;;  %1732 = vmatprep.subr.mxu0 %v1885_v1 }
  0x27   : > { %1678 = vmatmul.mubr.msk.f32.gmra.mxu1 %vm215_vm0, %v2031_v22  ;;  %1733 = vmatpush3.msra.mxu0 %v1507_v23 }
  0x28   : > { %1698 = vmatmul.mubr.msk.f32.gmra.mxu0 %vm215_vm0, %v427_v24  ;;  %1680 = vmatprep.mubr.msk.f32.mxu1 %vm1886_vm1, %v1885_v1 }
  0x29   : > { %1700 = vmatprep.mubr.msk.f32.mxu0 %vm1886_vm1, %v1885_v1  ;;  %1712 = vmatpush3.msra.mxu1 %v1497_v25 }
  0x2a   : > { %1713 = vmatprep.subr.mxu1 %v1885_v1  ;;  %1734 = vmatprep.subr.mxu0 %v1885_v1 }
  0x2b   : > { %1681 = vmatmul.mubr.msk.f32.gmra.mxu1 %vm215_vm0, %v2050_v26  ;;  %1735 = vmatpush3.msra.mxu0 %v1506_v27 }
  0x2c   : > { %1701 = vmatmul.mubr.msk.f32.gmra.mxu0 %vm215_vm0, %v428_v28  ;;  %1683 = vmatprep.mubr.msk.f32.mxu1 %vm1886_vm1, %v1885_v1 }
  0x2d   : > { %1703 = vmatprep.mubr.msk.f32.mxu0 %vm1886_vm1, %v1885_v1  ;;  %1714 = vmatpush3.msra.mxu1 %v1496_v29 }
  0x2e   : > { %1715 = vmatprep.subr.mxu1 %v1885_v1  ;;  %1736 = vmatprep.subr.mxu0 %v1885_v1 }
  0x2f   : > { %1684 = vmatmul.mubr.msk.f32.gmra.mxu1 %vm215_vm0, %v200_v30  ;;  %1737 = vmatpush3.msra.mxu0 %v1505_v31 }
  0x30   : > { %1704 = vmatmul.mubr.msk.f32.gmra.mxu0 %vm215_vm0, %v429_v32  ;;  %1716 = vmatpush3.msra.mxu1 %v1495_v33 }
  0x31   : > { %1706 = vmatprep.mubr.msk.f32.mxu0 %vm1886_vm1, %v1885_v1  ;;  %1717 = vmatprep.mubr.msk.f32.mxu1 %vm1886_vm1, %v1885_v1 }
  0x32   : > { %1738 = vmatprep.subr.mxu0 %v1885_v1  ;;  %1755 = vmatprep.subr.mxu1 %v1885_v1 }
  0x33   : > { %1718 = vmatmul.mubr.msk.f32.vlgmr.msra.gmra.mxu1 %vm215_vm0, %v546_v34  ;;  %1739 = vmatpush3.msra.mxu0 %v1504_v35 }
  0x34   : > { %1707 = vmatmul.mubr.msk.f32.gmra.mxu0 %vm215_vm0, %v430_v36  ;;  %1720 = vmatprep.mubr.msk.f32.mxu1 %vm1886_vm1, %v1885_v1 }
  0x35   : > { %1740 = vmatprep.mubr.msk.f32.mxu0 %vm1886_vm1, %v1885_v1  ;;  %1756 = vmatpush3.msra.mxu1 %v1516_v37 }
  0x36   : > { %1757 = vmatprep.subr.mxu1 %v1885_v1  ;;  %1778 = vmatprep.subr.mxu0 %v1885_v1 }
  0x37   : > { %1721 = vmatmul.mubr.msk.f32.gmra.mxu1 %vm215_vm0, %v2101_v38 }
  0x38   : > { %1741 = vmatmul.mubr.msk.f32.vlgmr.msra.gmra.mxu0 %vm215_vm0, %v2015_v19  ;;  %1723 = vmatprep.mubr.msk.f32.mxu1 %vm1886_vm1, %v1885_v1 }
  0x39   : > { %1743 = vmatprep.mubr.msk.f32.mxu0 %vm1886_vm1, %v1885_v1  ;;  %1758 = vmatpush3.msra.mxu1 %v1515_v39 }
  0x3a   : > { %1759 = vmatprep.subr.mxu1 %v1885_v1  ;;  %1779 = vmatpush3.msra.mxu0 %v1525_v40 }
  0x3b   : > { %1724 = vmatmul.mubr.msk.f32.gmra.mxu1 %vm215_vm0, %v2120_v41  ;;  %1780 = vmatprep.subr.mxu0 %v1885_v1 }
  0x3c   : > { %1744 = vmatmul.mubr.msk.f32.gmra.mxu0 %vm215_vm0, %v2031_v22  ;;  %1726 = vmatprep.mubr.msk.f32.mxu1 %vm1886_vm1, %v1885_v1 }
  0x3d   : > { %1746 = vmatprep.mubr.msk.f32.mxu0 %vm1886_vm1, %v1885_v1  ;;  %1760 = vmatpush3.msra.mxu1 %v1514_v42 }
  0x3e   : > { %1761 = vmatprep.subr.mxu1 %v1885_v1  ;;  %1781 = vmatpush3.msra.mxu0 %v1524_v43 }
  0x3f   : > { %1727 = vmatmul.mubr.msk.f32.gmra.mxu1 %vm215_vm0, %v2139_v44  ;;  %1782 = vmatprep.subr.mxu0 %v1885_v1 }
  0x40   : > { %1747 = vmatmul.mubr.msk.f32.gmra.mxu0 %vm215_vm0, %v2050_v26  ;;  %1729 = vmatprep.mubr.msk.f32.mxu1 %vm1886_vm1, %v1885_v1 }
  0x41   : > { %1749 = vmatprep.mubr.msk.f32.mxu0 %vm1886_vm1, %v1885_v1  ;;  %1762 = vmatpush3.msra.mxu1 %v1513_v45 }
  0x42   : > { %1783 = vmatpush3.msra.mxu0 %v1523_v46  ;;  %1801 = vmatprep.subr.mxu1 %v1885_v1 }
  0x43   : > { %1730 = vmatmul.mubr.msk.f32.gmra.mxu1 %vm215_vm0, %v550_v47  ;;  %1784 = vmatprep.subr.mxu0 %v1885_v1 }
  0x44   : > { %1750 = vmatmul.mubr.msk.f32.gmra.mxu0 %vm215_vm0, %v2161_v48  ;;  %1763 = vmatprep.mubr.msk.f32.mxu1 %vm1886_vm1, %v1885_v1 }
  0x45   : > { %1752 = vmatprep.mubr.msk.f32.mxu0 %vm1886_vm1, %v1885_v1  ;;  %1785 = vmatpush3.msra.mxu0 %v1522_v49 }
  0x46   : > { %1824 = vmatprep.subr.mxu0 %v1885_v1 }
  0x47   : > { %1764 = vmatmul.mubr.msk.f32.vlgmr.msra.gmra.mxu1 %vm215_vm0, %v1969_v9 }
  0x48   : > { %1753 = vmatmul.mubr.msk.f32.gmra.mxu0 %vm215_vm0, %v670_v50  ;;  %1766 = vmatprep.mubr.msk.f32.mxu1 %vm1886_vm1, %v1885_v1 }
  0x49   : > { %1786 = vmatprep.mubr.msk.f32.mxu0 %vm1886_vm1, %v1885_v1  ;;  %1802 = vmatpush3.msra.mxu1 %v1534_v51 }
  0x4a   : > { %1803 = vmatprep.subr.mxu1 %v1885_v1 }
  0x4b   : > { %1767 = vmatmul.mubr.msk.f32.gmra.mxu1 %vm215_vm0, %v1995_v15 }
  0x4c   : > { %1787 = vmatmul.mubr.msk.f32.vlgmr.msra.gmra.mxu0 %vm215_vm0, %v906_v52  ;;  %1769 = vmatprep.mubr.msk.f32.mxu1 %vm1886_vm1, %v1885_v1 }
  0x4d   : > { %1789 = vmatprep.mubr.msk.f32.mxu0 %vm1886_vm1, %v1885_v1  ;;  %1804 = vmatpush3.msra.mxu1 %v1533_v53 }
  0x4e   : > { %1805 = vmatprep.subr.mxu1 %v1885_v1  ;;  %1825 = vmatpush3.msra.mxu0 %v1543_v54 }
  0x4f   : > { %1770 = vmatmul.mubr.msk.f32.gmra.mxu1 %vm215_vm0, %v1950_v6  ;;  %1826 = vmatprep.subr.mxu0 %v1885_v1  ;;  %v1150_v6 = vld [vmem:[%s1944_s28 + $0x30] sm:$0x7] }
  0x50   : > { %1790 = vmatmul.mubr.msk.f32.gmra.mxu0 %vm215_vm0, %v907_v55  ;;  %1772 = vmatprep.mubr.msk.f32.mxu1 %vm1886_vm1, %v1885_v1 }
  0x51   : > { %1792 = vmatprep.mubr.msk.f32.mxu0 %vm1886_vm1, %v1885_v1  ;;  %1806 = vmatpush3.msra.mxu1 %v1532_v56 }
  0x52   : > { %1807 = vmatprep.subr.mxu1 %v1885_v1  ;;  %1827 = vmatpush3.msra.mxu0 %v1542_v57 }
  0x53   : > { %1773 = vmatmul.mubr.msk.f32.gmra.mxu1 %vm215_vm0, %v789_v58  ;;  %1828 = vmatprep.subr.mxu0 %v1885_v1 }
  0x54   : > { %1793 = vmatmul.mubr.msk.f32.gmra.mxu0 %vm215_vm0, %v908_v59  ;;  %1775 = vmatprep.mubr.msk.f32.mxu1 %vm1886_vm1, %v1885_v1 }
  0x55   : > { %1795 = vmatprep.mubr.msk.f32.mxu0 %vm1886_vm1, %v1885_v1  ;;  %1808 = vmatpush3.msra.mxu1 %v1531_v60 }
  0x56   : > { %1829 = vmatpush3.msra.mxu0 %v1541_v61  ;;  %1847 = vmatprep.subr.mxu1 %v1885_v1 }
  0x57   : > { %1776 = vmatmul.mubr.msk.f32.gmra.mxu1 %vm215_vm0, %v790_v62  ;;  %1830 = vmatprep.subr.mxu0 %v1885_v1 }
  0x58   : > { %1796 = vmatmul.mubr.msk.f32.gmra.mxu0 %vm215_vm0, %v909_v63  ;;  %1809 = vmatprep.mubr.msk.f32.mxu1 %vm1886_vm1, %v1885_v1 }
  0x59   : > { %1798 = vmatprep.mubr.msk.f32.mxu0 %vm1886_vm1, %v1885_v1  ;;  %1831 = vmatpush3.msra.mxu0 %v1540_v0 }
  0x5b   : > { %1810 = vmatmul.mubr.msk.f32.vlgmr.msra.gmra.mxu1 %vm215_vm0, %v2101_v38 }
  0x5c   : > { %1799 = vmatmul.mubr.msk.f32.gmra.mxu0 %vm215_vm0, %v910_v2  ;;  %1812 = vmatprep.mubr.msk.f32.mxu1 %vm1886_vm1, %v1885_v1 }
  0x5d   : > { %1832 = vmatprep.mubr.msk.f32.mxu0 %vm1886_vm1, %v1885_v1 }
  0x5f   : > { %1813 = vmatmul.mubr.msk.f32.gmra.mxu1 %vm215_vm0, %v2120_v41 }
  0x60   : > { %1833 = vmatmul.mubr.msk.f32.vlgmr.msra.gmra.mxu0 %vm215_vm0, %v2031_v22  ;;  %1815 = vmatprep.mubr.msk.f32.mxu1 %vm1886_vm1, %v1885_v1 }
  0x61   : > { %1835 = vmatprep.mubr.msk.f32.mxu0 %vm1886_vm1, %v1885_v1 }
  0x63   : > { %1816 = vmatmul.mubr.msk.f32.gmra.mxu1 %vm215_vm0, %v2139_v44 }
  0x64   : > { %1836 = vmatmul.mubr.msk.f32.gmra.mxu0 %vm215_vm0, %v2050_v26  ;;  %1818 = vmatprep.mubr.msk.f32.mxu1 %vm1886_vm1, %v1885_v1 }
  0x65   : > { %1838 = vmatprep.mubr.msk.f32.mxu0 %vm1886_vm1, %v1885_v1 }
  0x67   : > { %1819 = vmatmul.mubr.msk.f32.gmra.mxu1 %vm215_vm0, %v1029_v3 }
  0x68   : > { %1839 = vmatmul.mubr.msk.f32.gmra.mxu0 %vm215_vm0, %v2161_v48  ;;  %1821 = vmatprep.mubr.msk.f32.mxu1 %vm1886_vm1, %v1885_v1 }
  0x69   : > { %1841 = vmatprep.mubr.msk.f32.mxu0 %vm1886_vm1, %v1885_v1 }
  0x6b   : > { %1822 = vmatmul.mubr.msk.f32.gmra.mxu1 %vm215_vm0, %v1030_v4 }
  0x6c   : > { %1842 = vmatmul.mubr.msk.f32.gmra.mxu0 %vm215_vm0, %v1149_v5  ;;  %1855 = vmatprep.mubr.msk.f32.mxu1 %vm1886_vm1, %v1885_v1 }
  0x6d   : > { %1844 = vmatprep.mubr.msk.f32.mxu0 %vm1886_vm1, %v1885_v1 }
  0x70   : > { %1845 = vmatmul.mubr.msk.f32.gmra.mxu0 %vm215_vm0, %v1150_v6 }
  0xd5   : > { %v297_v7 = vpop.f32.mrf.mxu0  ;;  %v2289_v8 = vpop.f32.mrf.mxu1 }
  0xd7   : > { %v1650_v9 = vpop.f32.mrf.mxu0  ;;  %v1659_v10 = vpop.f32.mrf.mxu1 }
  0xd9   : > { %v302_v11 = vpop.f32.mrf.mxu0 }
  0xda   : > { %v2291_v12 = vpop.f32.mrf.mxu1 }
  0xdb   : > { %v1653_v13 = vpop.f32.mrf.mxu0 }
  0xdc   : > { %v1662_v14 = vpop.f32.mrf.mxu1 }
  0xdf   : > { %v2293_v15 = vpop.f32.mrf.mxu0  ;;  %v402_v16 = vpop.f32.mrf.mxu1 }
  0xe0   : > { %v403_v17 = vadd.f32 %v402_v16, %v297_v7 }
  0xe1   : > { %v1656_v18 = vpop.f32.mrf.mxu0  ;;  %v1673_v19 = vpop.f32.mrf.mxu1 }
  0xe3   : > { %v407_v20 = vpop.f32.mrf.mxu1 }
  0xe4   : > { %v408_v21 = vadd.f32 %v407_v20, %v302_v11  ;;  %v517_v22 = vpop.f32.mrf.mxu0 }
  0xe5   : > { %v541_v23 = vadd.f32 %v517_v22, %v403_v17  ;;  %v1676_v24 = vpop.f32.mrf.mxu1 }
  0xe6   : > { %v1696_v25 = vpop.f32.mrf.mxu0 }
  0xe7   : > { %v412_v26 = vpop.f32.mrf.mxu1 }
  0xe8   : > { %v522_v27 = vpop.f32.mrf.mxu0 }
  0xe9   : > { %v542_v28 = vadd.f32 %v522_v27, %v408_v21  ;;  %v1679_v29 = vpop.f32.mrf.mxu1  ;;  %v413_v21 = vadd.f32 %v412_v26, %v2293_v15  ;;  %v1549_v15 = vld [vmem:[%s2333_s2] ss:$0 sm:$0xff] }
  0xea   : > { %v1699_v30 = vpop.f32.mrf.mxu0 }
  0xeb   : > { %v417_v31 = vpop.f32.mrf.mxu1 }
  0xec   : > { %v527_v32 = vpop.f32.mrf.mxu0 }
  0xed   : > { %v1682_v33 = vpop.f32.mrf.mxu1  ;;  %v543_v29 = vadd.f32 %v527_v32, %v413_v21 }
  0xee   : > { %v1702_v34 = vpop.f32.mrf.mxu0 }
  0xef   : > { %v2295_v35 = vpop.f32.mrf.mxu1 }
  0xf0   : > { %v532_v36 = vpop.f32.mrf.mxu0 }
  0xf1   : > { %v1685_v37 = vpop.f32.mrf.mxu1 }
  0xf2   : > { %v1705_v38 = vpop.f32.mrf.mxu0 }
  0xf3   : > { %v637_v39 = vpop.f32.mrf.mxu1  ;;  %v418_v38 = vadd.f32 %v417_v31, %v2289_v8 }
  0xf4   : > { %v2297_v40 = vpop.f32.mrf.mxu0  ;;  %v661_v14 = vadd.f32 %v637_v39, %v541_v23 }
  0xf5   : > { %v1719_v41 = vpop.f32.mrf.mxu1  ;;  %v544_v26 = vadd.f32 %v532_v36, %v418_v38 }
  0xf6   : > { %v1708_v42 = vpop.f32.mrf.mxu0 }
  0xf7   : > { %v642_v43 = vpop.f32.mrf.mxu1 }
  0xf8   : > { %v757_v44 = vpop.f32.mrf.mxu0  ;;  %v662_v22 = vadd.f32 %v642_v43, %v542_v28 }
  0xf9   : > { %v1722_v45 = vpop.f32.mrf.mxu1  ;;  %v781_v18 = vadd.f32 %v757_v44, %v661_v14 }
  0xfa   : > { %v1742_v46 = vpop.f32.mrf.mxu0 }
  0xfb   : > { %v647_v47 = vpop.f32.mrf.mxu1  ;;  %v423_v46 = vadd.f32 %v2295_v35, %v2291_v12 }
  0xfc   : > { %v762_v48 = vpop.f32.mrf.mxu0  ;;  %v663_v41 = vadd.f32 %v647_v47, %v543_v29 }
  0xfd   : > { %v1725_v49 = vpop.f32.mrf.mxu1  ;;  %v782_v30 = vadd.f32 %v762_v48, %v662_v22 }
  0xfe   : > { %v1745_v50 = vpop.f32.mrf.mxu0 }
  0xff   : > { %v652_v51 = vpop.f32.mrf.mxu1 }
 0x100   : > { %v767_v52 = vpop.f32.mrf.mxu0  ;;  %v664_v49 = vadd.f32 %v652_v51, %v544_v26 }
 0x101   : > { %v1728_v53 = vpop.f32.mrf.mxu1  ;;  %v783_v28 = vadd.f32 %v767_v52, %v663_v41 }
 0x102   : > { %v1748_v54 = vpop.f32.mrf.mxu0  ;;  %v545_v53 = vadd.f32 %v2297_v40, %v423_v46 }
 0x103   : > { %v657_v55 = vpop.f32.mrf.mxu1 }
 0x104   : > { %v772_v56 = vpop.f32.mrf.mxu0  ;;  %v665_v52 = vadd.f32 %v657_v55, %v545_v53 }
 0x105   : > { %v1731_v57 = vpop.f32.mrf.mxu1 }
 0x106   : > { %v1751_v58 = vpop.f32.mrf.mxu0  ;;  %v784_v57 = vadd.f32 %v772_v56, %v664_v49 }
 0x107   : > { %v877_v59 = vpop.f32.mrf.mxu1 }
 0x108   : > { %v2299_v60 = vpop.f32.mrf.mxu0  ;;  %v901_v24 = vadd.f32 %v877_v59, %v781_v18 }
 0x109   : > { %v1765_v61 = vpop.f32.mrf.mxu1  ;;  %v785_v35 = vadd.f32 %v2299_v60, %v665_v52 }
 0x10a   : > { %v1754_v62 = vpop.f32.mrf.mxu0 }
 0x10b   : > { %v882_v63 = vpop.f32.mrf.mxu1 }
 0x10c   : > { %v997_v0 = vpop.f32.mrf.mxu0  ;;  %v902_v23 = vadd.f32 %v882_v63, %v782_v30 }
 0x10d   : > { %v1768_v2 = vpop.f32.mrf.mxu1  ;;  %v1021_v33 = vadd.f32 %v997_v0, %v901_v24 }
 0x10e   : > { %v1788_v3 = vpop.f32.mrf.mxu0 }
 0x10f   : > { %v887_v4 = vpop.f32.mrf.mxu1 }
 0x110   : > { %v1002_v5 = vpop.f32.mrf.mxu0  ;;  %v903_v8 = vadd.f32 %v887_v4, %v783_v28 }
 0x111   : > { %v1771_v6 = vpop.f32.mrf.mxu1  ;;  %v1022_v43 = vadd.f32 %v1002_v5, %v902_v23 }
 0x112   : > { %v1791_v7 = vpop.f32.mrf.mxu0 }
 0x113   : > { %v892_v9 = vpop.f32.mrf.mxu1 }
 0x114   : > { %v1007_v10 = vpop.f32.mrf.mxu0  ;;  %v904_v62 = vadd.f32 %v892_v9, %v784_v57  ;;  %v1331_v57 = vld [vmem:[%s2334_s3] sm:$0xf] }
 0x115   : > { %v1774_v11 = vpop.f32.mrf.mxu1  ;;  %v1023_v58 = vadd.f32 %v1007_v10, %v903_v8 }
 0x116   : > { %v1794_v13 = vpop.f32.mrf.mxu0 }
 0x117   : > { %v897_v16 = vpop.f32.mrf.mxu1 }
 0x118   : > { %v1012_v17 = vpop.f32.mrf.mxu0  ;;  %v905_v40 = vadd.f32 %v897_v16, %v785_v35 }
 0x119   : > { %v1777_v19 = vpop.f32.mrf.mxu1  ;;  %v1024_v3 = vadd.f32 %v1012_v17, %v904_v62 }
 0x11a   : > { %v1797_v20 = vpop.f32.mrf.mxu0 }
 0x11b   : > { %v1117_v25 = vpop.f32.mrf.mxu1 }
 0x11c   : > { %v1017_v27 = vpop.f32.mrf.mxu0  ;;  %v1141_v39 = vadd.f32 %v1117_v25, %v1021_v33 }
 0x11d   : > { %v1811_v34 = vpop.f32.mrf.mxu1  ;;  %v1025_v14 = vadd.f32 %v1017_v27, %v905_v40 }
 0x11e   : > { %v1800_v37 = vpop.f32.mrf.mxu0 }
 0x11f   : > { %v1122_v42 = vpop.f32.mrf.mxu1 }
 0x120   : > { %v1237_v44 = vpop.f32.mrf.mxu0  ;;  %v1142_v31 = vadd.f32 %v1122_v42, %v1022_v43 }
 0x121   : > { %v1261_v45 = vadd.f32 %v1237_v44, %v1141_v39  ;;  %v1814_v32 = vpop.f32.mrf.mxu1 }
 0x122   : > { %v1834_v48 = vpop.f32.mrf.mxu0 }
 0x123   : > { %v1273_v47 = vadd.f32 %v1549_v15, %v1261_v45  ;;  %v1127_v50 = vpop.f32.mrf.mxu1 }
 0x124   : > { %v1242_v54 = vpop.f32.mrf.mxu0  ;;  %v1143_v0 = vadd.f32 %v1127_v50, %v1023_v58 }
 0x125   : > { %v1262_v59 = vadd.f32 %v1242_v54, %v1142_v31  ;;  %v1817_v36 = vpop.f32.mrf.mxu1  ;;  %v1278_v63 = vmax.f32 %v1273_v47, 0.0 }
 0x126   : > { %v1837_v61 = vpop.f32.mrf.mxu0 }
 0x127   : > { %v1274_v2 = vadd.f32 %v1549_v15, %v1262_v59  ;;  %v1132_v12 = vpop.f32.mrf.mxu1  ;;  %v1289_v7 = vrot.slane %v1278_v63, 1 }
 0x128   : > { %v1247_v51 = vpop.f32.mrf.mxu0  ;;  %v1144_v11 = vadd.f32 %v1132_v12, %v1024_v3 }
 0x129   : > { %v1279_v4 = vmax.f32 %v1274_v2, 0.0  ;;  %v1263_v5 = vadd.f32 %v1247_v51, %v1143_v0  ;;  %v1820_v6 = vpop.f32.mrf.mxu1 }
 0x12a   : > { %v1840_v56 = vpop.f32.mrf.mxu0 }
 0x12b   : > { %v1290_v10 = vrot.slane %v1279_v4, 1  ;;  %v1275_v55 = vadd.f32 %v1549_v15, %v1263_v5  ;;  %v1137_v13 = vpop.f32.mrf.mxu1 }
 0x12c   : > { %v1252_v9 = vpop.f32.mrf.mxu0  ;;  %v1145_v24 = vadd.f32 %v1137_v13, %v1025_v14 }
 0x12d   : > { %v1291_v18 = vsel %vm1288_vm2, %v1289_v7, %v1290_v10  ;;  %v1280_v19 = vmax.f32 %v1275_v55, 0.0  ;;  %v1264_v20 = vadd.f32 %v1252_v9, %v1144_v11  ;;  %v1823_v60 = vpop.f32.mrf.mxu1 }
 0x12e   : > { %v1843_v21 = vpop.f32.mrf.mxu0  ;;  %v1303_v17 = vmax.f32 %v1278_v63, %v1291_v18 }
 0x12f   : > { %v1292_v22 = vrot.slane %v1280_v19, 1  ;;  %v1276_v25 = vadd.f32 %v1549_v15, %v1264_v20 }
 0x130   : > { %v1257_v16 = vpop.f32.mrf.mxu0  ;;  %v1314_v23 = vrot.slane %v1303_v17, 7 }
 0x131   : > { %v1293_v29 = vsel %vm1288_vm2, %v1290_v10, %v1292_v22  ;;  %v1281_v30 = vmax.f32 %v1276_v25, 0.0  ;;  %v1265_v33 = vadd.f32 %v1257_v16, %v1145_v24 }
 0x132   : > { %v1846_v34 = vpop.f32.mrf.mxu0  ;;  %v1304_v37 = vmax.f32 %v1279_v4, %v1293_v29 }
 0x133   : > { %v1294_v38 = vrot.slane %v1281_v30, 1  ;;  %v1277_v41 = vadd.f32 %v1549_v15, %v1265_v33 }
 0x134   : > { %v1315_v27 = vrot.slane %v1304_v37, 7 }
 0x135   : > { %v1295_v39 = vsel %vm1288_vm2, %v1292_v22, %v1294_v38  ;;  %v1282_v42 = vmax.f32 %v1277_v41, 0.0 }
 0x136   : > { %v1305_v44 = vmax.f32 %v1280_v19, %v1295_v39  ;;  %v1316_v26 = vsel %vm1313_vm3, %v1314_v23, %v1315_v27 }
 0x137   : > { %v1296_v28 = vrot.slane %v1282_v42, 1  ;;  %v1327_v43 = vmax.f32 %v1303_v17, %v1316_v26 }
 0x138   : > { %v1317_v45 = vrot.slane %v1305_v44, 7 }
 0x139   : > { %v1297_v32 = vsel %vm1288_vm2, %v1294_v38, %v1296_v28  ;;  %v1307_v46 = vmax.f32 %v1282_v42, %v1296_v28 }
 0x13a   : > { %v1306_v48 = vmax.f32 %v1281_v30, %v1297_v32  ;;  %v1318_v49 = vsel %vm1313_vm3, %v1315_v27, %v1317_v45 }
 0x13b   : > { %v1321_v8 = vrot.slane %v1307_v46, 7  ;;  %v1328_v15 = vmax.f32 %v1304_v37, %v1318_v49 }
 0x13c   : > { %v1319_v31 = vrot.slane %v1306_v48, 7 }
 0x13e   : > { %v1322_v47 = vsel %vm1313_vm3, %v1319_v31, %v1321_v8  ;;  %v1320_v50 = vsel %vm1313_vm3, %v1317_v45, %v1319_v31 }
 0x13f   : > { %v1330_v53 = vmax.f32 %v1306_v48, %v1322_v47  ;;  %v1329_v54 = vmax.f32 %v1305_v44, %v1320_v50 }
 0x141   : > { %1848 = vmatpush3.msk.msra.mxu1 %vm1336_vm4, %v1330_v53 }
 0x142   : > { %1849 = vmatprep.subr.mxu1 %v1885_v1 }
 0x143   : > { %1850 = vmatpush3.msra.mxu1 %v1329_v54 }
 0x144   : > { %1851 = vmatprep.subr.mxu1 %v1885_v1 }
 0x145   : > { %1852 = vmatpush3.msra.mxu1 %v1328_v15 }
 0x146   : > { %1853 = vmatprep.subr.mxu1 %v1885_v1 }
 0x147   : > { %1854 = vmatpush3.msra.mxu1 %v1327_v43 }
 0x148   : > { %1856 = vmatmul.mubr.msk.f32.vlgmr.msra.gmra.mxu1 %vm1332_vm5, %v1331_v57 }
 0x208   : > { %v1406_v58 = vpop.f32.mrf.mxu1 }
 0x209   : > { %1411 = vst.msk [vmem:[%s195_s30] sm:$0xf] %vm1410_vm6, %v1406_v58 }
 0x20a   : > { %v1857_v59 = vpop.f32.mrf.mxu1 }
 0x20b PF: > { %s14_s15 = sadd.s32 1, %s1883_s15  }
 0x20c   : > { %p11_p4 = scmp.ge.s32.totalorder %s14_s15, 4  }
 0x20e   :  { %13 = sbr.rel (!%p11_p4) target bundleno = 1 (0x1), region = 74 }

// kernel: rainbow_dqn_forward.5
= control target key start
LH: loop header
LB: loop body
LE: loop exit
PB: predicated region body
PF: predicated region fallthrough
CT: control target
= control target key end

     0   :  { %vm747_vm0 = vmmov 0   ;;  %s748_s25 = smov 104   ;;  %s749_s26 = smov 120   ;;  %vm506_vm1 = vcmask 58368   ;;  %s1286_s1 = inlined_call_operand.vmem [shape: f32[256,256], index: 1, kind: input, shape index: {}]   ;;  %s1287_s0 = inlined_call_operand.vmem [shape: f32[2,256], index: 0, kind: input, shape index: {}]   ;;  %s1288_s3 = inlined_call_operand.vmem [shape: f32[256,32], index: 3, kind: input, shape index: {}]   ;;  %s1289_s5 = inlined_call_operand.vmem [shape: f32[256,128], index: 5, kind: input, shape index: {}]   ;;  %s1290_s2 = inlined_call_operand.vmem [shape: f32[1,256], index: 2, kind: input, shape index: {}]   ;;  %s1291_s7 = inlined_call_operand.vmem [shape: f32[128,8], index: 7, kind: input, shape index: {}]   ;;  %s1292_s4 = inlined_call_operand.vmem [shape: f32[1,32], index: 4, kind: input, shape index: {}]   ;;  %s1293_s6 = inlined_call_operand.vmem [shape: f32[1,128], index: 6, kind: input, shape index: {}]   ;;  %s1294_s8 = inlined_call_operand.vmem [shape: f32[1,8], index: 8, kind: input, shape index: {}]   ;;  %s1295_s9 = inlined_call_operand.vmem [shape: f32[4,2,8], index: 9, kind: output, shape index: {}]  }
   0x1   :  { %v64_v0 = vld [vmem:[%s1286_s1 + $0xf8] sm:$0xff]  ;;  %v63_v1 = vld [vmem:[%s1286_s1 + $0xf0] sm:$0xff]  ;;  %v62_v2 = vld [vmem:[%s1286_s1 + $0xe8] sm:$0xff]  ;;  %s750_s27 = smov 112  }
   0x2   :  { %120 = vmatprep.subr.mxu0 %v64_v0  ;;  %v61_v3 = vld [vmem:[%s1286_s1 + $0xe0] sm:$0xff]  ;;  %v60_v4 = vld [vmem:[%s1286_s1 + $0xd8] sm:$0xff]  ;;  %v59_v5 = vld [vmem:[%s1286_s1 + $0xd0] sm:$0xff] }
   0x3   :  { %121 = vmatpush1.msra.mxu0 %v63_v1  ;;  %v58_v6 = vld [vmem:[%s1286_s1 + $0xc8] sm:$0xff]  ;;  %v57_v7 = vld [vmem:[%s1286_s1 + $0xc0] sm:$0xff]  ;;  %v56_v8 = vld [vmem:[%s1286_s1 + $0xb8] sm:$0xff] }
   0x4   :  { %122 = vmatprep.subr.mxu0 %v62_v2  ;;  %v55_v9 = vld [vmem:[%s1286_s1 + $0xb0] sm:$0xff]  ;;  %v54_v10 = vld [vmem:[%s1286_s1 + $0xa8] sm:$0xff]  ;;  %v53_v11 = vld [vmem:[%s1286_s1 + $0xa0] sm:$0xff] }
   0x5   :  { %123 = vmatpush1.msra.mxu0 %v61_v3  ;;  %v52_v12 = vld [vmem:[%s1286_s1 + $0x98] sm:$0xff]  ;;  %v51_v13 = vld [vmem:[%s1286_s1 + $0x90] sm:$0xff]  ;;  %v50_v14 = vld [vmem:[%s1286_s1 + $0x88] sm:$0xff] }
   0x6   :  { %124 = vmatprep.subr.mxu0 %v60_v4  ;;  %v49_v15 = vld [vmem:[%s1286_s1 + $0x80] sm:$0xff]  ;;  %v48_v16 = vld [vmem:[%s1286_s1 + $0x78] sm:$0xff]  ;;  %v47_v17 = vld [vmem:[%s1286_s1 + $0x70] sm:$0xff] }
   0x7   :  { %125 = vmatpush1.msra.mxu0 %v59_v5  ;;  %v46_v18 = vld [vmem:[%s1286_s1 + $0x68] sm:$0xff]  ;;  %v45_v19 = vld [vmem:[%s1286_s1 + $0x60] sm:$0xff]  ;;  %v44_v20 = vld [vmem:[%s1286_s1 + $0x58] sm:$0xff] }
   0x8   :  { %126 = vmatprep.subr.mxu0 %v58_v6  ;;  %v43_v21 = vld [vmem:[%s1286_s1 + $0x50] sm:$0xff]  ;;  %v42_v22 = vld [vmem:[%s1286_s1 + $0x48] sm:$0xff]  ;;  %v41_v23 = vld [vmem:[%s1286_s1 + $0x40] sm:$0xff] }
   0x9   :  { %127 = vmatpush1.msra.mxu0 %v57_v7  ;;  %v876_v24 = vld.sshfl [vmem:[%s1287_s0] sm:$0x33 pattern:$0x76325410]  ;;  %v224_v25 = vld [vmem:[%s1288_s3 + $0xf8] sm:$0xff]  ;;  %v223_v29 = vld [vmem:[%s1288_s3 + $0xf0] sm:$0xff] }
   0xa   :  { %128 = vmatprep.subr.mxu0 %v56_v8  ;;  %v40_v26 = vld [vmem:[%s1286_s1 + $0x38] sm:$0xff]  ;;  %v886_v27 = vcombine.high %v876_v24, %v876_v24  ;;  %603 = vmatprep.subr.mxu1 %v224_v25  ;;  %v39_v30 = vld [vmem:[%s1286_s1 + $0x30] sm:$0xff]  ;;  %v38_v32 = vld [vmem:[%s1286_s1 + $0x28] sm:$0xff] }
   0xb   :  { %129 = vmatpush1.msra.mxu0 %v55_v9  ;;  %v208_v28 = vld [vmem:[%s1288_s3 + $0x78] sm:$0xff]  ;;  %v207_v31 = vld [vmem:[%s1288_s3 + $0x70] sm:$0xff]  ;;  %v222_v33 = vld [vmem:[%s1288_s3 + $0xe8] sm:$0xff] }
   0xc   :  { %130 = vmatprep.subr.mxu0 %v54_v10  ;;  %604 = vmatpush3.msra.mxu1 %v208_v28  ;;  %v37_v34 = vld [vmem:[%s1286_s1 + $0x20] sm:$0xff]  ;;  %v206_v35 = vld [vmem:[%s1288_s3 + $0x68] sm:$0xff]  ;;  %v36_v36 = vld [vmem:[%s1286_s1 + $0x18] sm:$0xff] }
   0xd   :  { %131 = vmatpush1.msra.mxu0 %v53_v11  ;;  %184 = vmatprep.mubr.f32.mxu0 %v886_v27  ;;  %v221_v37 = vld [vmem:[%s1288_s3 + $0xe0] sm:$0xff]  ;;  %v35_v38 = vld [vmem:[%s1286_s1 + $0x10] sm:$0xff]  ;;  %v34_v40 = vld [vmem:[%s1286_s1 + $0x8] sm:$0xff] }
   0xe   :  { %132 = vmatprep.subr.mxu0 %v52_v12  ;;  %605 = vmatprep.subr.mxu1 %v223_v29  ;;  %v205_v39 = vld [vmem:[%s1288_s3 + $0x60] sm:$0xff]  ;;  %v220_v41 = vld [vmem:[%s1288_s3 + $0xd8] sm:$0xff]  ;;  %v219_v45 = vld [vmem:[%s1288_s3 + $0xd0] sm:$0xff] }
   0xf   :  { %133 = vmatpush1.msra.mxu0 %v51_v13  ;;  %606 = vmatpush3.msra.mxu1 %v207_v31  ;;  %v33_v42 = vld [vmem:[%s1286_s1] sm:$0xff]  ;;  %v204_v43 = vld [vmem:[%s1288_s3 + $0x58] sm:$0xff]  ;;  %v95_v46 = vld [vmem:[%s1286_s1 + $0x1f0] sm:$0xff] }
  0x10   :  { %134 = vmatprep.subr.mxu0 %v50_v14  ;;  %607 = vmatprep.subr.mxu1 %v222_v33  ;;  %v96_v44 = vld [vmem:[%s1286_s1 + $0x1f8] sm:$0xff]  ;;  %v203_v47 = vld [vmem:[%s1288_s3 + $0x50] sm:$0xff]  ;;  %v94_v48 = vld [vmem:[%s1286_s1 + $0x1e8] sm:$0xff] }
  0x11   :  { %135 = vmatpush1.msra.mxu0 %v49_v15  ;;  %608 = vmatpush3.msra.mxu1 %v206_v35  ;;  %v218_v49 = vld [vmem:[%s1288_s3 + $0xc8] sm:$0xff]  ;;  %v93_v50 = vld [vmem:[%s1286_s1 + $0x1e0] sm:$0xff]  ;;  %v92_v52 = vld [vmem:[%s1286_s1 + $0x1d8] sm:$0xff] }
  0x12   :  { %136 = vmatprep.subr.mxu0 %v48_v16  ;;  %609 = vmatprep.subr.mxu1 %v221_v37  ;;  %v202_v51 = vld [vmem:[%s1288_s3 + $0x48] sm:$0xff]  ;;  %v217_v53 = vld [vmem:[%s1288_s3 + $0xc0] sm:$0xff]  ;;  %v91_v54 = vld [vmem:[%s1286_s1 + $0x1d0] sm:$0xff]  ;;  %v99_v37 = vlaneseq }
  0x13   :  { %137 = vmatpush1.msra.mxu0 %v47_v17  ;;  %610 = vmatpush3.msra.mxu1 %v205_v39  ;;  %v201_v55 = vld [vmem:[%s1288_s3 + $0x40] sm:$0xff]  ;;  %v90_v56 = vld [vmem:[%s1286_s1 + $0x1c8] sm:$0xff]  ;;  %v216_v57 = vld [vmem:[%s1288_s3 + $0xb8] sm:$0xff] }
  0x14   :  { %138 = vmatprep.subr.mxu0 %v46_v18  ;;  %611 = vmatprep.subr.mxu1 %v220_v41  ;;  %v89_v58 = vld [vmem:[%s1286_s1 + $0x1c0] sm:$0xff]  ;;  %v200_v59 = vld [vmem:[%s1288_s3 + $0x38] sm:$0xff]  ;;  %v215_v61 = vld [vmem:[%s1288_s3 + $0xb0] sm:$0xff] }
  0x15   :  { %139 = vmatpush1.msra.mxu0 %v45_v19  ;;  %612 = vmatpush3.msra.mxu1 %v204_v43  ;;  %v88_v60 = vld [vmem:[%s1286_s1 + $0x1b8] sm:$0xff]  ;;  %v87_v62 = vld [vmem:[%s1286_s1 + $0x1b0] sm:$0xff]  ;;  %v86_v0 = vld [vmem:[%s1286_s1 + $0x1a8] sm:$0xff] }
  0x16   :  { %140 = vmatprep.subr.mxu0 %v44_v20  ;;  %613 = vmatprep.subr.mxu1 %v219_v45  ;;  %v199_v63 = vld [vmem:[%s1288_s3 + $0x30] sm:$0xff]  ;;  %v214_v1 = vld [vmem:[%s1288_s3 + $0xa8] sm:$0xff]  ;;  %v85_v2 = vld [vmem:[%s1286_s1 + $0x1a0] sm:$0xff] }
  0x17   :  { %141 = vmatpush1.msra.mxu0 %v43_v21  ;;  %614 = vmatpush3.msra.mxu1 %v203_v47  ;;  %v198_v3 = vld [vmem:[%s1288_s3 + $0x28] sm:$0xff]  ;;  %v84_v4 = vld [vmem:[%s1286_s1 + $0x198] sm:$0xff]  ;;  %v213_v5 = vld [vmem:[%s1288_s3 + $0xa0] sm:$0xff] }
  0x18   :  { %142 = vmatprep.subr.mxu0 %v42_v22  ;;  %615 = vmatprep.subr.mxu1 %v218_v49  ;;  %v83_v6 = vld [vmem:[%s1286_s1 + $0x190] sm:$0xff]  ;;  %v197_v7 = vld [vmem:[%s1288_s3 + $0x20] sm:$0xff]  ;;  %v82_v8 = vld [vmem:[%s1286_s1 + $0x188] sm:$0xff] }
  0x19   :  { %143 = vmatpush1.msra.mxu0 %v41_v23  ;;  %616 = vmatpush3.msra.mxu1 %v202_v51  ;;  %v212_v9 = vld [vmem:[%s1288_s3 + $0x98] sm:$0xff]  ;;  %v81_v10 = vld [vmem:[%s1286_s1 + $0x180] sm:$0xff]  ;;  %v79_v12 = vld [vmem:[%s1286_s1 + $0x170] sm:$0xff] }
  0x1a   :  { %144 = vmatprep.subr.mxu0 %v40_v26  ;;  %617 = vmatprep.subr.mxu1 %v217_v53  ;;  %v80_v11 = vld [vmem:[%s1286_s1 + $0x178] sm:$0xff]  ;;  %v78_v13 = vld [vmem:[%s1286_s1 + $0x168] sm:$0xff]  ;;  %v77_v14 = vld [vmem:[%s1286_s1 + $0x160] sm:$0xff] }
  0x1b   :  { %145 = vmatpush1.msra.mxu0 %v39_v30  ;;  %618 = vmatpush3.msra.mxu1 %v201_v55  ;;  %v76_v15 = vld [vmem:[%s1286_s1 + $0x158] sm:$0xff]  ;;  %v75_v16 = vld [vmem:[%s1286_s1 + $0x150] sm:$0xff]  ;;  %v74_v17 = vld [vmem:[%s1286_s1 + $0x148] sm:$0xff] }
  0x1c   :  { %146 = vmatprep.subr.mxu0 %v38_v32  ;;  %619 = vmatprep.subr.mxu1 %v216_v57  ;;  %v73_v18 = vld [vmem:[%s1286_s1 + $0x140] sm:$0xff]  ;;  %v72_v19 = vld [vmem:[%s1286_s1 + $0x138] sm:$0xff]  ;;  %v71_v20 = vld [vmem:[%s1286_s1 + $0x130] sm:$0xff] }
  0x1d   :  { %147 = vmatpush1.msra.mxu0 %v37_v34  ;;  %620 = vmatpush3.msra.mxu1 %v200_v59  ;;  %v70_v21 = vld [vmem:[%s1286_s1 + $0x128] sm:$0xff]  ;;  %v69_v22 = vld [vmem:[%s1286_s1 + $0x120] sm:$0xff]  ;;  %v68_v23 = vld [vmem:[%s1286_s1 + $0x118] sm:$0xff] }
  0x1e   :  { %148 = vmatprep.subr.mxu0 %v36_v36  ;;  %621 = vmatprep.subr.mxu1 %v215_v61  ;;  %v67_v25 = vld [vmem:[%s1286_s1 + $0x110] sm:$0xff]  ;;  %v66_v26 = vld [vmem:[%s1286_s1 + $0x108] sm:$0xff]  ;;  %v65_v28 = vld [vmem:[%s1286_s1 + $0x100] sm:$0xff] }
  0x1f   :  { %149 = vmatpush1.msra.mxu0 %v35_v38  ;;  %622 = vmatpush3.msra.mxu1 %v199_v63  ;;  %v196_v29 = vld [vmem:[%s1288_s3 + $0x18] sm:$0xff]  ;;  %v211_v30 = vld [vmem:[%s1288_s3 + $0x90] sm:$0xff]  ;;  %v210_v32 = vld [vmem:[%s1288_s3 + $0x88] sm:$0xff]  ;;  %v100_v38 = vshrl.u32 %v99_v37, 7 }
  0x20   :  { %150 = vmatprep.subr.mxu0 %v34_v40  ;;  %623 = vmatprep.subr.mxu1 %v214_v1  ;;  %v195_v31 = vld [vmem:[%s1288_s3 + $0x10] sm:$0xff]  ;;  %v194_v33 = vld [vmem:[%s1288_s3 + $0x8] sm:$0xff]  ;;  %v209_v34 = vld [vmem:[%s1288_s3 + $0x80] sm:$0xff] }
  0x21   :  { %151 = vmatpush1.msra.mxu0 %v33_v42  ;;  %624 = vmatpush3.msra.mxu1 %v198_v3  ;;  %v193_v35 = vld [vmem:[%s1288_s3] sm:$0xff]  ;;  %v333_v36 = vld [vmem:[%s1289_s5 + $0xf8] sm:$0xff]  ;;  %v101_v39 = vsub.s32 0, %v100_v38  ;;  %v105_v41 = vsub.s32 1, %v100_v38  ;;  %v332_v51 = vld [vmem:[%s1289_s5 + $0xf0] sm:$0xff] }
  0x22   :  { %152 = vmatprep.subr.mxu0 %v96_v44  ;;  %625 = vmatprep.subr.mxu1 %v213_v5  ;;  %v97_v40 = vld [vmem:[%s1290_s2] sm:$0x3]  ;;  %v331_v53 = vld [vmem:[%s1289_s5 + $0xe8] sm:$0xff]  ;;  %v313_v57 = vld [vmem:[%s1289_s5 + $0x58] sm:$0xff] }
  0x23   :  { %153 = vmatpush2.msra.mxu0 %v95_v46  ;;  %626 = vmatpush3.msra.mxu1 %v197_v7  ;;  %v102_v42 = vrot.slane %v97_v40, %v101_v39  ;;  %v106_v43 = vrot.slane %v97_v40, %v105_v41  ;;  %v330_v55 = vld [vmem:[%s1289_s5 + $0xe0] sm:$0xff]  ;;  %v312_v59 = vld [vmem:[%s1289_s5 + $0x50] sm:$0xff]  ;;  %v311_v61 = vld [vmem:[%s1289_s5 + $0x48] sm:$0xff] }
  0x24   :  { %154 = vmatprep.subr.mxu0 %v94_v48  ;;  %627 = vmatprep.subr.mxu1 %v212_v9  ;;  %v310_v63 = vld [vmem:[%s1289_s5 + $0x40] sm:$0xff]  ;;  %v309_v1 = vld [vmem:[%s1289_s5 + $0x38] sm:$0xff]  ;;  %v308_v3 = vld [vmem:[%s1289_s5 + $0x30] sm:$0xff] }
  0x25   :  { %155 = vmatpush2.msra.mxu0 %v93_v50  ;;  %628 = vmatpush3.msra.mxu1 %v196_v29  ;;  %v317_v50 = vld [vmem:[%s1289_s5 + $0x78] sm:$0xff]  ;;  %v307_v5 = vld [vmem:[%s1289_s5 + $0x28] sm:$0xff]  ;;  %v306_v7 = vld [vmem:[%s1289_s5 + $0x20] sm:$0xff] }
  0x26   :  { %156 = vmatprep.subr.mxu0 %v92_v52  ;;  %629 = vmatprep.subr.mxu1 %v211_v30  ;;  %v316_v52 = vld [vmem:[%s1289_s5 + $0x70] sm:$0xff]  ;;  %v305_v9 = vld [vmem:[%s1289_s5 + $0x18] sm:$0xff]  ;;  %v416_v29 = vld [vmem:[%s1291_s7 + $0x20] sm:$0xff] }
  0x27   :  { %157 = vmatpush2.msra.mxu0 %v91_v54  ;;  %630 = vmatpush3.msra.mxu1 %v195_v31  ;;  %v315_v54 = vld [vmem:[%s1289_s5 + $0x68] sm:$0xff]  ;;  %v415_v30 = vld [vmem:[%s1291_s7 + $0x18] sm:$0xff]  ;;  %v414_v31 = vld [vmem:[%s1291_s7 + $0x10] sm:$0xff] }
  0x28   :  { %158 = vmatprep.subr.mxu0 %v90_v56  ;;  %631 = vmatprep.subr.mxu1 %v210_v32  ;;  %v314_v56 = vld [vmem:[%s1289_s5 + $0x60] sm:$0xff]  ;;  %v413_v32 = vld [vmem:[%s1291_s7 + $0x8] sm:$0xff] }
  0x29   :  { %159 = vmatpush2.msra.mxu0 %v89_v58  ;;  %632 = vmatpush3.msra.mxu1 %v194_v33  ;;  %v328_v58 = vld [vmem:[%s1289_s5 + $0xd0] sm:$0xff]  ;;  %v412_v33 = vld [vmem:[%s1291_s7] sm:$0xff] }
  0x2a   :  { %160 = vmatprep.subr.mxu0 %v88_v60  ;;  %633 = vmatprep.subr.mxu1 %v209_v34  ;;  %v327_v60 = vld [vmem:[%s1289_s5 + $0xc8] sm:$0xff]  ;;  %v598_v40 = vld [vmem:[%s1293_s6] ss:$0 sm:$0xff] }
  0x2b   :  { %161 = vmatpush2.msra.mxu0 %v87_v62  ;;  %634 = vmatpush3.msra.mxu1 %v193_v35  ;;  %v326_v62 = vld [vmem:[%s1289_s5 + $0xc0] sm:$0xff] }
  0x2c   :  { %162 = vmatprep.subr.mxu0 %v86_v0  ;;  %638 = vmatprep.subr.mxu1 %v333_v36  ;;  %v325_v0 = vld [vmem:[%s1289_s5 + $0xb8] sm:$0xff]  ;;  %v597_v35 = vld [vmem:[%s1292_s4] ss:$0 sm:$0xff] }
  0x2d   :  { %163 = vmatpush2.msra.mxu0 %v85_v2  ;;  %v324_v2 = vld [vmem:[%s1289_s5 + $0xb0] sm:$0xff] }
  0x2e   :  { %164 = vmatprep.subr.mxu0 %v84_v4  ;;  %v323_v4 = vld [vmem:[%s1289_s5 + $0xa8] sm:$0xff] }
  0x2f   :  { %165 = vmatpush2.msra.mxu0 %v83_v6  ;;  %v322_v6 = vld [vmem:[%s1289_s5 + $0xa0] sm:$0xff] }
  0x30   :  { %166 = vmatprep.subr.mxu0 %v82_v8  ;;  %v321_v8 = vld [vmem:[%s1289_s5 + $0x98] sm:$0xff] }
  0x31   :  { %167 = vmatpush2.msra.mxu0 %v81_v10  ;;  %v320_v10 = vld [vmem:[%s1289_s5 + $0x90] sm:$0xff] }
  0x32   :  { %168 = vmatprep.subr.mxu0 %v80_v11  ;;  %v304_v11 = vld [vmem:[%s1289_s5 + $0x10] sm:$0xff] }
  0x33   :  { %169 = vmatpush2.msra.mxu0 %v79_v12  ;;  %v319_v12 = vld [vmem:[%s1289_s5 + $0x88] sm:$0xff] }
  0x34   :  { %170 = vmatprep.subr.mxu0 %v78_v13  ;;  %v303_v13 = vld [vmem:[%s1289_s5 + $0x8] sm:$0xff] }
  0x35   :  { %171 = vmatpush2.msra.mxu0 %v77_v14  ;;  %v318_v14 = vld [vmem:[%s1289_s5 + $0x80] sm:$0xff] }
  0x36   :  { %172 = vmatprep.subr.mxu0 %v76_v15  ;;  %v302_v15 = vld [vmem:[%s1289_s5] sm:$0xff] }
  0x37   :  { %173 = vmatpush2.msra.mxu0 %v75_v16  ;;  %v746_v16 = vmov 0.0  }
  0x38   :  { %174 = vmatprep.subr.mxu0 %v74_v17  ;;  %v427_v17 = vld [vmem:[%s1291_s7 + $0x78] sm:$0xff] }
  0x39   :  { %175 = vmatpush2.msra.mxu0 %v73_v18  ;;  %v426_v18 = vld [vmem:[%s1291_s7 + $0x70] sm:$0xff] }
  0x3a   :  { %176 = vmatprep.subr.mxu0 %v72_v19  ;;  %v425_v19 = vld [vmem:[%s1291_s7 + $0x68] sm:$0xff] }
  0x3b   :  { %177 = vmatpush2.msra.mxu0 %v71_v20  ;;  %v423_v20 = vld [vmem:[%s1291_s7 + $0x58] sm:$0xff] }
  0x3c   :  { %178 = vmatprep.subr.mxu0 %v70_v21  ;;  %v422_v21 = vld [vmem:[%s1291_s7 + $0x50] sm:$0xff] }
  0x3d   :  { %179 = vmatpush2.msra.mxu0 %v69_v22  ;;  %v421_v22 = vld [vmem:[%s1291_s7 + $0x48] sm:$0xff] }
  0x3e   :  { %180 = vmatprep.subr.mxu0 %v68_v23  ;;  %v420_v23 = vld [vmem:[%s1291_s7 + $0x40] sm:$0xff] }
  0x3f   :  { %181 = vmatpush2.msra.mxu0 %v67_v25  ;;  %v419_v25 = vld [vmem:[%s1291_s7 + $0x38] sm:$0xff] }
  0x40   :  { %182 = vmatprep.subr.mxu0 %v66_v26  ;;  %v418_v26 = vld [vmem:[%s1291_s7 + $0x30] sm:$0xff] }
  0x41   :  { %183 = vmatpush2.msra.mxu0 %v65_v28  ;;  %v417_v28 = vld [vmem:[%s1291_s7 + $0x28] sm:$0xff] }
  0x42   :  { %185 = vmatmul.mubr.f32.vlgmr.msra.gmra.mxu0 %v876_v24  ;;  %690 = vmatprep.subr.mxu0 %v746_v16 }
  0x43   :  { %691 = vmatpush3.msra.mxu0 %v427_v17  ;;  %722 = vmatprep.mubr.msk.f32.mxu0 %vm747_vm0, %v746_v16 }
  0x44   :  { %692 = vmatprep.subr.mxu0 %v746_v16 }
  0x45   :  { %693 = vmatpush3.msra.mxu0 %v426_v18 }
  0x46   :  { %694 = vmatprep.subr.mxu0 %v746_v16 }
  0x47   :  { %695 = vmatpush3.msra.mxu0 %v425_v19 }
  0x48   :  { %696 = vmatprep.subr.mxu0 %v746_v16 }
 0x102   :  { %v186_v44 = vpop.f32.mrf.mxu0 }
 0x103   :  { %v187_v45 = vadd.f32 %v186_v44, %v102_v42 }
 0x104   :  { %v188_v46 = vpop.f32.mrf.mxu0 }
 0x105   :  { %v189_v47 = vadd.f32 %v188_v46, %v106_v43  ;;  %v191_v49 = vmax.f32 %v187_v45, 0.0 }
 0x107   :  { %v192_v48 = vmax.f32 %v189_v47, 0.0 }
 0x109   :  { %296 = vmatprep.mubr.f32.mxu1 %v192_v48 }
 0x10a   :  { %297 = vmatmul.mubr.f32.vlgmr.msra.gmra.mxu1 %v191_v49 }
 0x10b   :  { %639 = vmatpush3.msra.mxu1 %v317_v50  ;;  %405 = vmatprep.mubr.f32.mxu1 %v886_v27  ;;  %v329_v27 = vld [vmem:[%s1289_s5 + $0xd8] sm:$0xff] }
 0x10c   :  { %640 = vmatprep.subr.mxu1 %v332_v51 }
 0x10d   :  { %641 = vmatpush3.msra.mxu1 %v316_v52  ;;  %v599_v52 = vld [vmem:[%s1294_s8] ss:$0 sm:$0xff] }
 0x10e   :  { %642 = vmatprep.subr.mxu1 %v331_v53 }
 0x10f   :  { %643 = vmatpush3.msra.mxu1 %v315_v54 }
 0x110   :  { %644 = vmatprep.subr.mxu1 %v330_v55 }
 0x111   :  { %645 = vmatpush3.msra.mxu1 %v314_v56 }
 0x112   :  { %646 = vmatprep.subr.mxu1 %v329_v27 }
 0x113   :  { %647 = vmatpush3.msra.mxu1 %v313_v57 }
 0x114   :  { %648 = vmatprep.subr.mxu1 %v328_v58 }
 0x115   :  { %649 = vmatpush3.msra.mxu1 %v312_v59 }
 0x116   :  { %650 = vmatprep.subr.mxu1 %v327_v60 }
 0x117   :  { %651 = vmatpush3.msra.mxu1 %v311_v61 }
 0x118   :  { %652 = vmatprep.subr.mxu1 %v326_v62 }
 0x119   :  { %653 = vmatpush3.msra.mxu1 %v310_v63 }
 0x11a   :  { %654 = vmatprep.subr.mxu1 %v325_v0 }
 0x11b   :  { %655 = vmatpush3.msra.mxu1 %v309_v1 }
 0x11c   :  { %656 = vmatprep.subr.mxu1 %v324_v2 }
 0x11d   :  { %657 = vmatpush3.msra.mxu1 %v308_v3 }
 0x11e   :  { %658 = vmatprep.subr.mxu1 %v323_v4 }
 0x11f   :  { %659 = vmatpush3.msra.mxu1 %v307_v5 }
 0x120   :  { %660 = vmatprep.subr.mxu1 %v322_v6 }
 0x121   :  { %661 = vmatpush3.msra.mxu1 %v306_v7 }
 0x122   :  { %662 = vmatprep.subr.mxu1 %v321_v8 }
 0x123   :  { %663 = vmatpush3.msra.mxu1 %v305_v9 }
 0x124   :  { %664 = vmatprep.subr.mxu1 %v320_v10 }
 0x125   :  { %665 = vmatpush3.msra.mxu1 %v304_v11 }
 0x126   :  { %666 = vmatprep.subr.mxu1 %v319_v12 }
 0x127   :  { %667 = vmatpush3.msra.mxu1 %v303_v13 }
 0x128   :  { %668 = vmatprep.subr.mxu1 %v318_v14 }
 0x129   :  { %669 = vmatpush3.msra.mxu1 %v302_v15 }
 0x12a   :  { %406 = vmatmul.mubr.f32.vlgmr.msra.gmra.mxu1 %v876_v24  ;;  %v424_v24 = vld [vmem:[%s1291_s7 + $0x60] sm:$0xff] }
 0x12b   :  { %697 = vmatpush3.msra.mxu0 %v424_v24 }
 0x12c   :  { %698 = vmatprep.subr.mxu0 %v746_v16 }
 0x12d   :  { %699 = vmatpush3.msra.mxu0 %v423_v20 }
 0x12e   :  { %700 = vmatprep.subr.mxu0 %v746_v16 }
 0x12f   :  { %701 = vmatpush3.msra.mxu0 %v422_v21 }
 0x130   :  { %702 = vmatprep.subr.mxu0 %v746_v16 }
 0x131   :  { %703 = vmatpush3.msra.mxu0 %v421_v22 }
 0x132   :  { %704 = vmatprep.subr.mxu0 %v746_v16 }
 0x133   :  { %705 = vmatpush3.msra.mxu0 %v420_v23 }
 0x134   :  { %706 = vmatprep.subr.mxu0 %v746_v16 }
 0x135   :  { %707 = vmatpush3.msra.mxu0 %v419_v25 }
 0x136   :  { %708 = vmatprep.subr.mxu0 %v746_v16 }
 0x137   :  { %709 = vmatpush3.msra.mxu0 %v418_v26 }
 0x138   :  { %710 = vmatprep.subr.mxu0 %v746_v16 }
 0x139   :  { %711 = vmatpush3.msra.mxu0 %v417_v28 }
 0x13a   :  { %712 = vmatprep.subr.mxu0 %v746_v16 }
 0x13b   :  { %713 = vmatpush3.msra.mxu0 %v416_v29 }
 0x13c   :  { %714 = vmatprep.subr.mxu0 %v746_v16 }
 0x13d   :  { %715 = vmatpush3.msra.mxu0 %v415_v30 }
 0x13e   :  { %716 = vmatprep.subr.mxu0 %v746_v16 }
 0x13f   :  { %717 = vmatpush3.msra.mxu0 %v414_v31 }
 0x140   :  { %718 = vmatprep.subr.mxu0 %v746_v16 }
 0x141   :  { %719 = vmatpush3.msra.mxu0 %v413_v32 }
 0x142   :  { %720 = vmatprep.subr.mxu0 %v746_v16 }
 0x143   :  { %721 = vmatpush3.msra.mxu0 %v412_v33 }
 0x1ca   :  { %v635_v34 = vpop.f32.mrf.mxu1 }
 0x1cc   :  { %v636_v36 = vpop.f32.mrf.mxu1 }
 0x1cd   :  { %v637_v37 = vadd.f32 %v636_v36, %v635_v34 }
 0x1cf   :  { %v299_v38 = vadd.f32 %v637_v37, %v597_v35 }
 0x1d1   :  { %570 = vrot.lane.b32.xlu1 %v299_v38, %s748_s25  ;;  %526 = vrot.lane.b32.xlu0 %v299_v38, %s749_s26  ;;  %v507_v45 = vsel %vm506_vm1, %v299_v38, 0.0 }
 0x1d5   :  { %548 = vrot.lane.b32.xlu0 %v299_v38, %s750_s27 }
 0x1ea   :  { %v670_v39 = vpop.f32.mrf.mxu1 }
 0x1ec   :  { %v671_v41 = vpop.f32.mrf.mxu1 }
 0x1ed   :  { %v672_v42 = vadd.f32 %v671_v41, %v670_v39 }
 0x1ef   :  { %v408_v43 = vadd.f32 %v672_v42, %v598_v40 }
 0x1f1   :  { %v411_v44 = vmax.f32 %v408_v43, 0.0 }
 0x1f3   :  { %723 = vmatmul.mubr.f32.vlgmr.msra.gmra.mxu0 %v411_v44 }
 0x1f5   :  { %508 = vadd.xlane.f32.xlu1 %v507_v45 }
 0x243   :  { %v571_v46 = vpop.permute.xlu1 %570  ;;  %v527_v47 = vpop.permute.xlu0 %526 }
 0x244   :  { %v530_v48 = vsel %vm506_vm1, %v527_v47, 0.0  ;;  %v574_v49 = vsel %vm506_vm1, %v571_v46, 0.0 }
 0x245   :  { %531 = vadd.xlane.f32.xlu0 %v530_v48  ;;  %575 = vadd.xlane.f32.xlu1 %v574_v49 }
 0x247   :  { %v549_v50 = vpop.permute.xlu0 %548 }
 0x248   :  { %v552_v51 = vsel %vm506_vm1, %v549_v50, 0.0 }
 0x249   :  { %553 = vadd.xlane.f32.xlu0 %v552_v51 }
 0x27e   :  { %v509_v53 = vpop.xlane.xlu1 %508 }
 0x27f   :  { %v511_v27 = vmul.f32 0.125, %v509_v53 }
 0x2b3   :  { %v501_v54 = vpop.f32.mrf.mxu0 }
 0x2b4   :  { %v502_v55 = vadd.f32 %v599_v52, %v501_v54 }
 0x2b5   :  { %v724_v56 = vpop.f32.mrf.mxu0 }
 0x2b6   :  { %v505_v57 = vadd.f32 %v502_v55, %v299_v38  ;;  %v529_v0 = vadd.f32 %v527_v47, %v502_v55  ;;  %v573_v2 = vadd.f32 %v571_v46, %v502_v55  ;;  %v551_v7 = vadd.f32 %v549_v50, %v502_v55 }
 0x2b8   :  { %v512_v58 = vsub.f32 %v505_v57, %v511_v27 }
 0x2ba   :  { %v513_v59 = vsel %vm506_vm1, %v512_v58, -inf }
 0x2bb   :  { %514 = vmax.xlane.f32.xlu0 %v513_v59 }
 0x2ce   :  { %v532_v60 = vpop.xlane.xlu0 %531  ;;  %v576_v61 = vpop.xlane.xlu1 %575 }
 0x2cf   :  { %v533_v62 = vmul.f32 0.125, %v532_v60  ;;  %v577_v63 = vmul.f32 0.125, %v576_v61 }
 0x2d1   :  { %v534_v1 = vsub.f32 %v529_v0, %v533_v62  ;;  %v578_v6 = vsub.f32 %v573_v2, %v577_v63 }
 0x2d2   :  { %v554_v3 = vpop.xlane.xlu0 %553 }
 0x2d3   :  { %v555_v4 = vmul.f32 0.125, %v554_v3  ;;  %v535_v5 = vsel %vm506_vm1, %v534_v1, -inf  ;;  %v579_v9 = vsel %vm506_vm1, %v578_v6, -inf }
 0x2d4   :  { %536 = vmax.xlane.f32.xlu1 %v535_v5 }
 0x2d5   :  { %v556_v8 = vsub.f32 %v551_v7, %v555_v4 }
 0x2d7   :  { %v557_v10 = vsel %vm506_vm1, %v556_v8, -inf }
 0x2d8   :  { %580 = vmax.xlane.f32.xlu1 %v579_v9  ;;  %558 = vmax.xlane.f32.xlu0 %v557_v10 }
 0x344   :  { %v515_v11 = vpop.xlane.xlu0 %514 }
 0x345   :  { %v516_v12 = vsub.f32 %v512_v58, %v515_v11 }
 0x347   :  { %v517_v13 = vmul.f32 1.442695, %v516_v12 }
 0x349   :  { %730 = vpow2.f32 %v517_v13 }
 0x356   :  { %v731_v14 = vpop.eup %730 }
 0x357   :  { %v519_v15 = vsel %vm506_vm1, %v731_v14, 0.0 }
 0x358   :  { %520 = vadd.xlane.f32.xlu0 %v519_v15 }
 0x35d   :  { %v537_v16 = vpop.xlane.xlu1 %536 }
 0x35e   :  { %v538_v17 = vsub.f32 %v534_v1, %v537_v16 }
 0x360   :  { %v539_v18 = vmul.f32 1.442695, %v538_v17 }
 0x361   :  { %v581_v19 = vpop.xlane.xlu1 %580  ;;  %v559_v24 = vpop.xlane.xlu0 %558 }
 0x362   :  { %732 = vpow2.f32 %v539_v18  ;;  %v582_v20 = vsub.f32 %v578_v6, %v581_v19  ;;  %v560_v21 = vsub.f32 %v556_v8, %v559_v24 }
 0x364   :  { %v583_v22 = vmul.f32 1.442695, %v582_v20  ;;  %v561_v23 = vmul.f32 1.442695, %v560_v21 }
 0x366   :  { %734 = vpow2.f32 %v583_v22 }
 0x367   :  { %736 = vpow2.f32 %v561_v23 }
 0x36f   :  { %v733_v25 = vpop.eup %732 }
 0x370   :  { %v541_v26 = vsel %vm506_vm1, %v733_v25, 0.0 }
 0x371   :  { %542 = vadd.xlane.f32.xlu1 %v541_v26 }
 0x373   :  { %v735_v28 = vpop.eup %734 }
 0x374   :  { %v737_v29 = vpop.eup %736  ;;  %v585_v30 = vsel %vm506_vm1, %v735_v28, 0.0 }
 0x375   :  { %586 = vadd.xlane.f32.xlu1 %v585_v30  ;;  %v563_v31 = vsel %vm506_vm1, %v737_v29, 0.0 }
 0x376   :  { %564 = vadd.xlane.f32.xlu0 %v563_v31 }
 0x3e1   :  { %v521_v32 = vpop.xlane.xlu0 %520 }
 0x3e2   :  { %738 = vrcp.f32 %v521_v32 }
 0x3ef   :  { %v739_v33 = vpop.eup %738 }
 0x3f0   :  { %v523_v34 = vmul.f32 %v739_v33, %v731_v14 }
 0x3f2   :  { %524 = vst.msk [vmem:[%s1295_s9] sm:$0x3] %vm506_vm1, %v523_v34 }
 0x3fa   :  { %v543_v35 = vpop.xlane.xlu1 %542 }
 0x3fb   :  { %740 = vrcp.f32 %v543_v35 }
 0x3fe   :  { %v587_v36 = vpop.xlane.xlu1 %586 }
 0x3ff   :  { %742 = vrcp.f32 %v587_v36  ;;  %v565_v37 = vpop.xlane.xlu0 %564 }
 0x400   :  { %744 = vrcp.f32 %v565_v37 }
 0x408   :  { %v741_v38 = vpop.eup %740 }
 0x409   :  { %v545_v39 = vmul.f32 %v741_v38, %v733_v25 }
 0x40b   :  { %600 = vst.msk [vmem:[%s1295_s9 + $0x2] sm:$0x3] %vm506_vm1, %v545_v39 }
 0x40c   :  { %v743_v40 = vpop.eup %742 }
 0x40d   :  { %v745_v41 = vpop.eup %744  ;;  %v589_v42 = vmul.f32 %v743_v40, %v735_v28 }
 0x40e   :  { %v567_v43 = vmul.f32 %v745_v41, %v737_v29 }
 0x40f   :  { %602 = vst.msk [vmem:[%s1295_s9 + $0x6] sm:$0x3] %vm506_vm1, %v589_v42 }
 0x410   :  { %601 = vst.msk [vmem:[%s1295_s9 + $0x4] sm:$0x3] %vm506_vm1, %v567_v43 }

// kernel: rainbow_dqn_forward.3
= control target key start
LH: loop header
LB: loop body
LE: loop exit
PB: predicated region body
PF: predicated region fallthrough
CT: control target
= control target key end

     0   :  { %s4715_s15 = smov 0   ;;  %s6277_s0 = inlined_call_operand.vmem [shape: f32[2,272,3], index: 0, kind: input, shape index: {}]   ;;  %s6278_s1 = inlined_call_operand.vmem [shape: f32[9,3,32], index: 1, kind: input, shape index: {}]   ;;  %s6279_s2 = inlined_call_operand.vmem [shape: f32[1,32], index: 2, kind: input, shape index: {}]   ;;  %s6280_s3 = inlined_call_operand.vmem [shape: f32[56,207], index: 3, kind: input, shape index: {}]   ;;  %s6281_s4 = inlined_call_operand.vmem [shape: f32[2,56,32], index: 4, kind: output, shape index: {}]  }
   0x1 LB: > { %s3724_s16 = sadd.s32 4294967295, %s4687_s15   ;;  %p3728_p0 = scmp.ge.s32.totalorder %s4687_s15, 1  ;;  %s4687_s15 = sphi %s4715_s15, %s14_s15  }
   0x2   : > { %p162_p1 = scmp.lt.s32.totalorder %s4687_s15, 3 }
   0x4   : > { %p163_p2 = pnand %p3728_p0, %p162_p1 }
   0x6   : > { %166 = sbr.rel (%p163_p2) target bundleno = 747 (0x2eb), region = 36 }
   0xb   : > { %v3731_v0 = vld [vmem:[%s6278_s1 + $0x4] sm:$0x7]  ;;  %vm342_vm0 = vcmask 1042432   ;;  %p188_p3 = scmp.lt.s32.totalorder %s3724_s16, 1  ;;  %v3790_v1 = vld [vmem:[%s6278_s1 + $0x8] sm:$0x7] }
   0xc   : > { %4272 = vmatprep.subr.msk.mxu0 %vm342_vm0, %v3731_v0  ;;  %4668 = vmatprep.subr.msk.mxu1 %vm342_vm0, %v3731_v0  ;;  %v226_v2 = vld [vmem:[%s6278_s1] sm:$0x7]  ;;  %vm257_vm1 = vcmask 23552   ;;  %v3820_v9 = vld [vmem:[%s6278_s1 + $0xc] sm:$0x7]  ;;  %vm3536_vm2 = vcmask 646144  }
   0xd   : > { %4273 = vmatpush3.msk.msra.mxu0 %vm342_vm0, %v3731_v0  ;;  %4669 = vmatpush3.msk.msra.mxu1 %vm342_vm0, %v3731_v0  ;;  %s6358_s16 = smov (!%p188_p3, %s3724_s16), 1  ;;  %v4772_v10 = vld [vmem:[%s6278_s1 + $0x10] sm:$0x7]  ;;  %v4836_v23 = vld [vmem:[%s6278_s1 + $0x14] sm:$0x7]  ;;  %vm3384_vm3 = vcmask 1046528  }
   0xe   : > { %4360 = vmatprep.subr.msk.mxu0 %vm342_vm0, %v3790_v1  ;;  %4316 = vmatprep.subr.msk.mxu1 %vm342_vm0, %v226_v2  ;;  %s4670_s23 = smul.u32 272, %s6358_s16  ;;  %v4998_v56 = vld [vmem:[%s6278_s1 + $0x18] sm:$0x7]  ;;  %vm3661_vm4 = vcmask 261120  }
   0xf   : > { %s4671_s21 = smul.u32 56, %s6358_s16 }
  0x10   : > { %s4744_s26 = scalar_lea.vmem %s6277_s0, %s4670_s23 }
  0x11   : > { %v227_v3 = vld [vmem:[%s4744_s26 + $0x1] sm:$0xff]  ;;  %v4748_v4 = vld [vmem:[%s4744_s26 + $0xb1] sm:$0xff]  ;;  %v228_v5 = vld [vmem:[%s4744_s26 + $0x9] sm:$0xff]  ;;  %s197_s24 = scalar_lea.vmem %s6281_s4, %s4671_s21 }
  0x12   : > { %4274 = vmatprep.mubr.msk.f32.mxu0 %vm257_vm1, %v227_v3  ;;  %4307 = vmatprep.mubr.msk.f32.mxu1 %vm257_vm1, %v4748_v4  ;;  %v4755_v6 = vld [vmem:[%s4744_s26 + $0xb9] sm:$0xff]  ;;  %v4758_v7 = vld [vmem:[%s4744_s26 + $0x11] sm:$0xff]  ;;  %v4761_v8 = vld [vmem:[%s4744_s26 + $0xc1] sm:$0xff] }
  0x13   : > { %6311 = vst [vmem:[#allocation2_spill] sm:$0xff] %v4761_v8  ;;  %4275 = vmatmul.mubr.msk.f32.vlgmr.msra.gmra.mxu0 %vm257_vm1, %v228_v5  ;;  %4308 = vmatmul.mubr.msk.f32.vlgmr.msra.gmra.mxu1 %vm257_vm1, %v4755_v6  ;;  %v4779_v11 = vld [vmem:[%s4744_s26 + $0x19] sm:$0xff]  ;;  %v4782_v12 = vld [vmem:[%s4744_s26 + $0xc9] sm:$0xff]  ;;  %v4786_v13 = vld [vmem:[%s4744_s26 + $0x21] sm:$0xff] }
  0x14   : > { %4277 = vmatprep.mubr.msk.f32.mxu0 %vm257_vm1, %v4758_v7  ;;  %4310 = vmatprep.mubr.msk.f32.mxu1 %vm257_vm1, %v4761_v8  ;;  %6312 = vst [vmem:[#allocation3_spill] sm:$0xff] %v4782_v12  ;;  %v4789_v14 = vld [vmem:[%s4744_s26 + $0xd1] sm:$0xff]  ;;  %v4804_v15 = vld [vmem:[%s4744_s26 + $0x29] sm:$0xff]  ;;  %v4807_v16 = vld [vmem:[%s4744_s26 + $0xd9] sm:$0xff] }
  0x15   : > { %4361 = vmatpush3.msk.msra.mxu0 %vm342_vm0, %v3790_v1  ;;  %6313 = vst [vmem:[#allocation4_spill] sm:$0xff] %v4789_v14  ;;  %4317 = vmatpush3.msk.msra.mxu1 %vm342_vm0, %v226_v2  ;;  %6314 = vst [vmem:[#allocation5_spill] sm:$0xff] %v4807_v16  ;;  %v4810_v17 = vld [vmem:[%s4744_s26 + $0x31] sm:$0xff]  ;;  %v198_v18 = vld [vmem:[%s4744_s26] sm:$0xff] }
  0x16   : > { %4404 = vmatprep.subr.msk.mxu1 %vm342_vm0, %v3820_v9  ;;  %4448 = vmatprep.subr.msk.mxu0 %vm342_vm0, %v4772_v10  ;;  %v4821_v19 = vld [vmem:[%s4744_s26 + $0x39] sm:$0xff]  ;;  %v199_v20 = vld [vmem:[%s4744_s26 + $0x8] sm:$0xff]  ;;  %v4828_v22 = vld [vmem:[%s4744_s26 + $0x10] sm:$0xff] }
  0x17   : > { %4278 = vmatmul.mubr.msk.f32.gmra.mxu0 %vm257_vm1, %v4779_v11  ;;  %4311 = vmatmul.mubr.msk.f32.gmra.mxu1 %vm257_vm1, %v4782_v12  ;;  %v4825_v21 = vld [vmem:[%s4744_s26 + $0x41] sm:$0xff]  ;;  %v4843_v24 = vld [vmem:[%s4744_s26 + $0x49] sm:$0xff]  ;;  %v4846_v25 = vld [vmem:[%s4744_s26 + $0x18] sm:$0xff] }
  0x18   : > { %4280 = vmatprep.mubr.msk.f32.mxu0 %vm257_vm1, %v4786_v13  ;;  %4313 = vmatprep.mubr.msk.f32.mxu1 %vm257_vm1, %v4789_v14  ;;  %v4849_v26 = vld [vmem:[%s4744_s26 + $0x51] sm:$0xff]  ;;  %v4852_v27 = vld [vmem:[%s4744_s26 + $0x20] sm:$0xff]  ;;  %v4869_v29 = vld [vmem:[%s4744_s26 + $0x28] sm:$0xff] }
  0x19   : > { %v4866_v28 = vld [vmem:[%s4744_s26 + $0x59] sm:$0xff]  ;;  %6315 = vst [vmem:[#allocation6_spill] sm:$0xff] %v4869_v29  ;;  %v4872_v30 = vld [vmem:[%s4744_s26 + $0x61] sm:$0xff]  ;;  %v4875_v31 = vld [vmem:[%s4744_s26 + $0x30] sm:$0xff] }
  0x1a   : > { %6316 = vst [vmem:[#allocation7_spill] sm:$0xff] %v4875_v31  ;;  %v4886_v32 = vld [vmem:[%s4744_s26 + $0x69] sm:$0xff]  ;;  %v4889_v33 = vld [vmem:[%s4744_s26 + $0x38] sm:$0xff]  ;;  %v4895_v35 = vld [vmem:[%s4744_s26 + $0x40] sm:$0xff] }
  0x1b   : > { %4281 = vmatmul.mubr.msk.f32.gmra.mxu0 %vm257_vm1, %v4804_v15  ;;  %4314 = vmatmul.mubr.msk.f32.gmra.mxu1 %vm257_vm1, %v4807_v16  ;;  %6317 = vst [vmem:[#allocation8_spill] sm:$0xff] %v4889_v33  ;;  %v4892_v34 = vld [vmem:[%s4744_s26 + $0x71] sm:$0xff]  ;;  %6318 = vst [vmem:[#allocation9_spill] sm:$0xff] %v4895_v35  ;;  %v4906_v36 = vld [vmem:[%s4744_s26 + $0x79] sm:$0xff] }
  0x1c   : > { %4283 = vmatprep.mubr.msk.f32.mxu0 %vm257_vm1, %v4810_v17  ;;  %4318 = vmatprep.mubr.msk.f32.mxu1 %vm257_vm1, %v198_v18  ;;  %v4909_v37 = vld [vmem:[%s4744_s26 + $0x48] sm:$0xff]  ;;  %v4915_v39 = vld [vmem:[%s4744_s26 + $0x50] sm:$0xff]  ;;  %v4929_v41 = vld [vmem:[%s4744_s26 + $0x58] sm:$0xff] }
  0x1d   : > { %6319 = vst [vmem:[#allocation10_spill] sm:$0xff] %v4909_v37  ;;  %v4912_v38 = vld [vmem:[%s4744_s26 + $0x81] sm:$0xff]  ;;  %6320 = vst [vmem:[#allocation11_spill] sm:$0xff] %v4915_v39  ;;  %v4926_v40 = vld [vmem:[%s4744_s26 + $0x89] sm:$0xff] }
  0x1e   : > { %6321 = vst [vmem:[#allocation12_spill] sm:$0xff] %v4929_v41  ;;  %v4932_v42 = vld [vmem:[%s4744_s26 + $0x91] sm:$0xff]  ;;  %v4935_v43 = vld [vmem:[%s4744_s26 + $0x60] sm:$0xff]  ;;  %v4949_v45 = vld [vmem:[%s4744_s26 + $0x68] sm:$0xff] }
  0x1f   : > { %4284 = vmatmul.mubr.msk.f32.gmra.mxu0 %vm257_vm1, %v4821_v19  ;;  %4319 = vmatmul.mubr.msk.f32.vlgmr.msra.gmra.mxu1 %vm257_vm1, %v199_v20  ;;  %v4946_v44 = vld [vmem:[%s4744_s26 + $0x99] sm:$0xff]  ;;  %6322 = vst [vmem:[#allocation13_spill] sm:$0xff] %v4949_v45  ;;  %v4952_v46 = vld [vmem:[%s4744_s26 + $0xa1] sm:$0xff]  ;;  %v4955_v47 = vld [vmem:[%s4744_s26 + $0x70] sm:$0xff] }
  0x20   : > { %4286 = vmatprep.mubr.msk.f32.mxu0 %vm257_vm1, %v4825_v21  ;;  %4321 = vmatprep.mubr.msk.f32.mxu1 %vm257_vm1, %v4828_v22  ;;  %v4966_v48 = vld [vmem:[%s4744_s26 + $0xa9] sm:$0xff]  ;;  %v4969_v49 = vld [vmem:[%s4744_s26 + $0x78] sm:$0xff]  ;;  %v4972_v50 = vld [vmem:[%s4744_s26 + $0x80] sm:$0xff] }
  0x21   : > { %4405 = vmatpush3.msk.msra.mxu1 %vm342_vm0, %v3820_v9  ;;  %6323 = vst [vmem:[#allocation14_spill] sm:$0xff] %v4972_v50  ;;  %v843_v51 = vld [vmem:[%s4744_s26 + $0x2] sm:$0xff]  ;;  %v844_v53 = vld [vmem:[%s4744_s26 + $0xa] sm:$0xff]  ;;  %v4990_v55 = vld [vmem:[%s4744_s26 + $0x12] sm:$0xff] }
  0x22   : > { %4492 = vmatprep.subr.msk.mxu1 %vm342_vm0, %v4836_v23  ;;  %v4983_v52 = vld [vmem:[%s4744_s26 + $0x88] sm:$0xff]  ;;  %v4987_v54 = vld [vmem:[%s4744_s26 + $0x90] sm:$0xff]  ;;  %v5005_v57 = vld [vmem:[%s4744_s26 + $0x98] sm:$0xff] }
  0x23   : > { %4287 = vmatmul.mubr.msk.f32.gmra.mxu0 %vm257_vm1, %v4843_v24  ;;  %4322 = vmatmul.mubr.msk.f32.gmra.mxu1 %vm257_vm1, %v4846_v25  ;;  %v5008_v58 = vld [vmem:[%s4744_s26 + $0x1a] sm:$0xff]  ;;  %v5016_v60 = vld [vmem:[%s4744_s26 + $0x22] sm:$0xff]  ;;  %v5032_v62 = vld [vmem:[%s4744_s26 + $0x2a] sm:$0xff] }
  0x24   : > { %4289 = vmatprep.mubr.msk.f32.mxu0 %vm257_vm1, %v4849_v26  ;;  %4324 = vmatprep.mubr.msk.f32.mxu1 %vm257_vm1, %v4852_v27  ;;  %v5013_v59 = vld [vmem:[%s4744_s26 + $0xa0] sm:$0xff]  ;;  %v5029_v61 = vld [vmem:[%s4744_s26 + $0xa8] sm:$0xff]  ;;  %v5035_v63 = vld [vmem:[%s4744_s26 + $0xb0] sm:$0xff] }
  0x25   : > { %v5038_v0 = vld [vmem:[%s4744_s26 + $0x32] sm:$0xff]  ;;  %v5052_v2 = vld [vmem:[%s4744_s26 + $0x3a] sm:$0xff]  ;;  %v5058_v5 = vld [vmem:[%s4744_s26 + $0x42] sm:$0xff] }
  0x26   : > { %v5049_v1 = vld [vmem:[%s4744_s26 + $0xb8] sm:$0xff]  ;;  %v5055_v3 = vld [vmem:[%s4744_s26 + $0xc0] sm:$0xff]  ;;  %v5069_v9 = vld [vmem:[%s4744_s26 + $0xc8] sm:$0xff] }
  0x27   : > { %4290 = vmatmul.mubr.msk.f32.gmra.mxu0 %vm257_vm1, %v4866_v28  ;;  %4325 = vmatmul.mubr.msk.f32.gmra.mxu1 %vm257_vm1, %v4869_v29  ;;  %v5075_v18 = vld [vmem:[%s4744_s26 + $0xd0] sm:$0xff]  ;;  %v5095_v16 = vld [vmem:[%s4744_s26 + $0x62] sm:$0xff]  ;;  %v5118_v8 = vld [vmem:[%s6278_s1 + $0x1c] sm:$0x7] }
  0x28   : > { %4292 = vmatprep.mubr.msk.f32.mxu0 %vm257_vm1, %v4872_v30  ;;  %4327 = vmatprep.mubr.msk.f32.mxu1 %vm257_vm1, %v4875_v31  ;;  %v5078_v20 = vld [vmem:[%s4744_s26 + $0x52] sm:$0xff]  ;;  %6326 = vst [vmem:[#allocation17_spill] sm:$0xff] %v5095_v16  ;;  %v5106_v14 = vld [vmem:[%s4744_s26 + $0x6a] sm:$0xff] }
  0x29   : > { %6324 = vst [vmem:[#allocation15_spill] sm:$0xff] %v5078_v20  ;;  %6327 = vst [vmem:[#allocation18_spill] sm:$0xff] %v5106_v14  ;;  %v5109_v12 = vld [vmem:[%s4744_s26 + $0x72] sm:$0xff] }
  0x2b   : > { %4293 = vmatmul.mubr.msk.f32.gmra.mxu0 %vm257_vm1, %v4886_v32  ;;  %4328 = vmatmul.mubr.msk.f32.gmra.mxu1 %vm257_vm1, %v4889_v33 }
  0x2c   : > { %4295 = vmatprep.mubr.msk.f32.mxu0 %vm257_vm1, %v4892_v34  ;;  %4330 = vmatprep.mubr.msk.f32.mxu1 %vm257_vm1, %v4895_v35 }
  0x2f   : > { %4296 = vmatmul.mubr.msk.f32.gmra.mxu0 %vm257_vm1, %v4906_v36  ;;  %4331 = vmatmul.mubr.msk.f32.gmra.mxu1 %vm257_vm1, %v4909_v37 }
  0x30   : > { %4298 = vmatprep.mubr.msk.f32.mxu0 %vm257_vm1, %v4912_v38  ;;  %4333 = vmatprep.mubr.msk.f32.mxu1 %vm257_vm1, %v4915_v39 }
  0x33   : > { %4299 = vmatmul.mubr.msk.f32.gmra.mxu0 %vm257_vm1, %v4926_v40  ;;  %4334 = vmatmul.mubr.msk.f32.gmra.mxu1 %vm257_vm1, %v4929_v41 }
  0x34   : > { %4301 = vmatprep.mubr.msk.f32.mxu0 %vm257_vm1, %v4932_v42  ;;  %4336 = vmatprep.mubr.msk.f32.mxu1 %vm257_vm1, %v4935_v43 }
  0x37   : > { %4302 = vmatmul.mubr.msk.f32.gmra.mxu0 %vm257_vm1, %v4946_v44  ;;  %4337 = vmatmul.mubr.msk.f32.gmra.mxu1 %vm257_vm1, %v4949_v45 }
  0x38   : > { %4304 = vmatprep.mubr.msk.f32.mxu0 %vm257_vm1, %v4952_v46  ;;  %4339 = vmatprep.mubr.msk.f32.mxu1 %vm257_vm1, %v4955_v47 }
  0x3b   : > { %4305 = vmatmul.mubr.msk.f32.gmra.mxu0 %vm257_vm1, %v4966_v48  ;;  %4340 = vmatmul.mubr.msk.f32.gmra.mxu1 %vm257_vm1, %v4969_v49 }
  0x3c   : > { %4342 = vmatprep.mubr.msk.f32.mxu1 %vm257_vm1, %v4972_v50  ;;  %4362 = vmatprep.mubr.msk.f32.mxu0 %vm257_vm1, %v843_v51  ;;  %v5089_v51 = vld [vmem:[%s4744_s26 + $0xd8] sm:$0xff] }
  0x3f   : > { %4343 = vmatmul.mubr.msk.f32.gmra.mxu1 %vm257_vm1, %v4983_v52  ;;  %4363 = vmatmul.mubr.msk.f32.vlgmr.msra.gmra.mxu0 %vm257_vm1, %v844_v53  ;;  %v5092_v53 = vld [vmem:[%s4744_s26 + $0x5a] sm:$0xff] }
  0x40   : > { %4345 = vmatprep.mubr.msk.f32.mxu1 %vm257_vm1, %v4987_v54  ;;  %4365 = vmatprep.mubr.msk.f32.mxu0 %vm257_vm1, %v4990_v55  ;;  %6325 = vst [vmem:[#allocation16_spill] sm:$0xff] %v5092_v53 }
  0x41   : > { %4449 = vmatpush3.msk.msra.mxu0 %vm342_vm0, %v4772_v10  ;;  %v5072_v10 = vld [vmem:[%s4744_s26 + $0x4a] sm:$0xff] }
  0x42   : > { %4536 = vmatprep.subr.msk.mxu0 %vm342_vm0, %v4998_v56 }
  0x43   : > { %4346 = vmatmul.mubr.msk.f32.gmra.mxu1 %vm257_vm1, %v5005_v57  ;;  %4366 = vmatmul.mubr.msk.f32.gmra.mxu0 %vm257_vm1, %v5008_v58 }
  0x44   : > { %4348 = vmatprep.mubr.msk.f32.mxu1 %vm257_vm1, %v5013_v59  ;;  %4368 = vmatprep.mubr.msk.f32.mxu0 %vm257_vm1, %v5016_v60 }
  0x47   : > { %4349 = vmatmul.mubr.msk.f32.gmra.mxu1 %vm257_vm1, %v5029_v61  ;;  %4369 = vmatmul.mubr.msk.f32.gmra.mxu0 %vm257_vm1, %v5032_v62 }
  0x48   : > { %4351 = vmatprep.mubr.msk.f32.mxu1 %vm257_vm1, %v5035_v63  ;;  %4371 = vmatprep.mubr.msk.f32.mxu0 %vm257_vm1, %v5038_v0 }
  0x4b   : > { %4352 = vmatmul.mubr.msk.f32.gmra.mxu1 %vm257_vm1, %v5049_v1  ;;  %4372 = vmatmul.mubr.msk.f32.gmra.mxu0 %vm257_vm1, %v5052_v2 }
  0x4c   : > { %4354 = vmatprep.mubr.msk.f32.mxu1 %vm257_vm1, %v5055_v3  ;;  %4374 = vmatprep.mubr.msk.f32.mxu0 %vm257_vm1, %v5058_v5 }
  0x4f   : > { %4355 = vmatmul.mubr.msk.f32.gmra.mxu1 %vm257_vm1, %v5069_v9  ;;  %4375 = vmatmul.mubr.msk.f32.gmra.mxu0 %vm257_vm1, %v5072_v10 }
  0x50   : > { %4357 = vmatprep.mubr.msk.f32.mxu1 %vm257_vm1, %v5075_v18  ;;  %4377 = vmatprep.mubr.msk.f32.mxu0 %vm257_vm1, %v5078_v20 }
  0x53   : > { %4358 = vmatmul.mubr.msk.f32.gmra.mxu1 %vm257_vm1, %v5089_v51  ;;  %4378 = vmatmul.mubr.msk.f32.gmra.mxu0 %vm257_vm1, %v5092_v53 }
  0x54   : > { %4380 = vmatprep.mubr.msk.f32.mxu0 %vm257_vm1, %v5095_v16  ;;  %4406 = vmatprep.mubr.msk.f32.mxu1 %vm257_vm1, %v4828_v22  ;;  %v5125_v22 = vld [vmem:[%s4744_s26 + $0x7a] sm:$0xff]  ;;  %v5128_v16 = vld [vmem:[%s4744_s26 + $0x82] sm:$0xff] }
  0x55   : > { %6328 = vst [vmem:[#allocation19_spill] sm:$0xff] %v5125_v22  ;;  %6329 = vst [vmem:[#allocation20_spill] sm:$0xff] %v5128_v16 }
  0x57   : > { %4381 = vmatmul.mubr.msk.f32.gmra.mxu0 %vm257_vm1, %v5106_v14  ;;  %4407 = vmatmul.mubr.msk.f32.vlgmr.msra.gmra.mxu1 %vm257_vm1, %v4846_v25  ;;  %v5143_v25 = vld [vmem:[%s4744_s26 + $0x8a] sm:$0xff] }
  0x58   : > { %4383 = vmatprep.mubr.msk.f32.mxu0 %vm257_vm1, %v5109_v12  ;;  %4409 = vmatprep.mubr.msk.f32.mxu1 %vm257_vm1, %v4852_v27 }
  0x59   : > { %4493 = vmatpush3.msk.msra.mxu1 %vm342_vm0, %v4836_v23  ;;  %v5146_v23 = vld [vmem:[%s4744_s26 + $0x92] sm:$0xff] }
  0x5a   : > { %4580 = vmatprep.subr.msk.mxu1 %vm342_vm0, %v5118_v8 }
  0x5b   : > { %4384 = vmatmul.mubr.msk.f32.gmra.mxu0 %vm257_vm1, %v5125_v22  ;;  %4410 = vmatmul.mubr.msk.f32.gmra.mxu1 %vm257_vm1, %v4869_v29  ;;  %v5157_v29 = vld [vmem:[%s4744_s26 + $0x9a] sm:$0xff] }
  0x5c   : > { %4386 = vmatprep.mubr.msk.f32.mxu0 %vm257_vm1, %v5128_v16  ;;  %4412 = vmatprep.mubr.msk.f32.mxu1 %vm257_vm1, %v4875_v31  ;;  %6330 = vst [vmem:[#allocation21_spill] sm:$0xff] %v5157_v29  ;;  %v5160_v31 = vld [vmem:[%s4744_s26 + $0xa2] sm:$0xff] }
  0x5f   : > { %4387 = vmatmul.mubr.msk.f32.gmra.mxu0 %vm257_vm1, %v5143_v25  ;;  %4413 = vmatmul.mubr.msk.f32.gmra.mxu1 %vm257_vm1, %v4889_v33  ;;  %v5171_v33 = vld [vmem:[%s4744_s26 + $0xaa] sm:$0xff] }
  0x60   : > { %4389 = vmatprep.mubr.msk.f32.mxu0 %vm257_vm1, %v5146_v23  ;;  %4415 = vmatprep.mubr.msk.f32.mxu1 %vm257_vm1, %v4895_v35  ;;  %v5174_v35 = vld [vmem:[%s4744_s26 + $0xb2] sm:$0xff] }
  0x61   : > { %6331 = vst [vmem:[#allocation22_spill] sm:$0xff] %v5174_v35 }
  0x63   : > { %4390 = vmatmul.mubr.msk.f32.gmra.mxu0 %vm257_vm1, %v5157_v29  ;;  %4416 = vmatmul.mubr.msk.f32.gmra.mxu1 %vm257_vm1, %v4909_v37  ;;  %v5185_v37 = vld [vmem:[%s4744_s26 + $0xba] sm:$0xff] }
  0x64   : > { %4392 = vmatprep.mubr.msk.f32.mxu0 %vm257_vm1, %v5160_v31  ;;  %4418 = vmatprep.mubr.msk.f32.mxu1 %vm257_vm1, %v4915_v39  ;;  %v5188_v39 = vld [vmem:[%s4744_s26 + $0xc2] sm:$0xff] }
  0x67   : > { %4393 = vmatmul.mubr.msk.f32.gmra.mxu0 %vm257_vm1, %v5171_v33  ;;  %4419 = vmatmul.mubr.msk.f32.gmra.mxu1 %vm257_vm1, %v4929_v41  ;;  %v5199_v41 = vld [vmem:[%s4744_s26 + $0xca] sm:$0xff] }
  0x68   : > { %4395 = vmatprep.mubr.msk.f32.mxu0 %vm257_vm1, %v5174_v35  ;;  %4421 = vmatprep.mubr.msk.f32.mxu1 %vm257_vm1, %v4935_v43  ;;  %v5202_v35 = vld [vmem:[%s4744_s26 + $0xd2] sm:$0xff] }
  0x6b   : > { %4396 = vmatmul.mubr.msk.f32.gmra.mxu0 %vm257_vm1, %v5185_v37  ;;  %4422 = vmatmul.mubr.msk.f32.gmra.mxu1 %vm257_vm1, %v4949_v45  ;;  %v5213_v45 = vld [vmem:[%s4744_s26 + $0xda] sm:$0xff] }
  0x6c   : > { %4398 = vmatprep.mubr.msk.f32.mxu0 %vm257_vm1, %v5188_v39  ;;  %4424 = vmatprep.mubr.msk.f32.mxu1 %vm257_vm1, %v4955_v47 }
  0x6f   : > { %4399 = vmatmul.mubr.msk.f32.gmra.mxu0 %vm257_vm1, %v5199_v41  ;;  %4425 = vmatmul.mubr.msk.f32.gmra.mxu1 %vm257_vm1, %v4969_v49 }
  0x70   : > { %4401 = vmatprep.mubr.msk.f32.mxu0 %vm257_vm1, %v5202_v35  ;;  %4427 = vmatprep.mubr.msk.f32.mxu1 %vm257_vm1, %v4972_v50  ;;  %v5230_v50 = vld [vmem:[%s6278_s1 + $0x20] sm:$0x7] }
  0x73   : > { %4402 = vmatmul.mubr.msk.f32.gmra.mxu0 %vm257_vm1, %v5213_v45  ;;  %4428 = vmatmul.mubr.msk.f32.gmra.mxu1 %vm257_vm1, %v4983_v52 }
  0x74   : > { %4430 = vmatprep.mubr.msk.f32.mxu1 %vm257_vm1, %v4987_v54  ;;  %4450 = vmatprep.mubr.msk.f32.mxu0 %vm257_vm1, %v4758_v7  ;;  %v5265_v7 = vld [vmem:[%s4744_s26 + $0xe0] sm:$0xff] }
  0x77   : > { %4431 = vmatmul.mubr.msk.f32.gmra.mxu1 %vm257_vm1, %v5005_v57  ;;  %4451 = vmatmul.mubr.msk.f32.vlgmr.msra.gmra.mxu0 %vm257_vm1, %v4779_v11  ;;  %v5276_v11 = vld [vmem:[%s4744_s26 + $0xe8] sm:$0xff] }
  0x78   : > { %4433 = vmatprep.mubr.msk.f32.mxu1 %vm257_vm1, %v5013_v59  ;;  %4453 = vmatprep.mubr.msk.f32.mxu0 %vm257_vm1, %v4786_v13 }
  0x79   : > { %4537 = vmatpush3.msk.msra.mxu0 %vm342_vm0, %v4998_v56  ;;  %v6334_v56 = vld [vmem:[#allocation3_spill] sm:$0xff] }
  0x7a   : > { %4624 = vmatprep.subr.msk.mxu0 %vm342_vm0, %v5230_v50 }
  0x7b   : > { %4434 = vmatmul.mubr.msk.f32.gmra.mxu1 %vm257_vm1, %v5029_v61  ;;  %4454 = vmatmul.mubr.msk.f32.gmra.mxu0 %vm257_vm1, %v4804_v15 }
  0x7c   : > { %4436 = vmatprep.mubr.msk.f32.mxu1 %vm257_vm1, %v5035_v63  ;;  %4456 = vmatprep.mubr.msk.f32.mxu0 %vm257_vm1, %v4810_v17 }
  0x7f   : > { %4437 = vmatmul.mubr.msk.f32.gmra.mxu1 %vm257_vm1, %v5049_v1  ;;  %4457 = vmatmul.mubr.msk.f32.gmra.mxu0 %vm257_vm1, %v4821_v19 }
  0x80   : > { %4439 = vmatprep.mubr.msk.f32.mxu1 %vm257_vm1, %v5055_v3  ;;  %4459 = vmatprep.mubr.msk.f32.mxu0 %vm257_vm1, %v4825_v21 }
  0x83   : > { %4440 = vmatmul.mubr.msk.f32.gmra.mxu1 %vm257_vm1, %v5069_v9  ;;  %4460 = vmatmul.mubr.msk.f32.gmra.mxu0 %vm257_vm1, %v4843_v24 }
  0x84   : > { %4442 = vmatprep.mubr.msk.f32.mxu1 %vm257_vm1, %v5075_v18  ;;  %4462 = vmatprep.mubr.msk.f32.mxu0 %vm257_vm1, %v4849_v26 }
  0x87   : > { %4443 = vmatmul.mubr.msk.f32.gmra.mxu1 %vm257_vm1, %v5089_v51  ;;  %4463 = vmatmul.mubr.msk.f32.gmra.mxu0 %vm257_vm1, %v4866_v28 }
  0x88   : > { %4445 = vmatprep.mubr.msk.f32.mxu1 %vm257_vm1, %v5265_v7  ;;  %4465 = vmatprep.mubr.msk.f32.mxu0 %vm257_vm1, %v4872_v30 }
  0x8b   : > { %4446 = vmatmul.mubr.msk.f32.gmra.mxu1 %vm257_vm1, %v5276_v11  ;;  %4466 = vmatmul.mubr.msk.f32.gmra.mxu0 %vm257_vm1, %v4886_v32 }
  0x8c   : > { %4468 = vmatprep.mubr.msk.f32.mxu0 %vm257_vm1, %v4892_v34  ;;  %4494 = vmatprep.mubr.msk.f32.mxu1 %vm257_vm1, %v4990_v55  ;;  %v6333_v55 = vld [vmem:[#allocation17_spill] sm:$0xff] }
  0x8f   : > { %4469 = vmatmul.mubr.msk.f32.gmra.mxu0 %vm257_vm1, %v4906_v36  ;;  %4495 = vmatmul.mubr.msk.f32.vlgmr.msra.gmra.mxu1 %vm257_vm1, %v5008_v58  ;;  %v6335_v58 = vld [vmem:[#allocation4_spill] sm:$0xff] }
  0x90   : > { %4471 = vmatprep.mubr.msk.f32.mxu0 %vm257_vm1, %v4912_v38  ;;  %4497 = vmatprep.mubr.msk.f32.mxu1 %vm257_vm1, %v5016_v60 }
  0x91   : > { %4581 = vmatpush3.msk.msra.mxu1 %vm342_vm0, %v5118_v8  ;;  %v6332_v8 = vld [vmem:[#allocation2_spill] sm:$0xff] }
  0x93   : > { %4472 = vmatmul.mubr.msk.f32.gmra.mxu0 %vm257_vm1, %v4926_v40  ;;  %4498 = vmatmul.mubr.msk.f32.gmra.mxu1 %vm257_vm1, %v5032_v62 }
  0x94   : > { %4474 = vmatprep.mubr.msk.f32.mxu0 %vm257_vm1, %v4932_v42  ;;  %4500 = vmatprep.mubr.msk.f32.mxu1 %vm257_vm1, %v5038_v0 }
  0x97   : > { %4475 = vmatmul.mubr.msk.f32.gmra.mxu0 %vm257_vm1, %v4946_v44  ;;  %4501 = vmatmul.mubr.msk.f32.gmra.mxu1 %vm257_vm1, %v5052_v2 }
  0x98   : > { %4477 = vmatprep.mubr.msk.f32.mxu0 %vm257_vm1, %v4952_v46  ;;  %4503 = vmatprep.mubr.msk.f32.mxu1 %vm257_vm1, %v5058_v5 }
  0x9b   : > { %4478 = vmatmul.mubr.msk.f32.gmra.mxu0 %vm257_vm1, %v4966_v48  ;;  %4504 = vmatmul.mubr.msk.f32.gmra.mxu1 %vm257_vm1, %v5072_v10 }
  0x9c   : > { %4480 = vmatprep.mubr.msk.f32.mxu0 %vm257_vm1, %v4748_v4  ;;  %4506 = vmatprep.mubr.msk.f32.mxu1 %vm257_vm1, %v5078_v20  ;;  %v5337_v20 = vld [vmem:[%s4744_s26 + $0xe1] sm:$0xff] }
  0x9f   : > { %4481 = vmatmul.mubr.msk.f32.gmra.mxu0 %vm257_vm1, %v4755_v6  ;;  %4507 = vmatmul.mubr.msk.f32.gmra.mxu1 %vm257_vm1, %v5092_v53  ;;  %v6336_v53 = vld [vmem:[#allocation5_spill] sm:$0xff] }
  0xa0   : > { %4483 = vmatprep.mubr.msk.f32.mxu0 %vm257_vm1, %v6332_v8  ;;  %4509 = vmatprep.mubr.msk.f32.mxu1 %vm257_vm1, %v6333_v55 }
  0xa3   : > { %4484 = vmatmul.mubr.msk.f32.gmra.mxu0 %vm257_vm1, %v6334_v56  ;;  %4510 = vmatmul.mubr.msk.f32.gmra.mxu1 %vm257_vm1, %v5106_v14  ;;  %v5348_v14 = vld [vmem:[%s4744_s26 + $0xe9] sm:$0xff] }
  0xa4   : > { %4486 = vmatprep.mubr.msk.f32.mxu0 %vm257_vm1, %v6335_v58  ;;  %4512 = vmatprep.mubr.msk.f32.mxu1 %vm257_vm1, %v5109_v12 }
  0xa7   : > { %4487 = vmatmul.mubr.msk.f32.gmra.mxu0 %vm257_vm1, %v6336_v53  ;;  %4513 = vmatmul.mubr.msk.f32.gmra.mxu1 %vm257_vm1, %v5125_v22  ;;  %v6337_v22 = vld [vmem:[#allocation6_spill] sm:$0xff] }
  0xa8   : > { %4489 = vmatprep.mubr.msk.f32.mxu0 %vm257_vm1, %v5337_v20  ;;  %4515 = vmatprep.mubr.msk.f32.mxu1 %vm257_vm1, %v5128_v16  ;;  %v6338_v16 = vld [vmem:[#allocation7_spill] sm:$0xff] }
  0xab   : > { %4490 = vmatmul.mubr.msk.f32.gmra.mxu0 %vm257_vm1, %v5348_v14  ;;  %4516 = vmatmul.mubr.msk.f32.gmra.mxu1 %vm257_vm1, %v5143_v25 }
  0xac   : > { %4518 = vmatprep.mubr.msk.f32.mxu1 %vm257_vm1, %v5146_v23  ;;  %4538 = vmatprep.mubr.msk.f32.mxu0 %vm257_vm1, %v4852_v27  ;;  %v6339_v27 = vld [vmem:[#allocation8_spill] sm:$0xff] }
  0xaf   : > { %4519 = vmatmul.mubr.msk.f32.gmra.mxu1 %vm257_vm1, %v5157_v29  ;;  %4539 = vmatmul.mubr.msk.f32.vlgmr.msra.gmra.mxu0 %vm257_vm1, %v6337_v22  ;;  %v6340_v29 = vld [vmem:[#allocation22_spill] sm:$0xff]  ;;  %v6341_v22 = vld [vmem:[#allocation9_spill] sm:$0xff] }
  0xb0   : > { %4521 = vmatprep.mubr.msk.f32.mxu1 %vm257_vm1, %v5160_v31  ;;  %4541 = vmatprep.mubr.msk.f32.mxu0 %vm257_vm1, %v6338_v16  ;;  %v6342_v16 = vld [vmem:[#allocation10_spill] sm:$0xff] }
  0xb1   : > { %4625 = vmatpush3.msk.msra.mxu0 %vm342_vm0, %v5230_v50  ;;  %v6343_v50 = vld [vmem:[#allocation11_spill] sm:$0xff] }
  0xb3   : > { %4522 = vmatmul.mubr.msk.f32.gmra.mxu1 %vm257_vm1, %v5171_v33  ;;  %4542 = vmatmul.mubr.msk.f32.gmra.mxu0 %vm257_vm1, %v6339_v27  ;;  %v6344_v27 = vld [vmem:[#allocation12_spill] sm:$0xff] }
  0xb4   : > { %4524 = vmatprep.mubr.msk.f32.mxu1 %vm257_vm1, %v6340_v29  ;;  %4544 = vmatprep.mubr.msk.f32.mxu0 %vm257_vm1, %v6341_v22  ;;  %v5393_v22 = vld [vmem:[%s4744_s26 + $0xe2] sm:$0xff] }
  0xb7   : > { %4525 = vmatmul.mubr.msk.f32.gmra.mxu1 %vm257_vm1, %v5185_v37  ;;  %4545 = vmatmul.mubr.msk.f32.gmra.mxu0 %vm257_vm1, %v6342_v16  ;;  %v6345_v16 = vld [vmem:[#allocation13_spill] sm:$0xff] }
  0xb8   : > { %4527 = vmatprep.mubr.msk.f32.mxu1 %vm257_vm1, %v5188_v39  ;;  %4547 = vmatprep.mubr.msk.f32.mxu0 %vm257_vm1, %v6343_v50  ;;  %v5404_v50 = vld [vmem:[%s4744_s26 + $0xea] sm:$0xff] }
  0xbb   : > { %4528 = vmatmul.mubr.msk.f32.gmra.mxu1 %vm257_vm1, %v5199_v41  ;;  %4548 = vmatmul.mubr.msk.f32.gmra.mxu0 %vm257_vm1, %v6344_v27 }
  0xbc   : > { %4530 = vmatprep.mubr.msk.f32.mxu1 %vm257_vm1, %v5202_v35  ;;  %4550 = vmatprep.mubr.msk.f32.mxu0 %vm257_vm1, %v4935_v43  ;;  %v6346_v43 = vld [vmem:[#allocation14_spill] sm:$0xff] }
  0xbf   : > { %4531 = vmatmul.mubr.msk.f32.gmra.mxu1 %vm257_vm1, %v5213_v45  ;;  %4551 = vmatmul.mubr.msk.f32.gmra.mxu0 %vm257_vm1, %v6345_v16 }
  0xc0   : > { %4533 = vmatprep.mubr.msk.f32.mxu1 %vm257_vm1, %v5393_v22  ;;  %4553 = vmatprep.mubr.msk.f32.mxu0 %vm257_vm1, %v4955_v47 }
  0xc3   : > { %4534 = vmatmul.mubr.msk.f32.gmra.mxu1 %vm257_vm1, %v5404_v50  ;;  %4554 = vmatmul.mubr.msk.f32.gmra.mxu0 %vm257_vm1, %v4969_v49  ;;  %v2269_v49 = vld [vmem:[%s4744_s26 + $0xf0] sm:$0xff] }
  0xc4   : > { %4556 = vmatprep.mubr.msk.f32.mxu0 %vm257_vm1, %v6346_v43  ;;  %4582 = vmatprep.mubr.msk.f32.mxu1 %vm257_vm1, %v4786_v13  ;;  %v2619_v43 = vld [vmem:[%s4744_s26 + $0xf1] sm:$0xff] }
  0xc7   : > { %4557 = vmatmul.mubr.msk.f32.gmra.mxu0 %vm257_vm1, %v4983_v52  ;;  %4583 = vmatmul.mubr.msk.f32.vlgmr.msra.gmra.mxu1 %vm257_vm1, %v4804_v15 }
  0xc8   : > { %4559 = vmatprep.mubr.msk.f32.mxu0 %vm257_vm1, %v4987_v54  ;;  %4585 = vmatprep.mubr.msk.f32.mxu1 %vm257_vm1, %v4810_v17 }
  0xcb   : > { %4560 = vmatmul.mubr.msk.f32.gmra.mxu0 %vm257_vm1, %v5005_v57  ;;  %4586 = vmatmul.mubr.msk.f32.gmra.mxu1 %vm257_vm1, %v4821_v19 }
  0xcc   : > { %4562 = vmatprep.mubr.msk.f32.mxu0 %vm257_vm1, %v5013_v59  ;;  %4588 = vmatprep.mubr.msk.f32.mxu1 %vm257_vm1, %v4825_v21 }
  0xcf   : > { %4563 = vmatmul.mubr.msk.f32.gmra.mxu0 %vm257_vm1, %v5029_v61  ;;  %4589 = vmatmul.mubr.msk.f32.gmra.mxu1 %vm257_vm1, %v4843_v24 }
  0xd0   : > { %4565 = vmatprep.mubr.msk.f32.mxu0 %vm257_vm1, %v5035_v63  ;;  %4591 = vmatprep.mubr.msk.f32.mxu1 %vm257_vm1, %v4849_v26 }
  0xd3   : > { %v4276_v13 = vpop.f32.mrf.mxu0  ;;  %v5438_v15 = vpop.f32.mrf.mxu1  ;;  %4566 = vmatmul.mubr.msk.f32.gmra.mxu0 %vm257_vm1, %v5049_v1  ;;  %4592 = vmatmul.mubr.msk.f32.gmra.mxu1 %vm257_vm1, %v4866_v28 }
  0xd4   : > { %4568 = vmatprep.mubr.msk.f32.mxu0 %vm257_vm1, %v5055_v3  ;;  %4594 = vmatprep.mubr.msk.f32.mxu1 %vm257_vm1, %v4872_v30 }
  0xd5   : > { %v5448_v17 = vpop.f32.mrf.mxu0  ;;  %v5450_v19 = vpop.f32.mrf.mxu1 }
  0xd7   : > { %v4279_v21 = vpop.f32.mrf.mxu0  ;;  %v5452_v24 = vpop.f32.mrf.mxu1  ;;  %4569 = vmatmul.mubr.msk.f32.gmra.mxu0 %vm257_vm1, %v5069_v9  ;;  %4595 = vmatmul.mubr.msk.f32.gmra.mxu1 %vm257_vm1, %v4886_v32 }
  0xd8   : > { %4571 = vmatprep.mubr.msk.f32.mxu0 %vm257_vm1, %v5075_v18  ;;  %4597 = vmatprep.mubr.msk.f32.mxu1 %vm257_vm1, %v4892_v34 }
  0xd9   : > { %v5462_v26 = vpop.f32.mrf.mxu0  ;;  %v5464_v28 = vpop.f32.mrf.mxu1 }
  0xdb   : > { %v4282_v30 = vpop.f32.mrf.mxu0  ;;  %v5466_v47 = vpop.f32.mrf.mxu1  ;;  %4572 = vmatmul.mubr.msk.f32.gmra.mxu0 %vm257_vm1, %v5089_v51  ;;  %4598 = vmatmul.mubr.msk.f32.gmra.mxu1 %vm257_vm1, %v4906_v36 }
  0xdc   : > { %4574 = vmatprep.mubr.msk.f32.mxu0 %vm257_vm1, %v5265_v7  ;;  %4600 = vmatprep.mubr.msk.f32.mxu1 %vm257_vm1, %v4912_v38  ;;  %v2270_v38 = vld [vmem:[%s4744_s26 + $0xf8] sm:$0xff] }
  0xdd   : > { %v5476_v32 = vpop.f32.mrf.mxu0  ;;  %v5478_v34 = vpop.f32.mrf.mxu1 }
  0xdf   : > { %v4285_v52 = vpop.f32.mrf.mxu0  ;;  %v4320_v54 = vpop.f32.mrf.mxu1  ;;  %4575 = vmatmul.mubr.msk.f32.gmra.mxu0 %vm257_vm1, %v5276_v11  ;;  %4601 = vmatmul.mubr.msk.f32.gmra.mxu1 %vm257_vm1, %v4926_v40 }
  0xe0   : > { %v5485_v36 = vadd.f32 %v4320_v54, %v4276_v13  ;;  %4577 = vmatprep.mubr.msk.f32.mxu0 %vm257_vm1, %v2269_v49  ;;  %4603 = vmatprep.mubr.msk.f32.mxu1 %vm257_vm1, %v4932_v42 }
  0xe1   : > { %v5491_v57 = vpop.f32.mrf.mxu0  ;;  %v5493_v59 = vpop.f32.mrf.mxu1 }
  0xe3   : > { %v4288_v61 = vpop.f32.mrf.mxu0  ;;  %v4323_v63 = vpop.f32.mrf.mxu1  ;;  %4578 = vmatmul.mubr.msk.f32.gmra.mxu0 %vm257_vm1, %v2270_v38  ;;  %4604 = vmatmul.mubr.msk.f32.gmra.mxu1 %vm257_vm1, %v4946_v44  ;;  %v6350_v38 = vld [vmem:[#allocation19_spill] sm:$0xff] }
  0xe4   : > { %v5498_v40 = vadd.f32 %v4323_v63, %v4279_v21  ;;  %4606 = vmatprep.mubr.msk.f32.mxu1 %vm257_vm1, %v4952_v46  ;;  %4626 = vmatprep.mubr.msk.f32.mxu0 %vm257_vm1, %v5016_v60 }
  0xe5   : > { %v5504_v42 = vpop.f32.mrf.mxu0  ;;  %v5506_v1 = vpop.f32.mrf.mxu1 }
  0xe7   : > { %v4291_v3 = vpop.f32.mrf.mxu0  ;;  %v4326_v9 = vpop.f32.mrf.mxu1  ;;  %4607 = vmatmul.mubr.msk.f32.gmra.mxu1 %vm257_vm1, %v4966_v48  ;;  %4627 = vmatmul.mubr.msk.f32.vlgmr.msra.gmra.mxu0 %vm257_vm1, %v5032_v62 }
  0xe8   : > { %v5512_v44 = vadd.f32 %v4326_v9, %v4282_v30  ;;  %4609 = vmatprep.mubr.msk.f32.mxu1 %vm257_vm1, %v4748_v4  ;;  %4629 = vmatprep.mubr.msk.f32.mxu0 %vm257_vm1, %v5038_v0 }
  0xe9   : > { %v5518_v46 = vpop.f32.mrf.mxu0  ;;  %v5520_v60 = vpop.f32.mrf.mxu1 }
  0xeb   : > { %v4294_v18 = vpop.f32.mrf.mxu0  ;;  %v4329_v51 = vpop.f32.mrf.mxu1  ;;  %4610 = vmatmul.mubr.msk.f32.gmra.mxu1 %vm257_vm1, %v4755_v6  ;;  %4630 = vmatmul.mubr.msk.f32.gmra.mxu0 %vm257_vm1, %v5052_v2  ;;  %v6347_v2 = vld [vmem:[#allocation15_spill] sm:$0xff] }
  0xec   : > { %v5526_v48 = vadd.f32 %v4329_v51, %v4285_v52  ;;  %4612 = vmatprep.mubr.msk.f32.mxu1 %vm257_vm1, %v6332_v8  ;;  %4632 = vmatprep.mubr.msk.f32.mxu0 %vm257_vm1, %v5058_v5  ;;  %v705_v51 = vadd.f32 %v5493_v59, %v5448_v17  ;;  %v715_v17 = vadd.f32 %v5506_v1, %v5462_v26 }
  0xed   : > { %v5532_v4 = vpop.f32.mrf.mxu0  ;;  %v5534_v62 = vpop.f32.mrf.mxu1  ;;  %v725_v26 = vadd.f32 %v5520_v60, %v5476_v32 }
  0xef   : > { %v4297_v0 = vpop.f32.mrf.mxu0  ;;  %v4332_v7 = vpop.f32.mrf.mxu1  ;;  %4613 = vmatmul.mubr.msk.f32.gmra.mxu1 %vm257_vm1, %v6334_v56  ;;  %4633 = vmatmul.mubr.msk.f32.gmra.mxu0 %vm257_vm1, %v5072_v10  ;;  %v6348_v56 = vld [vmem:[#allocation16_spill] sm:$0xff] }
  0xf0   : > { %v5540_v6 = vadd.f32 %v4332_v7, %v4288_v61  ;;  %4615 = vmatprep.mubr.msk.f32.mxu1 %vm257_vm1, %v6335_v58  ;;  %4635 = vmatprep.mubr.msk.f32.mxu0 %vm257_vm1, %v6347_v2  ;;  %v6351_v61 = vld [vmem:[#allocation20_spill] sm:$0xff] }
  0xf1   : > { %v482_v5 = vpop.f32.mrf.mxu0  ;;  %v5546_v11 = vpop.f32.mrf.mxu1 }
  0xf3   : > { %v4300_v8 = vpop.f32.mrf.mxu0  ;;  %v4335_v27 = vpop.f32.mrf.mxu1  ;;  %4616 = vmatmul.mubr.msk.f32.gmra.mxu1 %vm257_vm1, %v6336_v53  ;;  %4636 = vmatmul.mubr.msk.f32.gmra.mxu0 %vm257_vm1, %v6348_v56  ;;  %v6349_v53 = vld [vmem:[#allocation18_spill] sm:$0xff] }
  0xf4   : > { %v5552_v10 = vadd.f32 %v4335_v27, %v4291_v3  ;;  %4618 = vmatprep.mubr.msk.f32.mxu1 %vm257_vm1, %v5337_v20  ;;  %4638 = vmatprep.mubr.msk.f32.mxu0 %vm257_vm1, %v6333_v55  ;;  %v2620_v20 = vld [vmem:[%s4744_s26 + $0xf9] sm:$0xff] }
  0xf5   : > { %v492_v58 = vpop.f32.mrf.mxu0  ;;  %v5558_v16 = vpop.f32.mrf.mxu1 }
  0xf7   : > { %v4303_v13 = vpop.f32.mrf.mxu0  ;;  %v4338_v21 = vpop.f32.mrf.mxu1  ;;  %4619 = vmatmul.mubr.msk.f32.gmra.mxu1 %vm257_vm1, %v5348_v14  ;;  %4639 = vmatmul.mubr.msk.f32.gmra.mxu0 %vm257_vm1, %v6349_v53 }
  0xf8   : > { %v5565_v30 = vadd.f32 %v4338_v21, %v4294_v18  ;;  %4621 = vmatprep.mubr.msk.f32.mxu1 %vm257_vm1, %v2619_v43  ;;  %4641 = vmatprep.mubr.msk.f32.mxu0 %vm257_vm1, %v5109_v12 }
  0xf9   : > { %v502_v55 = vpop.f32.mrf.mxu0  ;;  %v5571_v49 = vpop.f32.mrf.mxu1 }
  0xfb   : > { %v4306_v52 = vpop.f32.mrf.mxu0  ;;  %v4341_v54 = vpop.f32.mrf.mxu1  ;;  %4622 = vmatmul.mubr.msk.f32.gmra.mxu1 %vm257_vm1, %v2620_v20  ;;  %4642 = vmatmul.mubr.msk.f32.gmra.mxu0 %vm257_vm1, %v6350_v38 }
  0xfc   : > { %v5576_v14 = vadd.f32 %v4341_v54, %v4297_v0  ;;  %4644 = vmatprep.mubr.msk.f32.mxu0 %vm257_vm1, %v6351_v61 }
  0xfd   : > { %v512_v63 = vpop.f32.mrf.mxu0  ;;  %v774_v3 = vpop.f32.mrf.mxu1 }
  0xfe   : > { %v5580_v9 = vadd.f32 %v774_v3, %v482_v5 }
  0xff   : > { %v4344_v12 = vpop.f32.mrf.mxu1  ;;  %v4364_v18 = vpop.f32.mrf.mxu0  ;;  %4645 = vmatmul.mubr.msk.f32.gmra.mxu0 %vm257_vm1, %v5143_v25  ;;  %v6352_v25 = vld [vmem:[#allocation21_spill] sm:$0xff] }
 0x100   : > { %v5586_v7 = vadd.f32 %v4344_v12, %v4300_v8  ;;  %v5589_v0 = vadd.f32 %v4364_v18, %v5485_v36  ;;  %4647 = vmatprep.mubr.msk.f32.mxu0 %vm257_vm1, %v5146_v23 }
 0x101   : > { %v784_v2 = vpop.f32.mrf.mxu1  ;;  %v1026_v27 = vpop.f32.mrf.mxu0 }
 0x102   : > { %v5593_v5 = vadd.f32 %v784_v2, %v492_v58  ;;  %v5595_v56 = vadd.f32 %v1026_v27, %v705_v51 }
 0x103   : > { %v4347_v43 = vpop.f32.mrf.mxu1  ;;  %v4367_v21 = vpop.f32.mrf.mxu0  ;;  %4648 = vmatmul.mubr.msk.f32.gmra.mxu0 %vm257_vm1, %v6352_v25 }
 0x104   : > { %v5601_v59 = vadd.f32 %v4347_v43, %v4303_v13  ;;  %v5604_v36 = vadd.f32 %v4367_v21, %v5498_v40  ;;  %4650 = vmatprep.mubr.msk.f32.mxu0 %vm257_vm1, %v5160_v31 }
 0x105   : > { %v794_v23 = vpop.f32.mrf.mxu1  ;;  %v1036_v8 = vpop.f32.mrf.mxu0 }
 0x106   : > { %v5608_v58 = vadd.f32 %v794_v23, %v502_v55  ;;  %v5610_v53 = vadd.f32 %v1036_v8, %v715_v17 }
 0x107   : > { %v4350_v20 = vpop.f32.mrf.mxu1  ;;  %v4370_v54 = vpop.f32.mrf.mxu0  ;;  %4651 = vmatmul.mubr.msk.f32.gmra.mxu0 %vm257_vm1, %v5171_v33  ;;  %v735_v33 = vadd.f32 %v5534_v62, %v5491_v57 }
 0x108   : > { %v5616_v1 = vadd.f32 %v4350_v20, %v4306_v52  ;;  %v5619_v40 = vadd.f32 %v4370_v54, %v5512_v44  ;;  %4653 = vmatprep.mubr.msk.f32.mxu0 %vm257_vm1, %v6340_v29 }
 0x109   : > { %v804_v31 = vpop.f32.mrf.mxu1  ;;  %v1046_v13 = vpop.f32.mrf.mxu0 }
 0x10a   : > { %v5623_v55 = vadd.f32 %v804_v31, %v512_v63  ;;  %v5625_v38 = vadd.f32 %v1046_v13, %v725_v26 }
 0x10b   : > { %v4353_v61 = vpop.f32.mrf.mxu1  ;;  %v4373_v3 = vpop.f32.mrf.mxu0  ;;  %4654 = vmatmul.mubr.msk.f32.gmra.mxu0 %vm257_vm1, %v5185_v37  ;;  %v745_v37 = vadd.f32 %v5546_v11, %v5504_v42  ;;  %v2969_v11 = vld [vmem:[%s4744_s26 + $0xf2] sm:$0xff] }
 0x10c   : > { %v5632_v32 = vadd.f32 %v4353_v61, %v5438_v15  ;;  %v1172_v44 = vadd.f32 %v4373_v3, %v5526_v48  ;;  %4656 = vmatprep.mubr.msk.f32.mxu0 %vm257_vm1, %v5188_v39 }
 0x10d   : > { %v814_v29 = vpop.f32.mrf.mxu1  ;;  %v1056_v60 = vpop.f32.mrf.mxu0 }
 0x10e   : > { %v5638_v52 = vadd.f32 %v814_v29, %v5450_v19  ;;  %v1171_v63 = vadd.f32 %v1056_v60, %v735_v33 }
 0x10f   : > { %v4356_v12 = vpop.f32.mrf.mxu1  ;;  %v4376_v18 = vpop.f32.mrf.mxu0  ;;  %4657 = vmatmul.mubr.msk.f32.gmra.mxu0 %vm257_vm1, %v5199_v41 }
 0x110   : > { %v5645_v15 = vadd.f32 %v4356_v12, %v5452_v24  ;;  %v1174_v39 = vadd.f32 %v4376_v18, %v5540_v6  ;;  %4659 = vmatprep.mubr.msk.f32.mxu0 %vm257_vm1, %v5202_v35  ;;  %v755_v24 = vadd.f32 %v5558_v16, %v5518_v46 }
 0x111   : > { %v824_v19 = vpop.f32.mrf.mxu1  ;;  %v1066_v57 = vpop.f32.mrf.mxu0 }
 0x112   : > { %v5651_v48 = vadd.f32 %v824_v19, %v5464_v28  ;;  %v1173_v62 = vadd.f32 %v1066_v57, %v745_v37 }
 0x113   : > { %v4359_v51 = vpop.f32.mrf.mxu1  ;;  %v4379_v41 = vpop.f32.mrf.mxu0  ;;  %4660 = vmatmul.mubr.msk.f32.gmra.mxu0 %vm257_vm1, %v5213_v45 }
 0x114   : > { %v5658_v42 = vadd.f32 %v4359_v51, %v5466_v47  ;;  %v1176_v35 = vadd.f32 %v4379_v41, %v5552_v10  ;;  %4662 = vmatprep.mubr.msk.f32.mxu0 %vm257_vm1, %v5393_v22  ;;  %v765_v47 = vadd.f32 %v5571_v49, %v5532_v4  ;;  %v2970_v22 = vld [vmem:[%s4744_s26 + $0xfa] sm:$0xff] }
 0x115   : > { %v834_v28 = vpop.f32.mrf.mxu1  ;;  %v1076_v6 = vpop.f32.mrf.mxu0 }
 0x116   : > { %v5665_v2 = vadd.f32 %v834_v28, %v5478_v34  ;;  %v1175_v27 = vadd.f32 %v1076_v6, %v755_v24 }
 0x117   : > { %v4382_v45 = vpop.f32.mrf.mxu0  ;;  %v4408_v43 = vpop.f32.mrf.mxu1  ;;  %4663 = vmatmul.mubr.msk.f32.gmra.mxu0 %vm257_vm1, %v5404_v50 }
 0x118   : > { %v1178_v46 = vadd.f32 %v4382_v45, %v5565_v30  ;;  %v5673_v10 = vadd.f32 %v4408_v43, %v5589_v0  ;;  %4665 = vmatprep.mubr.msk.f32.mxu0 %vm257_vm1, %v2969_v11 }
 0x119   : > { %v1086_v16 = vpop.f32.mrf.mxu0  ;;  %v1376_v34 = vpop.f32.mrf.mxu1 }
 0x11a   : > { %v1177_v21 = vadd.f32 %v1086_v16, %v765_v47  ;;  %v5678_v25 = vadd.f32 %v1376_v34, %v5595_v56 }
 0x11b   : > { %v4385_v17 = vpop.f32.mrf.mxu0  ;;  %v4411_v23 = vpop.f32.mrf.mxu1  ;;  %4666 = vmatmul.mubr.msk.f32.gmra.mxu0 %vm257_vm1, %v2970_v22 }
 0x11c   : > { %v1180_v50 = vadd.f32 %v4385_v17, %v5576_v14  ;;  %v5683_v4 = vadd.f32 %v4411_v23, %v5604_v36 }
 0x11d   : > { %v1096_v30 = vpop.f32.mrf.mxu0  ;;  %v1386_v49 = vpop.f32.mrf.mxu1 }
 0x11e   : > { %v1179_v0 = vadd.f32 %v1096_v30, %v5580_v9  ;;  %v5687_v8 = vadd.f32 %v1386_v49, %v5610_v53 }
 0x11f   : > { %v4388_v20 = vpop.f32.mrf.mxu0  ;;  %v4414_v54 = vpop.f32.mrf.mxu1 }
 0x120   : > { %v1182_v56 = vadd.f32 %v4388_v20, %v5586_v7  ;;  %v5691_v26 = vadd.f32 %v4414_v54, %v5619_v40 }
 0x121   : > { %v1106_v31 = vpop.f32.mrf.mxu0  ;;  %v1396_v13 = vpop.f32.mrf.mxu1 }
 0x122   : > { %v1181_v14 = vadd.f32 %v1106_v31, %v5593_v5  ;;  %v5695_v36 = vadd.f32 %v1396_v13, %v5625_v38 }
 0x123   : > { %v4391_v61 = vpop.f32.mrf.mxu0  ;;  %v4417_v3 = vpop.f32.mrf.mxu1 }
 0x124   : > { %v1184_v9 = vadd.f32 %v4391_v61, %v5601_v59  ;;  %v5698_v53 = vadd.f32 %v4417_v3, %v1172_v44 }
 0x125   : > { %v1116_v33 = vpop.f32.mrf.mxu0  ;;  %v1406_v29 = vpop.f32.mrf.mxu1 }
 0x126   : > { %v1183_v7 = vadd.f32 %v1116_v33, %v5608_v58  ;;  %v5701_v60 = vadd.f32 %v1406_v29, %v1171_v63 }
 0x127   : > { %v4394_v40 = vpop.f32.mrf.mxu0  ;;  %v4420_v12 = vpop.f32.mrf.mxu1 }
 0x128   : > { %v1186_v18 = vadd.f32 %v4394_v40, %v5616_v1  ;;  %v5704_v5 = vadd.f32 %v4420_v12, %v1174_v39 }
 0x129   : > { %v1126_v38 = vpop.f32.mrf.mxu0  ;;  %v1416_v37 = vpop.f32.mrf.mxu1 }
 0x12a   : > { %v1185_v19 = vadd.f32 %v1126_v38, %v5623_v55  ;;  %v5707_v57 = vadd.f32 %v1416_v37, %v1173_v62 }
 0x12b   : > { %v4397_v59 = vpop.f32.mrf.mxu0  ;;  %v4423_v44 = vpop.f32.mrf.mxu1 }
 0x12c   : > { %v1188_v51 = vadd.f32 %v4397_v59, %v5632_v32  ;;  %v5710_v41 = vadd.f32 %v4423_v44, %v1176_v35 }
 0x12d   : > { %v1136_v58 = vpop.f32.mrf.mxu0  ;;  %v1426_v63 = vpop.f32.mrf.mxu1 }
 0x12e   : > { %v1187_v24 = vadd.f32 %v1136_v58, %v5638_v52  ;;  %v5713_v28 = vadd.f32 %v1426_v63, %v1175_v27 }
 0x12f   : > { %v4400_v1 = vpop.f32.mrf.mxu0  ;;  %v4426_v39 = vpop.f32.mrf.mxu1 }
 0x130   : > { %v1190_v6 = vadd.f32 %v4400_v1, %v5645_v15  ;;  %v5716_v11 = vadd.f32 %v4426_v39, %v1178_v46 }
 0x131   : > { %v1146_v55 = vpop.f32.mrf.mxu0  ;;  %v1436_v62 = vpop.f32.mrf.mxu1 }
 0x132   : > { %v1189_v45 = vadd.f32 %v1146_v55, %v5651_v48  ;;  %v5719_v43 = vadd.f32 %v1436_v62, %v1177_v21 }
 0x133   : > { %v4403_v32 = vpop.f32.mrf.mxu0  ;;  %v4429_v35 = vpop.f32.mrf.mxu1 }
 0x134   : > { %v1192_v47 = vadd.f32 %v4403_v32, %v5658_v42  ;;  %v5722_v22 = vadd.f32 %v4429_v35, %v1180_v50 }
 0x135   : > { %v1156_v52 = vpop.f32.mrf.mxu0  ;;  %v1446_v27 = vpop.f32.mrf.mxu1 }
 0x136   : > { %v1191_v16 = vadd.f32 %v1156_v52, %v5665_v2  ;;  %v5725_v34 = vadd.f32 %v1446_v27, %v1179_v0 }
 0x137   : > { %v4432_v15 = vpop.f32.mrf.mxu1  ;;  %v4452_v46 = vpop.f32.mrf.mxu0 }
 0x138   : > { %v5727_v17 = vadd.f32 %v4432_v15, %v1182_v56  ;;  %v1866_v48 = vadd.f32 %v4452_v46, %v5673_v10 }
 0x139   : > { %v1456_v21 = vpop.f32.mrf.mxu1  ;;  %v1726_v23 = vpop.f32.mrf.mxu0 }
 0x13a   : > { %v5730_v30 = vadd.f32 %v1456_v21, %v1181_v14  ;;  %v1865_v42 = vadd.f32 %v1726_v23, %v5678_v25 }
 0x13b   : > { %v4435_v50 = vpop.f32.mrf.mxu1  ;;  %v4455_v49 = vpop.f32.mrf.mxu0 }
 0x13c   : > { %v5733_v20 = vadd.f32 %v4435_v50, %v1184_v9  ;;  %v1868_v2 = vadd.f32 %v4455_v49, %v5683_v4 }
 0x13d   : > { %v1466_v0 = vpop.f32.mrf.mxu1  ;;  %v1736_v54 = vpop.f32.mrf.mxu0 }
 0x13e   : > { %v5736_v31 = vadd.f32 %v1466_v0, %v1183_v7  ;;  %v1867_v56 = vadd.f32 %v1736_v54, %v5687_v8 }
 0x13f   : > { %v4438_v13 = vpop.f32.mrf.mxu1  ;;  %v4458_v10 = vpop.f32.mrf.mxu0 }
 0x140   : > { %v5739_v61 = vadd.f32 %v4438_v13, %v1186_v18  ;;  %v1870_v14 = vadd.f32 %v4458_v10, %v5691_v26 }
 0x141   : > { %v1476_v3 = vpop.f32.mrf.mxu1  ;;  %v1746_v25 = vpop.f32.mrf.mxu0 }
 0x142   : > { %v5742_v33 = vadd.f32 %v1476_v3, %v1185_v19  ;;  %v1869_v9 = vadd.f32 %v1746_v25, %v5695_v36 }
 0x143   : > { %v4441_v29 = vpop.f32.mrf.mxu1  ;;  %v4461_v4 = vpop.f32.mrf.mxu0 }
 0x144   : > { %v5745_v40 = vadd.f32 %v4441_v29, %v1188_v51  ;;  %v1872_v7 = vadd.f32 %v4461_v4, %v5698_v53 }
 0x145   : > { %v1486_v12 = vpop.f32.mrf.mxu1  ;;  %v1756_v8 = vpop.f32.mrf.mxu0 }
 0x146   : > { %v5748_v38 = vadd.f32 %v1486_v12, %v1187_v24  ;;  %v1871_v18 = vadd.f32 %v1756_v8, %v5701_v60 }
 0x147   : > { %v4444_v37 = vpop.f32.mrf.mxu1  ;;  %v4464_v26 = vpop.f32.mrf.mxu0 }
 0x148   : > { %v5751_v59 = vadd.f32 %v4444_v37, %v1190_v6  ;;  %v1874_v19 = vadd.f32 %v4464_v26, %v5704_v5 }
 0x149   : > { %v1496_v44 = vpop.f32.mrf.mxu1  ;;  %v1766_v36 = vpop.f32.mrf.mxu0 }
 0x14a   : > { %v5754_v58 = vadd.f32 %v1496_v44, %v1189_v45  ;;  %v1873_v51 = vadd.f32 %v1766_v36, %v5707_v57 }
 0x14b   : > { %v4447_v63 = vpop.f32.mrf.mxu1  ;;  %v4467_v53 = vpop.f32.mrf.mxu0 }
 0x14c   : > { %v5757_v1 = vadd.f32 %v4447_v63, %v1192_v47  ;;  %v1876_v24 = vadd.f32 %v4467_v53, %v5710_v41 }
 0x14d   : > { %v1506_v39 = vpop.f32.mrf.mxu1  ;;  %v1776_v60 = vpop.f32.mrf.mxu0 }
 0x14e   : > { %v5760_v55 = vadd.f32 %v1506_v39, %v1191_v16  ;;  %v1875_v6 = vadd.f32 %v1776_v60, %v5713_v28 }
 0x14f   : > { %v4470_v62 = vpop.f32.mrf.mxu0  ;;  %v4496_v5 = vpop.f32.mrf.mxu1 }
 0x150   : > { %v1878_v32 = vadd.f32 %v4470_v62, %v5716_v11  ;;  %v5764_v45 = vadd.f32 %v4496_v5, %v1866_v48 }
 0x151   : > { %v1786_v35 = vpop.f32.mrf.mxu0  ;;  %v2076_v57 = vpop.f32.mrf.mxu1 }
 0x152   : > { %v1877_v52 = vadd.f32 %v1786_v35, %v5719_v43  ;;  %v2215_v47 = vadd.f32 %v2076_v57, %v1865_v42 }
 0x153   : > { %v4473_v27 = vpop.f32.mrf.mxu0  ;;  %v4499_v15 = vpop.f32.mrf.mxu1 }
 0x154   : > { %v5768_v41 = vadd.f32 %v4473_v27, %v5722_v22  ;;  %v2218_v16 = vadd.f32 %v4499_v15, %v1868_v2 }
 0x155   : > { %v1796_v46 = vpop.f32.mrf.mxu0  ;;  %v2086_v21 = vpop.f32.mrf.mxu1 }
 0x156   : > { %v5771_v28 = vadd.f32 %v1796_v46, %v5725_v34  ;;  %v2217_v23 = vadd.f32 %v2086_v21, %v1867_v56  ;;  %v6309_v34 = vmov 0.0  }
 0x157   : > { %v4476_v11 = vpop.f32.mrf.mxu0  ;;  %v4502_v48 = vpop.f32.mrf.mxu1  ;;  %3561 = vmatprep.subr.mxu1 %v6309_v34 }
 0x158   : > { %v5774_v50 = vadd.f32 %v4476_v11, %v5727_v17  ;;  %v2220_v49 = vadd.f32 %v4502_v48, %v1870_v14 }
 0x159   : > { %v1806_v43 = vpop.f32.mrf.mxu0  ;;  %v2096_v42 = vpop.f32.mrf.mxu1 }
 0x15a   : > { %v5777_v0 = vadd.f32 %v1806_v43, %v5730_v30  ;;  %v2219_v22 = vadd.f32 %v2096_v42, %v1869_v9 }
 0x15b   : > { %v4479_v54 = vpop.f32.mrf.mxu0  ;;  %v4505_v2 = vpop.f32.mrf.mxu1 }
 0x15c   : > { %v1884_v13 = vadd.f32 %v4479_v54, %v5733_v20  ;;  %v2222_v10 = vadd.f32 %v4505_v2, %v1872_v7 }
 0x15d   : > { %v1816_v56 = vpop.f32.mrf.mxu0  ;;  %v2106_v3 = vpop.f32.mrf.mxu1 }
 0x15e   : > { %v5782_v17 = vadd.f32 %v1816_v56, %v5736_v31  ;;  %v2221_v14 = vadd.f32 %v2106_v3, %v1871_v18 }
 0x15f   : > { %v4482_v25 = vpop.f32.mrf.mxu0  ;;  %v4508_v29 = vpop.f32.mrf.mxu1 }
 0x160   : > { %v1886_v30 = vadd.f32 %v4482_v25, %v5739_v61  ;;  %v2224_v4 = vadd.f32 %v4508_v29, %v1874_v19 }
 0x161   : > { %v1826_v9 = vpop.f32.mrf.mxu0  ;;  %v2116_v12 = vpop.f32.mrf.mxu1 }
 0x162   : > { %v1885_v8 = vadd.f32 %v1826_v9, %v5742_v33  ;;  %v2223_v20 = vadd.f32 %v2116_v12, %v1873_v51 }
 0x163   : > { %v4485_v7 = vpop.f32.mrf.mxu0  ;;  %v4511_v37 = vpop.f32.mrf.mxu1 }
 0x164   : > { %v1888_v26 = vadd.f32 %v4485_v7, %v5745_v40  ;;  %v2226_v44 = vadd.f32 %v4511_v37, %v1876_v24 }
 0x165   : > { %v1836_v36 = vpop.f32.mrf.mxu0  ;;  %v2126_v63 = vpop.f32.mrf.mxu1 }
 0x166   : > { %v1887_v31 = vadd.f32 %v1836_v36, %v5748_v38  ;;  %v2225_v18 = vadd.f32 %v2126_v63, %v1875_v6 }
 0x167   : > { %v4488_v53 = vpop.f32.mrf.mxu0  ;;  %v4514_v39 = vpop.f32.mrf.mxu1 }
 0x168   : > { %v1890_v61 = vadd.f32 %v4488_v53, %v5751_v59  ;;  %v2228_v19 = vadd.f32 %v4514_v39, %v1878_v32 }
 0x169   : > { %v1846_v60 = vpop.f32.mrf.mxu0  ;;  %v2136_v62 = vpop.f32.mrf.mxu1 }
 0x16a   : > { %v1889_v33 = vadd.f32 %v1846_v60, %v5754_v58  ;;  %v2227_v51 = vadd.f32 %v2136_v62, %v1877_v52 }
 0x16b   : > { %v4491_v5 = vpop.f32.mrf.mxu0  ;;  %v5790_v35 = vpop.f32.mrf.mxu1 }
 0x16c   : > { %v1892_v40 = vadd.f32 %v4491_v5, %v5757_v1 }
 0x16d   : > { %v1856_v24 = vpop.f32.mrf.mxu0  ;;  %v5793_v57 = vpop.f32.mrf.mxu1 }
 0x16e   : > { %v1891_v38 = vadd.f32 %v1856_v24, %v5760_v55 }
 0x16f   : > { %v5796_v6 = vpop.f32.mrf.mxu1  ;;  %v4540_v27 = vpop.f32.mrf.mxu0 }
 0x170   : > { %v2566_v59 = vadd.f32 %v4540_v27, %v5764_v45 }
 0x171   : > { %v5799_v32 = vpop.f32.mrf.mxu1  ;;  %v2426_v15 = vpop.f32.mrf.mxu0 }
 0x172   : > { %v2565_v58 = vadd.f32 %v2426_v15, %v2215_v47 }
 0x173   : > { %v4523_v52 = vpop.f32.mrf.mxu1  ;;  %v4543_v46 = vpop.f32.mrf.mxu0 }
 0x174   : > { %v2234_v21 = vadd.f32 %v4523_v52, %v1884_v13  ;;  %v5801_v11 = vadd.f32 %v4543_v46, %v2218_v16 }
 0x175   : > { %v5803_v1 = vpop.f32.mrf.mxu1  ;;  %v2436_v48 = vpop.f32.mrf.mxu0 }
 0x176   : > { %v5805_v43 = vadd.f32 %v2436_v48, %v2217_v23 }
 0x177   : > { %v4526_v55 = vpop.f32.mrf.mxu1  ;;  %v4546_v42 = vpop.f32.mrf.mxu0 }
 0x178   : > { %v2236_v54 = vadd.f32 %v4526_v55, %v1886_v30  ;;  %v5807_v2 = vadd.f32 %v4546_v42, %v2220_v49 }
 0x179   : > { %v2176_v45 = vpop.f32.mrf.mxu1  ;;  %v2446_v56 = vpop.f32.mrf.mxu0 }
 0x17a   : > { %v2235_v3 = vadd.f32 %v2176_v45, %v1885_v8  ;;  %v5809_v25 = vadd.f32 %v2446_v56, %v2219_v22 }
 0x17b   : > { %v4529_v47 = vpop.f32.mrf.mxu1  ;;  %v4549_v29 = vpop.f32.mrf.mxu0 }
 0x17c   : > { %v2238_v13 = vadd.f32 %v4529_v47, %v1888_v26  ;;  %v5811_v16 = vadd.f32 %v4549_v29, %v2222_v10 }
 0x17d   : > { %v2186_v9 = vpop.f32.mrf.mxu1  ;;  %v2456_v12 = vpop.f32.mrf.mxu0 }
 0x17e   : > { %v2237_v7 = vadd.f32 %v2186_v9, %v1887_v31  ;;  %v5813_v23 = vadd.f32 %v2456_v12, %v2221_v14 }
 0x17f   : > { %v4532_v37 = vpop.f32.mrf.mxu1  ;;  %v4552_v36 = vpop.f32.mrf.mxu0 }
 0x180   : > { %v2240_v30 = vadd.f32 %v4532_v37, %v1890_v61  ;;  %v5815_v49 = vadd.f32 %v4552_v36, %v2224_v4 }
 0x181   : > { %v2196_v63 = vpop.f32.mrf.mxu1  ;;  %v2466_v53 = vpop.f32.mrf.mxu0 }
 0x182   : > { %v2239_v8 = vadd.f32 %v2196_v63, %v1889_v33  ;;  %v5817_v22 = vadd.f32 %v2466_v53, %v2223_v20 }
 0x183   : > { %v4535_v39 = vpop.f32.mrf.mxu1  ;;  %v4555_v60 = vpop.f32.mrf.mxu0 }
 0x184   : > { %v2242_v26 = vadd.f32 %v4535_v39, %v1892_v40  ;;  %v5819_v10 = vadd.f32 %v4555_v60, %v2226_v44 }
 0x185   : > { %v2206_v62 = vpop.f32.mrf.mxu1  ;;  %v2476_v5 = vpop.f32.mrf.mxu0 }
 0x186   : > { %v2241_v31 = vadd.f32 %v2206_v62, %v1891_v38  ;;  %v5821_v14 = vadd.f32 %v2476_v5, %v2225_v18 }
 0x187   : > { %v4558_v24 = vpop.f32.mrf.mxu0  ;;  %v4584_v27 = vpop.f32.mrf.mxu1 }
 0x188   : > { %v5823_v61 = vadd.f32 %v4558_v24, %v2228_v19  ;;  %v2916_v4 = vadd.f32 %v4584_v27, %v2566_v59  ;;  %v3523_v19 = vld [vmem:[%s6280_s3 + $0x8] sm:$0xff] }
 0x189   : > { %v2486_v15 = vpop.f32.mrf.mxu0  ;;  %v2776_v52 = vpop.f32.mrf.mxu1  ;;  %4002 = vmatprep.mubr.msk.f32.mxu1 %vm3536_vm2, %v3523_v19 }
 0x18a   : > { %v5825_v33 = vadd.f32 %v2486_v15, %v2227_v51  ;;  %v2915_v20 = vadd.f32 %v2776_v52, %v2565_v58 }
 0x18b   : > { %v5827_v46 = vpop.f32.mrf.mxu0  ;;  %v4587_v40 = vpop.f32.mrf.mxu1 }
 0x18d   : > { %v5829_v44 = vpop.f32.mrf.mxu0  ;;  %v2786_v48 = vpop.f32.mrf.mxu1 }
 0x18e   : > { %v2917_v34 = vadd.f32 %v2786_v48, %v5805_v43  ;;  %v2232_v43 = vadd.f32 %v5796_v6, %v5774_v50 }
 0x18f   : > { %v5831_v55 = vpop.f32.mrf.mxu0  ;;  %v4590_v18 = vpop.f32.mrf.mxu1 }
 0x191   : > { %v5837_v38 = vpop.f32.mrf.mxu0  ;;  %v2796_v51 = vpop.f32.mrf.mxu1 }
 0x193   : > { %v4567_v59 = vpop.f32.mrf.mxu0  ;;  %v4593_v58 = vpop.f32.mrf.mxu1 }
 0x194   : > { %v5839_v42 = vadd.f32 %v4567_v59, %v2234_v21 }
 0x195   : > { %v5841_v45 = vpop.f32.mrf.mxu0  ;;  %v5843_v56 = vpop.f32.mrf.mxu1 }
 0x197   : > { %v4570_v47 = vpop.f32.mrf.mxu0  ;;  %v5845_v29 = vpop.f32.mrf.mxu1 }
 0x198   : > { %v5847_v9 = vadd.f32 %v4570_v47, %v2236_v54 }
 0x199   : > { %v2526_v12 = vpop.f32.mrf.mxu0  ;;  %v5849_v37 = vpop.f32.mrf.mxu1 }
 0x19a   : > { %v5851_v36 = vadd.f32 %v2526_v12, %v2235_v3  ;;  %v5878_v12 = vld [vmem:[%s6279_s2] ss:$0 sm:$0xff] }
 0x19b   : > { %v4573_v63 = vpop.f32.mrf.mxu0  ;;  %v5853_v53 = vpop.f32.mrf.mxu1 }
 0x19c   : > { %v5855_v39 = vadd.f32 %v4573_v63, %v2238_v13 }
 0x19d   : > { %v2536_v21 = vpop.f32.mrf.mxu0  ;;  %v5857_v60 = vpop.f32.mrf.mxu1 }
 0x19e   : > { %v5859_v62 = vadd.f32 %v2536_v21, %v2237_v7 }
 0x19f   : > { %v4576_v5 = vpop.f32.mrf.mxu0  ;;  %v5861_v24 = vpop.f32.mrf.mxu1 }
 0x1a0   : > { %v5863_v54 = vadd.f32 %v4576_v5, %v2240_v30 }
 0x1a1   : > { %v2546_v27 = vpop.f32.mrf.mxu0  ;;  %v5867_v3 = vpop.f32.mrf.mxu1 }
 0x1a2   : > { %v5865_v15 = vadd.f32 %v2546_v27, %v2239_v8  ;;  %v2918_v8 = vadd.f32 %v4587_v40, %v5801_v11 }
 0x1a3   : > { %v4579_v52 = vpop.f32.mrf.mxu0  ;;  %v5871_v59 = vpop.f32.mrf.mxu1 }
 0x1a4   : > { %v5869_v19 = vadd.f32 %v4579_v52, %v2242_v26 }
 0x1a5   : > { %v2556_v13 = vpop.f32.mrf.mxu0  ;;  %v5881_v21 = vpop.f32.mrf.mxu1 }
 0x1a6   : > { %v5873_v47 = vadd.f32 %v2556_v13, %v2241_v31 }
 0x1a7   : > { %v4628_v7 = vpop.f32.mrf.mxu0 }
 0x1a8   : > { %6353 = vst [vmem:[#allocation2_spill] sm:$0xff] %v5873_v47  ;;  %v3266_v30 = vadd.f32 %v4628_v7, %v2916_v4  ;;  %v2920_v4 = vadd.f32 %v4590_v18, %v5807_v2  ;;  %v5890_v7 = vpop.f32.mrf.mxu1 }
 0x1a9   : > { %v3126_v63 = vpop.f32.mrf.mxu0 }
 0x1aa   : > { %v5884_v26 = vadd.f32 %v5878_v12, %v3266_v30  ;;  %v3265_v5 = vadd.f32 %v3126_v63, %v2915_v20  ;;  %v2230_v20 = vadd.f32 %v5790_v35, %v5768_v41  ;;  %v2229_v30 = vadd.f32 %v5793_v57, %v5771_v28  ;;  %v5909_v57 = vpop.f32.mrf.mxu1 }
 0x1ab   : > { %v4631_v27 = vpop.f32.mrf.mxu0  ;;  %v2233_v28 = vadd.f32 %v5803_v1, %v5782_v17  ;;  %v5920_v17 = vadd.f32 %v5831_v55, %v2232_v43  ;;  %v2921_v1 = vadd.f32 %v5843_v56, %v5813_v23  ;;  %v2924_v56 = vadd.f32 %v5845_v29, %v5815_v49 }
 0x1ac   : > { %v3329_v31 = vmax.f32 %v5884_v26, 0.0  ;;  %v3300_v52 = vadd.f32 %v5878_v12, %v3265_v5  ;;  %v3268_v13 = vadd.f32 %v4631_v27, %v2918_v8  ;;  %v2231_v26 = vadd.f32 %v5799_v32, %v5777_v0 }
 0x1ad   : > { %v3136_v47 = vpop.f32.mrf.mxu0  ;;  %v2919_v5 = vadd.f32 %v2796_v51, %v5809_v25  ;;  %v2580_v0 = vadd.f32 %v5827_v46, %v2230_v20  ;;  %v5930_v20 = vadd.f32 %v5841_v45, %v2233_v28  ;;  %v2926_v29 = vadd.f32 %v5853_v53, %v5819_v10 }
 0x1ae   : > { %v3328_v11 = vmax.f32 %v3300_v52, 0.0  ;;  %v5893_v40 = vadd.f32 %v5878_v12, %v3268_v13  ;;  %v3267_v63 = vadd.f32 %v3136_v47, %v2917_v34  ;;  %v3386_v48 = vrot.slane %v3329_v31, 1 }
 0x1af   : > { %v4634_v8 = vpop.f32.mrf.mxu0  ;;  %v2922_v34 = vadd.f32 %v4593_v58, %v5811_v16  ;;  %v2579_v52 = vadd.f32 %v5829_v44, %v2229_v30  ;;  %v5932_v44 = vpop.f32.mrf.mxu1 }
 0x1b0   : > { %v3385_v2 = vrot.slane %v3328_v11, 1  ;;  %v3270_v18 = vadd.f32 %v4634_v8, %v2920_v4  ;;  %v3331_v27 = vmax.f32 %v5893_v40, 0.0  ;;  %v3302_v41 = vadd.f32 %v5878_v12, %v3267_v63 }
 0x1b1   : > { %v3146_v35 = vpop.f32.mrf.mxu0  ;;  %v5927_v40 = vadd.f32 %v5837_v38, %v2231_v26  ;;  %v2923_v38 = vadd.f32 %v5849_v37, %v5817_v22  ;;  %v5953_v28 = vpop.f32.mrf.mxu1 }
 0x1b2   : > { %v3387_v50 = vsel %vm3384_vm3, %v3385_v2, %v3386_v48  ;;  %v5913_v6 = vadd.f32 %v5878_v12, %v3270_v18  ;;  %v3330_v25 = vmax.f32 %v3302_v41, 0.0  ;;  %v3269_v51 = vadd.f32 %v3146_v35, %v2919_v5 }
 0x1b3   : > { %v5916_v32 = vmax.f32 %v3328_v11, %v3387_v50  ;;  %v4637_v47 = vpop.f32.mrf.mxu0  ;;  %v3390_v58 = vrot.slane %v3331_v27, 1 }
 0x1b4   : > { %v3272_v16 = vadd.f32 %v4637_v47, %v2922_v34  ;;  %v3388_v13 = vrot.slane %v3330_v25, 1  ;;  %v3333_v4 = vmax.f32 %v5913_v6, 0.0  ;;  %v3304_v46 = vadd.f32 %v5878_v12, %v3269_v51 }
 0x1b5   : > { %v3156_v11 = vpop.f32.mrf.mxu0 }
 0x1b6   : > { %v5935_v55 = vadd.f32 %v5878_v12, %v3272_v16  ;;  %v3271_v23 = vadd.f32 %v3156_v11, %v2921_v1  ;;  %v3389_v30 = vsel %vm3384_vm3, %v3386_v48, %v3388_v13  ;;  %v3391_v63 = vsel %vm3384_vm3, %v3388_v13, %v3390_v58  ;;  %v5972_v13 = vpop.f32.mrf.mxu1 }
 0x1b7   : > { %v3332_v8 = vmax.f32 %v3304_v46, 0.0  ;;  %v4640_v43 = vpop.f32.mrf.mxu0  ;;  %v5943_v45 = vmax.f32 %v3330_v25, %v3391_v63  ;;  %v3394_v26 = vrot.slane %v3333_v4, 1  ;;  %v5947_v49 = vmax.f32 %v3329_v31, %v3389_v30 }
 0x1b8   : > { %v3335_v2 = vmax.f32 %v5935_v55, 0.0  ;;  %v3306_v18 = vadd.f32 %v5878_v12, %v3271_v23  ;;  %v3274_v41 = vadd.f32 %v4640_v43, %v2924_v56  ;;  %v2925_v48 = vadd.f32 %v5857_v60, %v5821_v14 }
 0x1b9   : > { %v3392_v5 = vrot.slane %v3332_v8, 1  ;;  %v3166_v35 = vpop.f32.mrf.mxu0  ;;  %v3496_v22 = vmax.f32 %v5916_v32, %v5943_v45  ;;  %v2928_v60 = vadd.f32 %v5861_v24, %v5823_v61  ;;  %v2927_v61 = vadd.f32 %v5867_v3, %v5825_v33  ;;  %v5993_v3 = vpop.f32.mrf.mxu1  ;;  %v3522_v32 = vld [vmem:[%s6280_s3] sm:$0xff] }
 0x1ba   : > { %v3334_v37 = vmax.f32 %v3306_v18, 0.0  ;;  %v5960_v6 = vadd.f32 %v5878_v12, %v3274_v41  ;;  %v3273_v31 = vadd.f32 %v3166_v35, %v2923_v38  ;;  %v3398_v10 = vrot.slane %v3335_v2, 1 }
 0x1bb   : > { %v3393_v34 = vsel %vm3384_vm3, %v3390_v58, %v3392_v5  ;;  %v3395_v50 = vsel %vm3384_vm3, %v3392_v5, %v3394_v26  ;;  %v4643_v25 = vpop.f32.mrf.mxu0  ;;  %v2930_v24 = vadd.f32 %v5871_v59, %v2580_v0 }
 0x1bc   : > { %v5962_v51 = vmax.f32 %v3332_v8, %v3395_v50  ;;  %v3396_v14 = vrot.slane %v3334_v37, 1  ;;  %v3276_v53 = vadd.f32 %v4643_v25, %v2926_v29  ;;  %v3337_v47 = vmax.f32 %v5960_v6, 0.0 }
 0x1bd   : > { %v3308_v1 = vadd.f32 %v5878_v12, %v3273_v31  ;;  %v3176_v16 = vpop.f32.mrf.mxu0  ;;  %v5970_v58 = vmax.f32 %v3331_v27, %v3393_v34  ;;  %v2929_v8 = vadd.f32 %v5881_v21, %v2579_v52 }
 0x1be   : > { %v3498_v46 = vmax.f32 %v5943_v45, %v5962_v51  ;;  %v3397_v11 = vsel %vm3384_vm3, %v3394_v26, %v3396_v14  ;;  %v3399_v23 = vsel %vm3384_vm3, %v3396_v14, %v3398_v10  ;;  %v5979_v56 = vadd.f32 %v5878_v12, %v3276_v53  ;;  %v3525_v45 = vld [vmem:[%s6280_s3 + $0x18] sm:$0xff] }
 0x1bf   : > { %v5984_v30 = vmax.f32 %v3334_v37, %v3399_v23  ;;  %v3336_v27 = vmax.f32 %v3308_v1, 0.0  ;;  %v4646_v63 = vpop.f32.mrf.mxu0  ;;  %v3275_v43 = vadd.f32 %v3176_v16, %v2925_v48  ;;  %v5987_v18 = vmax.f32 %v3333_v4, %v3397_v11 }
 0x1c0   : > { %v3278_v38 = vadd.f32 %v4646_v63, %v2928_v60  ;;  %v3402_v5 = vrot.slane %v3337_v47, 1  ;;  %v3497_v33 = vmax.f32 %v5947_v49, %v5970_v58  ;;  %v3339_v59 = vmax.f32 %v5979_v56, 0.0  ;;  %v4617_v60 = vpop.f32.mrf.mxu1 }
 0x1c1   : > { %v3500_v26 = vmax.f32 %v5962_v51, %v5984_v30  ;;  %v3400_v41 = vrot.slane %v3336_v27, 1  ;;  %v3186_v35 = vpop.f32.mrf.mxu0  ;;  %v3310_v0 = vadd.f32 %v5878_v12, %v3275_v43  ;;  %v2932_v4 = vadd.f32 %v5890_v7, %v5920_v17  ;;  %v3527_v51 = vld [vmem:[%s6280_s3 + $0x28] sm:$0xff] }
 0x1c2   : > { %v5998_v21 = vadd.f32 %v5878_v12, %v3278_v38  ;;  %v3277_v52 = vadd.f32 %v3186_v35, %v2927_v61  ;;  %v3499_v34 = vmax.f32 %v5970_v58, %v5987_v18  ;;  %v2931_v14 = vadd.f32 %v5909_v57, %v5927_v40  ;;  %v3526_v58 = vld [vmem:[%s6280_s3 + $0x20] sm:$0xff] }
 0x1c3   : > { %v3401_v29 = vsel %vm3384_vm3, %v3398_v10, %v3400_v41  ;;  %v3403_v48 = vsel %vm3384_vm3, %v3400_v41, %v3402_v5  ;;  %v4649_v37 = vpop.f32.mrf.mxu0  ;;  %v3338_v6 = vmax.f32 %v3310_v0, 0.0  ;;  %v2934_v7 = vadd.f32 %v5932_v44, %v5839_v42 }
 0x1c4   : > { %v6006_v50 = vmax.f32 %v3336_v27, %v3403_v48  ;;  %v3341_v31 = vmax.f32 %v5998_v21, 0.0  ;;  %v3312_v25 = vadd.f32 %v5878_v12, %v3277_v52  ;;  %v3280_v17 = vadd.f32 %v4649_v37, %v2930_v24 }
 0x1c5   : > { %v3196_v10 = vpop.f32.mrf.mxu0  ;;  %v6016_v53 = vmax.f32 %v3335_v2, %v3401_v29  ;;  %v3406_v16 = vrot.slane %v3339_v59, 1  ;;  %v3404_v11 = vrot.slane %v3338_v6, 1 }
 0x1c6   : > { %v3502_v1 = vmax.f32 %v5984_v30, %v6006_v50  ;;  %v3340_v23 = vmax.f32 %v3312_v25, 0.0  ;;  %v3410_v56 = vrot.slane %v3341_v31, 1  ;;  %v6023_v57 = vadd.f32 %v5878_v12, %v3280_v17  ;;  %v3528_v30 = vld [vmem:[%s6280_s3 + $0x30] sm:$0xff] }
 0x1c7   : > { %v3279_v42 = vadd.f32 %v3196_v10, %v2929_v8  ;;  %v4652_v40 = vpop.f32.mrf.mxu0  ;;  %v3501_v44 = vmax.f32 %v5987_v18, %v6016_v53  ;;  %v3405_v55 = vsel %vm3384_vm3, %v3402_v5, %v3404_v11  ;;  %v3407_v2 = vsel %vm3384_vm3, %v3404_v11, %v3406_v16  ;;  %v2886_v8 = vpop.f32.mrf.mxu1  ;;  %v3531_v18 = vld [vmem:[%s6280_s3 + $0x48] sm:$0xff] }
 0x1c8   : > { %v3408_v61 = vrot.slane %v3340_v23, 1  ;;  %v3282_v24 = vadd.f32 %v4652_v40, %v2932_v4  ;;  %v6029_v27 = vmax.f32 %v3338_v6, %v3407_v2  ;;  %v3343_v63 = vmax.f32 %v6023_v57, 0.0 }
 0x1c9   : > { %v3314_v43 = vadd.f32 %v5878_v12, %v3279_v42  ;;  %v3206_v38 = vpop.f32.mrf.mxu0  ;;  %v6033_v41 = vmax.f32 %v3337_v47, %v3405_v55  ;;  %v2933_v4 = vadd.f32 %v5953_v28, %v5930_v20  ;;  %v4620_v57 = vpop.f32.mrf.mxu1 }
 0x1ca   : > { %v3409_v35 = vsel %vm3384_vm3, %v3406_v16, %v3408_v61  ;;  %v3411_v0 = vsel %vm3384_vm3, %v3408_v61, %v3410_v56  ;;  %v6038_v5 = vadd.f32 %v5878_v12, %v3282_v24  ;;  %v3281_v52 = vadd.f32 %v3206_v38, %v2931_v14 }
 0x1cb   : > { %v3504_v29 = vmax.f32 %v6006_v50, %v6029_v27  ;;  %v6044_v48 = vmax.f32 %v3340_v23, %v3411_v0  ;;  %v3342_v37 = vmax.f32 %v3314_v43, 0.0  ;;  %v4655_v47 = vpop.f32.mrf.mxu0  ;;  %v6048_v10 = vmax.f32 %v3339_v59, %v3409_v35  ;;  %v3535_v50 = vld [vmem:[%s6280_s3 + $0x68] sm:$0xff] }
 0x1cc   : > { %v3345_v6 = vmax.f32 %v6038_v5, 0.0  ;;  %v3316_v25 = vadd.f32 %v5878_v12, %v3281_v52  ;;  %v3284_v17 = vadd.f32 %v4655_v47, %v2934_v7  ;;  %v3414_v16 = vrot.slane %v3343_v63, 1 }
 0x1cd   : > { %v3506_v14 = vmax.f32 %v6029_v27, %v6044_v48  ;;  %v3412_v11 = vrot.slane %v3342_v37, 1  ;;  %v3216_v20 = vpop.f32.mrf.mxu0  ;;  %v3503_v28 = vmax.f32 %v6016_v53, %v6033_v41  ;;  %v2936_v23 = vadd.f32 %v5972_v13, %v5847_v9  ;;  %v3534_v53 = vld [vmem:[%s6280_s3 + $0x60] sm:$0xff] }
 0x1ce   : > { %v3344_v42 = vmax.f32 %v3316_v25, 0.0  ;;  %v6057_v40 = vadd.f32 %v5878_v12, %v3284_v17  ;;  %v3283_v7 = vadd.f32 %v3216_v20, %v2933_v4  ;;  %v3418_v2 = vrot.slane %v3345_v6, 1 }
 0x1cf   : > { %v3413_v59 = vsel %vm3384_vm3, %v3410_v56, %v3412_v11  ;;  %v3415_v55 = vsel %vm3384_vm3, %v3412_v11, %v3414_v16  ;;  %v4658_v61 = vpop.f32.mrf.mxu0  ;;  %v3505_v24 = vmax.f32 %v6033_v41, %v6048_v10  ;;  %v2935_v35 = vadd.f32 %v5993_v3, %v5851_v36 }
 0x1d0   : > { %v6065_v43 = vmax.f32 %v3342_v37, %v3415_v55  ;;  %v3416_v9 = vrot.slane %v3344_v42, 1  ;;  %v3347_v13 = vmax.f32 %v6057_v40, 0.0  ;;  %v3318_v38 = vadd.f32 %v5878_v12, %v3283_v7  ;;  %v2896_v37 = vpop.f32.mrf.mxu1 }
 0x1d1   : > { %v2938_v56 = vadd.f32 %v4617_v60, %v5855_v39  ;;  %v3286_v0 = vadd.f32 %v4658_v61, %v2936_v23  ;;  %v3226_v52 = vpop.f32.mrf.mxu0  ;;  %v6074_v4 = vmax.f32 %v3341_v31, %v3413_v59  ;;  %v2937_v47 = vadd.f32 %v2886_v8, %v5859_v62 }
 0x1d2   : > { %v3508_v25 = vmax.f32 %v6044_v48, %v6065_v43  ;;  %v3417_v17 = vsel %vm3384_vm3, %v3414_v16, %v3416_v9  ;;  %v3419_v11 = vsel %vm3384_vm3, %v3416_v9, %v3418_v2  ;;  %v3346_v36 = vmax.f32 %v3318_v38, 0.0  ;;  %v4623_v61 = vpop.f32.mrf.mxu1 }
 0x1d3   : > { %v6081_v20 = vmax.f32 %v3344_v42, %v3419_v11  ;;  %v3321_v39 = vadd.f32 %v5878_v12, %v3286_v0  ;;  %v3285_v3 = vadd.f32 %v3226_v52, %v2935_v35  ;;  %v4661_v60 = vpop.f32.mrf.mxu0  ;;  %v3422_v21 = vrot.slane %v3347_v13, 1 }
 0x1d4   : > { %v3288_v31 = vadd.f32 %v4661_v60, %v2938_v56  ;;  %v3483_v62 = vmax.f32 %v3343_v63, %v3417_v17  ;;  %v3507_v8 = vmax.f32 %v6048_v10, %v6074_v4  ;;  %v3420_v23 = vrot.slane %v3346_v36, 1 }
 0x1d5   : > { %v3510_v16 = vmax.f32 %v6065_v43, %v6081_v20  ;;  %v3349_v7 = vmax.f32 %v3321_v39, 0.0  ;;  %v3320_v42 = vadd.f32 %v5878_v12, %v3285_v3  ;;  %v3236_v59 = vpop.f32.mrf.mxu0  ;;  %v2940_v55 = vadd.f32 %v4620_v57, %v5863_v54 }
 0x1d6   : > { %v6093_v9 = vadd.f32 %v5878_v12, %v3288_v31  ;;  %v3287_v38 = vadd.f32 %v3236_v59, %v2937_v47  ;;  %v3509_v63 = vmax.f32 %v6074_v4, %v3483_v62  ;;  %v2939_v35 = vadd.f32 %v2896_v37, %v5865_v15 }
 0x1d7   : > { %v3421_v56 = vsel %vm3384_vm3, %v3418_v2, %v3420_v23  ;;  %v3423_v0 = vsel %vm3384_vm3, %v3420_v23, %v3422_v21  ;;  %v3348_v52 = vmax.f32 %v3320_v42, 0.0  ;;  %v4664_v17 = vpop.f32.mrf.mxu0  ;;  %v2942_v3 = vadd.f32 %v4623_v61, %v5869_v19  ;;  %v2906_v2 = vpop.f32.mrf.mxu1 }
 0x1d8   : > { %v6099_v11 = vmax.f32 %v3346_v36, %v3423_v0  ;;  %v3351_v39 = vmax.f32 %v6093_v9, 0.0  ;;  %v3322_v54 = vadd.f32 %v5878_v12, %v3287_v38  ;;  %v3290_v57 = vadd.f32 %v4664_v17, %v2940_v55  ;;  %v6354_v0 = vld [vmem:[#allocation2_spill] sm:$0xff] }
 0x1d9   : > { %v3426_v47 = vrot.slane %v3349_v7, 1  ;;  %v3424_v60 = vrot.slane %v3348_v52, 1  ;;  %v3246_v31 = vpop.f32.mrf.mxu0  ;;  %v6106_v15 = vmax.f32 %v3345_v6, %v3421_v56  ;;  %v2941_v17 = vadd.f32 %v2906_v2, %v6354_v0 }
 0x1da   : > { %v3430_v36 = vrot.slane %v3351_v39, 1  ;;  %v3350_v23 = vmax.f32 %v3322_v54, 0.0  ;;  %v3325_v42 = vadd.f32 %v5878_v12, %v3290_v57  ;;  %v3289_v19 = vadd.f32 %v3246_v31, %v2939_v35 }
 0x1db   : > { %v3425_v59 = vsel %vm3384_vm3, %v3422_v21, %v3424_v60  ;;  %v3427_v55 = vsel %vm3384_vm3, %v3424_v60, %v3426_v47  ;;  %v4667_v61 = vpop.f32.mrf.mxu0  ;;  %v3511_v9 = vmax.f32 %v3483_v62, %v6106_v15  ;;  %v6355_v57 = vmov 0.0  }
 0x1dc   : > { %v6114_v38 = vmax.f32 %v3348_v52, %v3427_v55  ;;  %v3428_v5 = vrot.slane %v3350_v23, 1  ;;  %v3353_v6 = vmax.f32 %v3325_v42, 0.0  ;;  %v3292_v56 = vadd.f32 %v4667_v61, %v2942_v3 }
 0x1dd   : > { %v3324_v37 = vadd.f32 %v5878_v12, %v3289_v19  ;;  %3562 = vmatpush1.msra.mxu1 %v3511_v9  ;;  %v3256_v54 = vpop.f32.mrf.mxu0  ;;  %v6120_v21 = vmax.f32 %v3347_v13, %v3425_v59  ;;  %v6356_v49 = vmax.f32 %v6081_v20, %v6099_v11 }
 0x1de   : > { %v3514_v35 = vmax.f32 %v6099_v11, %v6114_v38  ;;  %v3429_v62 = vsel %vm3384_vm3, %v3426_v47, %v3428_v5  ;;  %v3431_v52 = vsel %vm3384_vm3, %v3428_v5, %v3430_v36  ;;  %3563 = vmatprep.subr.mxu1 %v6355_v57  ;;  %v3327_v31 = vadd.f32 %v5878_v12, %v3292_v56 }
 0x1df   : > { %v6127_v3 = vmax.f32 %v3350_v23, %v3431_v52  ;;  %v3352_v60 = vmax.f32 %v3324_v37, 0.0  ;;  %v3291_v2 = vadd.f32 %v3256_v54, %v2941_v17  ;;  %3564 = vmatpush1.msra.mxu1 %v3510_v16  ;;  %v3434_v42 = vrot.slane %v3353_v6, 1 }
 0x1e0   : > { %3565 = vmatprep.subr.mxu1 %v6355_v57  ;;  %v6131_v40 = vmax.f32 %v3349_v7, %v3429_v62  ;;  %v3513_v13 = vmax.f32 %v6106_v15, %v6120_v21  ;;  %v3355_v55 = vmax.f32 %v3327_v31, 0.0 }
 0x1e1   : > { %v3516_v47 = vmax.f32 %v6114_v38, %v6127_v3  ;;  %v3432_v59 = vrot.slane %v3352_v60, 1  ;;  %v3326_v23 = vadd.f32 %v5878_v12, %v3291_v2  ;;  %3566 = vmatpush1.msra.mxu1 %v3509_v63 }
 0x1e2   : > { %3567 = vmatprep.subr.mxu1 %v6355_v57  ;;  %v3515_v16 = vmax.f32 %v6120_v21, %v6131_v40  ;;  %v3438_v9 = vrot.slane %v3355_v55, 1 }
 0x1e3   : > { %v3433_v37 = vsel %vm3384_vm3, %v3430_v36, %v3432_v59  ;;  %v3435_v7 = vsel %vm3384_vm3, %v3432_v59, %v3434_v42  ;;  %v3354_v19 = vmax.f32 %v3326_v23, 0.0  ;;  %3568 = vmatpush1.msra.mxu1 %v3508_v25 }
 0x1e4   : > { %v3492_v61 = vmax.f32 %v3352_v60, %v3435_v7  ;;  %3569 = vmatprep.subr.mxu1 %v6355_v57  ;;  %v3491_v12 = vmax.f32 %v3351_v39, %v3433_v37  ;;  %v3495_v25 = vmax.f32 %v3355_v55, %v3438_v9 }
 0x1e5   : > { %v3436_v63 = vrot.slane %v3354_v19, 1  ;;  %3570 = vmatpush1.msra.mxu1 %v3507_v8 }
 0x1e6   : > { %v3518_v5 = vmax.f32 %v6127_v3, %v3492_v61  ;;  %3571 = vmatprep.subr.mxu1 %v6355_v57  ;;  %v3517_v36 = vmax.f32 %v6131_v40, %v3491_v12 }
 0x1e7   : > { %v3437_v56 = vsel %vm3384_vm3, %v3434_v42, %v3436_v63  ;;  %v3439_v43 = vsel %vm3384_vm3, %v3436_v63, %v3438_v9  ;;  %3572 = vmatpush1.msra.mxu1 %v3506_v14 }
 0x1e8   : > { %v3493_v39 = vmax.f32 %v3353_v6, %v3437_v56  ;;  %v3494_v0 = vmax.f32 %v3354_v19, %v3439_v43  ;;  %3573 = vmatprep.subr.mxu1 %v6355_v57 }
 0x1e9   : > { %3574 = vmatpush1.msra.mxu1 %v3505_v24 }
 0x1ea   : > { %v3520_v4 = vmax.f32 %v3492_v61, %v3494_v0  ;;  %3575 = vmatprep.subr.mxu1 %v6355_v57  ;;  %v3521_v8 = vmax.f32 %v3493_v39, %v3495_v25  ;;  %v3519_v17 = vmax.f32 %v3491_v12, %v3493_v39 }
 0x1eb   : > { %3576 = vmatpush1.msra.mxu1 %v3504_v29 }
 0x1ec   : > { %3577 = vmatprep.subr.mxu1 %v6355_v57 }
 0x1ed   : > { %3578 = vmatpush1.msra.mxu1 %v3503_v28 }
 0x1ee   : > { %3579 = vmatprep.subr.mxu1 %v6355_v57 }
 0x1ef   : > { %3580 = vmatpush1.msra.mxu1 %v3502_v1 }
 0x1f0   : > { %3581 = vmatprep.subr.mxu1 %v6355_v57 }
 0x1f1   : > { %3582 = vmatpush1.msra.mxu1 %v3501_v44 }
 0x1f2   : > { %3583 = vmatprep.subr.mxu1 %v6355_v57 }
 0x1f3   : > { %3584 = vmatpush1.msra.mxu1 %v3500_v26  ;;  %v3530_v26 = vld [vmem:[%s6280_s3 + $0x40] sm:$0xff] }
 0x1f4   : > { %3585 = vmatprep.subr.mxu1 %v6355_v57 }
 0x1f5   : > { %3586 = vmatpush1.msra.mxu1 %v3499_v34  ;;  %v3532_v34 = vld [vmem:[%s6280_s3 + $0x50] sm:$0xff] }
 0x1f6   : > { %3587 = vmatprep.subr.mxu1 %v6355_v57 }
 0x1f7   : > { %3588 = vmatpush1.msra.mxu1 %v3498_v46  ;;  %v3529_v46 = vld [vmem:[%s6280_s3 + $0x38] sm:$0xff] }
 0x1f8   : > { %3589 = vmatprep.subr.mxu1 %v6355_v57 }
 0x1f9   : > { %3590 = vmatpush1.msra.mxu1 %v3497_v33  ;;  %v3533_v33 = vld [vmem:[%s6280_s3 + $0x58] sm:$0xff] }
 0x1fa   : > { %3591 = vmatprep.subr.mxu1 %v6355_v57 }
 0x1fb   : > { %3592 = vmatpush1.msra.mxu1 %v3496_v22  ;;  %v3524_v22 = vld [vmem:[%s6280_s3 + $0x10] sm:$0xff] }
 0x1fc   : > { %3605 = vmatprep.subr.mxu1 %v6355_v57 }
 0x1fd   : > { %4001 = vmatpush2.msk.msra.mxu1 %vm3384_vm3, %v3521_v8 }
 0x1fe   : > { %3607 = vmatprep.subr.mxu1 %v6355_v57 }
 0x1ff   : > { %3608 = vmatpush2.msra.mxu1 %v3520_v4 }
 0x200   : > { %3609 = vmatprep.subr.mxu1 %v6355_v57 }
 0x201   : > { %3610 = vmatpush2.msra.mxu1 %v3519_v17 }
 0x202   : > { %3611 = vmatprep.subr.mxu1 %v6355_v57 }
 0x203   : > { %3612 = vmatpush2.msra.mxu1 %v3518_v5 }
 0x204   : > { %3613 = vmatprep.subr.mxu1 %v6355_v57 }
 0x205   : > { %3614 = vmatpush2.msra.mxu1 %v3517_v36 }
 0x206   : > { %3615 = vmatprep.subr.mxu1 %v6355_v57 }
 0x207   : > { %3616 = vmatpush2.msra.mxu1 %v3516_v47 }
 0x208   : > { %3617 = vmatprep.subr.mxu1 %v6355_v57 }
 0x209   : > { %3618 = vmatpush2.msra.mxu1 %v3515_v16 }
 0x20a   : > { %3619 = vmatprep.subr.mxu1 %v6355_v57 }
 0x20b   : > { %3620 = vmatpush2.msra.mxu1 %v3514_v35 }
 0x20c   : > { %3621 = vmatprep.subr.mxu1 %v6355_v57 }
 0x20d   : > { %3622 = vmatpush2.msra.mxu1 %v3513_v13 }
 0x20e   : > { %3623 = vmatprep.subr.mxu1 %v6355_v57 }
 0x20f   : > { %3624 = vmatpush2.msra.mxu1 %v6356_v49 }
 0x210   : > { %3626 = vmatmul.mubr.f32.vlgmr.msra.gmra.mxu1 %v3522_v32 }
 0x211   : > { %4003 = vmatprep.mubr.msk.f32.mxu1 %vm3536_vm2, %v3525_v45 }
 0x214   : > { %3631 = vmatmul.mubr.f32.gmra.mxu1 %v3524_v22 }
 0x215   : > { %4004 = vmatprep.mubr.msk.f32.mxu1 %vm3536_vm2, %v3527_v51 }
 0x218   : > { %3636 = vmatmul.mubr.f32.gmra.mxu1 %v3526_v58 }
 0x219   : > { %4005 = vmatprep.mubr.msk.f32.mxu1 %vm3536_vm2, %v3529_v46 }
 0x21c   : > { %3641 = vmatmul.mubr.f32.gmra.mxu1 %v3528_v30 }
 0x21d   : > { %4006 = vmatprep.mubr.msk.f32.mxu1 %vm3536_vm2, %v3531_v18 }
 0x220   : > { %3646 = vmatmul.mubr.f32.gmra.mxu1 %v3530_v26 }
 0x221   : > { %4007 = vmatprep.mubr.msk.f32.mxu1 %vm3536_vm2, %v3533_v33 }
 0x224   : > { %3651 = vmatmul.mubr.f32.gmra.mxu1 %v3532_v34 }
 0x225   : > { %4008 = vmatprep.mubr.msk.f32.mxu1 %vm3536_vm2, %v3535_v50 }
 0x228   : > { %3656 = vmatmul.mubr.f32.gmra.mxu1 %v3534_v53 }
 0x2d0   : > { %v3627_v1 = vpop.f32.mrf.mxu1 }
 0x2d1   : > { %3662 = vst.msk [vmem:[%s197_s24] sm:$0xff] %vm3661_vm4, %v3627_v1 }
 0x2d2   : > { %v3629_v44 = vpop.f32.mrf.mxu1 }
 0x2d4   : > { %v3632_v27 = vpop.f32.mrf.mxu1 }
 0x2d5   : > { %3663 = vst.msk [vmem:[%s197_s24 + $0x8] sm:$0xff] %vm3661_vm4, %v3632_v27 }
 0x2d6   : > { %v3634_v41 = vpop.f32.mrf.mxu1 }
 0x2d8   : > { %v3637_v29 = vpop.f32.mrf.mxu1 }
 0x2d9   : > { %3664 = vst.msk [vmem:[%s197_s24 + $0x10] sm:$0xff] %vm3661_vm4, %v3637_v29 }
 0x2da   : > { %v3639_v48 = vpop.f32.mrf.mxu1 }
 0x2dc   : > { %v3642_v10 = vpop.f32.mrf.mxu1 }
 0x2dd   : > { %3665 = vst.msk [vmem:[%s197_s24 + $0x18] sm:$0xff] %vm3661_vm4, %v3642_v10 }
 0x2de   : > { %v3644_v14 = vpop.f32.mrf.mxu1 }
 0x2e0   : > { %v3647_v28 = vpop.f32.mrf.mxu1 }
 0x2e1   : > { %3666 = vst.msk [vmem:[%s197_s24 + $0x20] sm:$0xff] %vm3661_vm4, %v3647_v28 }
 0x2e2   : > { %v3649_v24 = vpop.f32.mrf.mxu1 }
 0x2e4   : > { %v3652_v20 = vpop.f32.mrf.mxu1 }
 0x2e5   : > { %3667 = vst.msk [vmem:[%s197_s24 + $0x28] sm:$0xff] %vm3661_vm4, %v3652_v20 }
 0x2e6   : > { %v3654_v11 = vpop.f32.mrf.mxu1 }
 0x2e8   : > { %v3657_v15 = vpop.f32.mrf.mxu1 }
 0x2e9   : > { %3668 = vst.msk [vmem:[%s197_s24 + $0x30] sm:$0xff] %vm3661_vm4, %v3657_v15 }
 0x2ea   : > { %v3659_v38 = vpop.f32.mrf.mxu1 }
 0x2eb PF: > { %s14_s15 = sadd.s32 1, %s4687_s15  }
 0x2ec   : > { %p11_p4 = scmp.ge.s32.totalorder %s14_s15, 4  }
 0x2ee   :  { %13 = sbr.rel (!%p11_p4) target bundleno = 1 (0x1), region = 74 }

</bundles_post_ra>
